<compile_context>
chip_gen: v5e
topology: v5e:2x2
jax: 0.10.0
libtpu: 0.0.40
codegen_flags: <defaults>
</compile_context>

<pallas_src>
import functools

import jax
import jax.numpy as jnp
from jax import lax
from jax.experimental import pallas as pl
from jax.experimental.pallas import tpu as pltpu


# ----------------------------------------------------------------------------
# Pallas kernels
# ----------------------------------------------------------------------------
def _conv_mm_kernel(w_ref, x_ref, b_ref, o_ref):
    """out(Cout, tn) = relu(W(Cout, K) @ cols(K, tn) + b(Cout, 1)).

    The spatial N*H*W axis sits on lanes -> unmasked, lane-dense stores.
    """
    y = jnp.dot(w_ref[...], x_ref[...], preferred_element_type=jnp.float32)
    y = y + b_ref[...]
    o_ref[...] = jnp.maximum(y, 0.0).astype(o_ref.dtype)


def _pick_tile(m, prefer=1024):
    if m <= prefer:
        return m
    for t in (prefer, 512, 256, 128):
        if m % t == 0:
            return t
    return m


def pallas_conv_matmul_relu(wmat, cols, b):
    """wmat:(Cout,K), cols:(K,M), b:(Cout,) -> relu(wmat @ cols + b) : (Cout,M)."""
    Cout, K = wmat.shape
    K2, M = cols.shape
    assert K == K2
    tn = _pick_tile(M)
    grid = (M // tn,)
    return pl.pallas_call(
        _conv_mm_kernel,
        out_shape=jax.ShapeDtypeStruct((Cout, M), jnp.float32),
        grid=grid,
        in_specs=[
            pl.BlockSpec((Cout, K), lambda i: (0, 0)),
            pl.BlockSpec((K, tn), lambda i: (0, i)),
            pl.BlockSpec((Cout, 1), lambda i: (0, 0)),
        ],
        out_specs=pl.BlockSpec((Cout, tn), lambda i: (0, i)),
        compiler_params=pltpu.CompilerParams(
            dimension_semantics=("parallel",)),
    )(wmat, cols, b.reshape(Cout, 1))


def _lstm_layer_kernel(x_ref, wx_ref, wh_ref, b_ref, out_ref, h_sc, c_sc, *,
                       hidden):
    """One LSTMCell_scratch layer over the whole sequence, recurrence in-kernel.

    x_ref:(T,B,D)  wx_ref:(D,4H)  wh_ref:(H,4H)  b_ref:(1,4H)  out_ref:(T,B,H)
    Gate order along the 4H axis: forget, input, cell, output (matches the
    PyTorch cell).  h, c live in VMEM scratch for the whole sequence.
    """
    T = x_ref.shape[0]
    H = hidden

    h_sc[...] = jnp.zeros(h_sc.shape, h_sc.dtype)
    c_sc[...] = jnp.zeros(c_sc.shape, c_sc.dtype)

    # Hoist weight loads out of the time loop.
    wx = wx_ref[...]
    wh = wh_ref[...]
    b = b_ref[...]

    def step(t, carry):
        x = x_ref[t]              # (B, D)
        h = h_sc[...]             # (B, H)
        c = c_sc[...]             # (B, H)
        # combined = cat([x, h]) @ W.T + b  ==  x @ Wx + h @ Wh + b, all gates fused
        gates = (jnp.dot(x, wx, preferred_element_type=jnp.float32)
                 + jnp.dot(h, wh, preferred_element_type=jnp.float32)
                 + b)                                   # (B, 4H)
        f_t = jax.nn.sigmoid(gates[:, 0 * H:1 * H])
        i_t = jax.nn.sigmoid(gates[:, 1 * H:2 * H])
        g_t = jnp.tanh(gates[:, 2 * H:3 * H])
        o_t = jax.nn.sigmoid(gates[:, 3 * H:4 * H])
        c_next = f_t * c + i_t * g_t
        h_next = o_t * jnp.tanh(c_next)
        c_sc[...] = c_next
        h_sc[...] = h_next
        out_ref[t] = h_next.astype(out_ref.dtype)
        return carry

    lax.fori_loop(0, T, step, 0, unroll=True)


def pallas_lstm_layer(x_tbd, wx, wh, b):
    """x_tbd:(T,B,D), wx:(D,4H), wh:(H,4H), b:(1,4H) -> (T,B,H)."""
    T, B, D = x_tbd.shape
    H = wh.shape[0]
    return pl.pallas_call(
        functools.partial(_lstm_layer_kernel, hidden=H),
        out_shape=jax.ShapeDtypeStruct((T, B, H), jnp.float32),
        scratch_shapes=[
            pltpu.VMEM((B, H), jnp.float32),   # h
            pltpu.VMEM((B, H), jnp.float32),   # c
        ],
    )(x_tbd, wx, wh, b)


def _classifier_kernel(x_ref, w1_ref, b1_ref, w2_ref, b2_ref, w3_ref, b3_ref,
                       o_ref):
    """Fused fc1+ReLU -> fc2+ReLU -> fc3; intermediates stay in VMEM."""
    z = jnp.dot(x_ref[...], w1_ref[...],
                preferred_element_type=jnp.float32) + b1_ref[...]
    z = jnp.maximum(z, 0.0)
    z = jnp.dot(z, w2_ref[...],
                preferred_element_type=jnp.float32) + b2_ref[...]
    z = jnp.maximum(z, 0.0)
    z = jnp.dot(z, w3_ref[...],
                preferred_element_type=jnp.float32) + b3_ref[...]
    o_ref[...] = z.astype(o_ref.dtype)


def pallas_classifier(x, w1, b1, w2, b2, w3, b3):
    B = x.shape[0]
    N = w3.shape[1]
    return pl.pallas_call(
        _classifier_kernel,
        out_shape=jax.ShapeDtypeStruct((B, N), jnp.float32),
    )(x, w1, b1.reshape(1, -1), w2, b2.reshape(1, -1), w3, b3.reshape(1, -1))


# ----------------------------------------------------------------------------
# JAX glue: channel-major im2col, pooling, parameter init, full forward
# ----------------------------------------------------------------------------
def im2col_3x3_T(x_cnhw):
    """(C, N, H, W) -> (C*9, N*H*W), K ordered (C, kh, kw) to match PyTorch's
    Conv2d weight.reshape(Cout, Cin*9)."""
    C, N, H, W = x_cnhw.shape
    xp = jnp.pad(x_cnhw, ((0, 0), (0, 0), (1, 1), (1, 1)))
    patches = [xp[:, :, kh:kh + H, kw:kw + W]
               for kh in range(3) for kw in range(3)]
    p = jnp.stack(patches, axis=1)            # (C, 9, N, H, W)
    return p.reshape(C * 9, N * H * W)


def conv3x3_relu(x_cnhw, w, b):
    """3x3 / stride 1 / pad 1 conv + ReLU in channel-major (C,N,H,W) layout."""
    Cout = w.shape[0]
    C, N, H, W = x_cnhw.shape
    # TODO(synk): fold the 3x3 gather into the Pallas kernel (9 shifted loads)
    # to avoid materializing the 9x im2col in HBM, especially for conv1 (C=1).
    cols = im2col_3x3_T(x_cnhw)               # (C*9, N*H*W)
    wmat = w.reshape(Cout, -1)                # (Cout, C*9)
    y = pallas_conv_matmul_relu(wmat, cols, b)   # (Cout, N*H*W), channel-major
    return y.reshape(Cout, N, H, W)


def maxpool2(x_cnhw):
    C, N, H, W = x_cnhw.shape
    return x_cnhw.reshape(C, N, H // 2, 2, W // 2, 2).max(axis=(3, 5))


def _uniform(key, shape, fan_in):
    bound = 1.0 / jnp.sqrt(jnp.float32(fan_in))
    return jax.random.uniform(key, shape, jnp.float32, -bound, bound)


def init_params(key, input_dim, hidden_dim, num_layers):
    keys = iter(jax.random.split(key, 64))
    p = {}
    # encoder convs
    p["conv1_w"] = _uniform(next(keys), (16, 1, 3, 3), 1 * 9)
    p["conv1_b"] = _uniform(next(keys), (16,), 1 * 9)
    p["conv2_w"] = _uniform(next(keys), (32, 16, 3, 3), 16 * 9)
    p["conv2_b"] = _uniform(next(keys), (32,), 16 * 9)
    p["conv3_w"] = _uniform(next(keys), (input_dim, 32, 3, 3), 32 * 9)
    p["conv3_b"] = _uniform(next(keys), (input_dim,), 32 * 9)
    # LSTMCell_scratch layers: per gate Linear(in+H, H); stored gate-fused as
    # wx:(D,4H), wh:(H,4H), b:(1,4H) with gate order forget, input, cell, output.
    p["lstm"] = []
    for layer in range(num_layers):
        d_in = input_dim if layer == 0 else hidden_dim
        fan = d_in + hidden_dim
        wx_parts, wh_parts, b_parts = [], [], []
        for _gate in range(4):   # forget, input, cell, output
            W = _uniform(next(keys), (fan, hidden_dim), fan)
            wx_parts.append(W[:d_in])
            wh_parts.append(W[d_in:])
            b_parts.append(_uniform(next(keys), (hidden_dim,), fan))
        p["lstm"].append({
            "wx": jnp.concatenate(wx_parts, axis=1),            # (d_in, 4H)
            "wh": jnp.concatenate(wh_parts, axis=1),            # (H, 4H)
            "b": jnp.concatenate(b_parts).reshape(1, -1),       # (1, 4H)
        })
    # classifier: hidden -> 128 -> 64 -> 6 (stored as (in, out))
    p["fc1_w"] = _uniform(next(keys), (hidden_dim, 128), hidden_dim)
    p["fc1_b"] = _uniform(next(keys), (128,), hidden_dim)
    p["fc2_w"] = _uniform(next(keys), (128, 64), 128)
    p["fc2_b"] = _uniform(next(keys), (64,), 128)
    p["fc3_w"] = _uniform(next(keys), (64, 6), 64)
    p["fc3_b"] = _uniform(next(keys), (6,), 64)
    return p


def forward(params, x):
    """x: (B, T, 1, H, W) float32 -> logits (B, 6)."""
    B, T, C, H, W = x.shape
    # channel-major encoder layout: (C, B*T, H, W)
    xf = x.reshape(B * T, C, H, W).transpose(1, 0, 2, 3)

    # encoder
    h1 = conv3x3_relu(xf, params["conv1_w"], params["conv1_b"])   # (16,BT,H,W)
    h1 = maxpool2(h1)                                             # (16,BT,H/2,W/2)
    h2 = conv3x3_relu(h1, params["conv2_w"], params["conv2_b"])
    h2 = maxpool2(h2)                                             # (32,BT,H/4,W/4)
    h3 = conv3x3_relu(h2, params["conv3_w"], params["conv3_b"])   # (D,BT,H/4,W/4)
    emb = h3.mean(axis=(2, 3))                                    # AdaptiveAvgPool2d -> (D, BT)
    emb = emb.T.reshape(B, T, -1).transpose(1, 0, 2)              # (T, B, input_dim)

    # stacked custom LSTM cells; each layer = one pallas_call, recurrence inside
    seq = emb
    for lp in params["lstm"]:
        seq = pallas_lstm_layer(seq, lp["wx"], lp["wh"], lp["b"])  # (T, B, hidden)

    # dropout p=0 -> Identity; fused classifier on last timestep
    last = seq[-1]                                                # (B, hidden)
    return pallas_classifier(last,
                             params["fc1_w"], params["fc1_b"],
                             params["fc2_w"], params["fc2_b"],
                             params["fc3_w"], params["fc3_b"])


if __name__ == "__main__":
    B, T, C, H, W = 2, 8, 1, 16, 16
    input_dim, hidden_dim, num_layers = 32, 32, 2

    key = jax.random.PRNGKey(0)
    pkey, xkey = jax.random.split(key)
    params = init_params(pkey, input_dim, hidden_dim, num_layers)
    x = jax.random.normal(xkey, (B, T, C, H, W), jnp.float32)

    fwd = jax.jit(forward)
    y = fwd(params, x)
    y = jax.block_until_ready(y)
    assert y.shape == (B, 6) and y.dtype == jnp.float32
    print("KERNEL_OK")
</pallas_src>

<mosaic_0001>
module attributes {stable_mosaic.version = 11 : i64} {
  func.func @_conv_mm_kernel(%arg0: i32, %arg1: memref<16x9xf32, #tpu.memory_space<vmem>>, %arg2: memref<9x1024xf32, #tpu.memory_space<vmem>>, %arg3: memref<16x1xf32, #tpu.memory_space<vmem>>, %arg4: memref<16x1024xf32, #tpu.memory_space<vmem>>) attributes {dimension_semantics = [#tpu.dimension_semantics<parallel>], iteration_bounds = array<i64: 4>, scalar_prefetch = 0 : i64, scratch_operands = 0 : i64, tpu.core_type = #tpu.core_type<tc>, window_params = [{pipeline_mode = #tpu.pipeline_mode<synchronous>, transform_indices = @transform_0, window_bounds = array<i64: 16, 9>}, {transform_indices = @transform_1, window_bounds = array<i64: 9, 1024>}, {pipeline_mode = #tpu.pipeline_mode<synchronous>, transform_indices = @transform_2, window_bounds = array<i64: 16, 1>}, {transform_indices = @transform_3, window_bounds = array<i64: 16, 1024>}]} {
    %c0 = arith.constant 0 : index
    %c0_0 = arith.constant 0 : index
    %0 = vector.load %arg1[%c0, %c0_0] : memref<16x9xf32, #tpu.memory_space<vmem>>, vector<16x9xf32>
    %c0_1 = arith.constant 0 : index
    %c0_2 = arith.constant 0 : index
    %1 = vector.load %arg2[%c0_1, %c0_2] : memref<9x1024xf32, #tpu.memory_space<vmem>>, vector<9x1024xf32>
    %cst = arith.constant dense<0.000000e+00> : vector<16x1024xf32>
    %2 = tpu.matmul %0, %1, %cst {dimension_numbers = #tpu.dot_dimension_numbers<[1], [0], [0], [1], [0, 0, 1, 1], [], []>} : vector<16x9xf32>, vector<9x1024xf32>, vector<16x1024xf32> -> vector<16x1024xf32>
    %c0_3 = arith.constant 0 : index
    %c0_4 = arith.constant 0 : index
    %3 = vector.load %arg3[%c0_3, %c0_4] : memref<16x1xf32, #tpu.memory_space<vmem>>, vector<16x1xf32>
    %4 = vector.broadcast %3 : vector<16x1xf32> to vector<16x1024xf32>
    %5 = arith.addf %2, %4 : vector<16x1024xf32>
    %cst_5 = arith.constant 0.000000e+00 : f32
    %6 = vector.broadcast %cst_5 : f32 to vector<16x1024xf32>
    %7 = arith.maximumf %5, %6 : vector<16x1024xf32>
    %c0_6 = arith.constant 0 : index
    %c0_7 = arith.constant 0 : index
    %8 = vector.load %arg4[%c0_6, %c0_7] : memref<16x1024xf32, #tpu.memory_space<vmem>>, vector<16x1024xf32>
    tpu.vector_store %arg4[%c0_6, %c0_7], %7 {strides = array<i32>} : memref<16x1024xf32, #tpu.memory_space<vmem>>, vector<16x1024xf32>,
    return
  }
  func.func @transform_0(%arg0: i32) -> (i32, i32) {
    %c0_i32 = arith.constant 0 : i32
    %c0_i32_0 = arith.constant 0 : i32
    %c0_i32_1 = arith.constant 0 : i32
    return %c0_i32, %c0_i32_0 : i32, i32
  }
  func.func @transform_1(%arg0: i32) -> (i32, i32) {
    %c0_i32 = arith.constant 0 : i32
    %c0_i32_0 = arith.constant 0 : i32
    return %c0_i32, %arg0 : i32, i32
  }
  func.func @transform_2(%arg0: i32) -> (i32, i32) {
    %c0_i32 = arith.constant 0 : i32
    %c0_i32_0 = arith.constant 0 : i32
    %c0_i32_1 = arith.constant 0 : i32
    return %c0_i32, %c0_i32_0 : i32, i32
  }
  func.func @transform_3(%arg0: i32) -> (i32, i32) {
    %c0_i32 = arith.constant 0 : i32
    %c0_i32_0 = arith.constant 0 : i32
    return %c0_i32, %arg0 : i32, i32
  }
}

module attributes {stable_mosaic.version = 11 : i64} {
  func.func @_conv_mm_kernel(%arg0: i32, %arg1: memref<32x144xf32, #tpu.memory_space<vmem>>, %arg2: memref<144x1024xf32, #tpu.memory_space<vmem>>, %arg3: memref<32x1xf32, #tpu.memory_space<vmem>>, %arg4: memref<32x1024xf32, #tpu.memory_space<vmem>>) attributes {dimension_semantics = [#tpu.dimension_semantics<parallel>], iteration_bounds = array<i64: 1>, scalar_prefetch = 0 : i64, scratch_operands = 0 : i64, tpu.core_type = #tpu.core_type<tc>, window_params = [{pipeline_mode = #tpu.pipeline_mode<synchronous>, transform_indices = @transform_0, window_bounds = array<i64: 32, 144>}, {transform_indices = @transform_1, window_bounds = array<i64: 144, 1024>}, {pipeline_mode = #tpu.pipeline_mode<synchronous>, transform_indices = @transform_2, window_bounds = array<i64: 32, 1>}, {transform_indices = @transform_3, window_bounds = array<i64: 32, 1024>}]} {
    %c0 = arith.constant 0 : index
    %c0_0 = arith.constant 0 : index
    %0 = vector.load %arg1[%c0, %c0_0] : memref<32x144xf32, #tpu.memory_space<vmem>>, vector<32x144xf32>
    %c0_1 = arith.constant 0 : index
    %c0_2 = arith.constant 0 : index
    %1 = vector.load %arg2[%c0_1, %c0_2] : memref<144x1024xf32, #tpu.memory_space<vmem>>, vector<144x1024xf32>
    %cst = arith.constant dense<0.000000e+00> : vector<32x1024xf32>
    %2 = tpu.matmul %0, %1, %cst {dimension_numbers = #tpu.dot_dimension_numbers<[1], [0], [0], [1], [0, 0, 1, 1], [], []>} : vector<32x144xf32>, vector<144x1024xf32>, vector<32x1024xf32> -> vector<32x1024xf32>
    %c0_3 = arith.constant 0 : index
    %c0_4 = arith.constant 0 : index
    %3 = vector.load %arg3[%c0_3, %c0_4] : memref<32x1xf32, #tpu.memory_space<vmem>>, vector<32x1xf32>
    %4 = vector.broadcast %3 : vector<32x1xf32> to vector<32x1024xf32>
    %5 = arith.addf %2, %4 : vector<32x1024xf32>
    %cst_5 = arith.constant 0.000000e+00 : f32
    %6 = vector.broadcast %cst_5 : f32 to vector<32x1024xf32>
    %7 = arith.maximumf %5, %6 : vector<32x1024xf32>
    %c0_6 = arith.constant 0 : index
    %c0_7 = arith.constant 0 : index
    %8 = vector.load %arg4[%c0_6, %c0_7] : memref<32x1024xf32, #tpu.memory_space<vmem>>, vector<32x1024xf32>
    tpu.vector_store %arg4[%c0_6, %c0_7], %7 {strides = array<i32>} : memref<32x1024xf32, #tpu.memory_space<vmem>>, vector<32x1024xf32>,
    return
  }
  func.func @transform_0(%arg0: i32) -> (i32, i32) {
    %c0_i32 = arith.constant 0 : i32
    %c0_i32_0 = arith.constant 0 : i32
    %c0_i32_1 = arith.constant 0 : i32
    return %c0_i32, %c0_i32_0 : i32, i32
  }
  func.func @transform_1(%arg0: i32) -> (i32, i32) {
    %c0_i32 = arith.constant 0 : i32
    %c0_i32_0 = arith.constant 0 : i32
    return %c0_i32, %arg0 : i32, i32
  }
  func.func @transform_2(%arg0: i32) -> (i32, i32) {
    %c0_i32 = arith.constant 0 : i32
    %c0_i32_0 = arith.constant 0 : i32
    %c0_i32_1 = arith.constant 0 : i32
    return %c0_i32, %c0_i32_0 : i32, i32
  }
  func.func @transform_3(%arg0: i32) -> (i32, i32) {
    %c0_i32 = arith.constant 0 : i32
    %c0_i32_0 = arith.constant 0 : i32
    return %c0_i32, %arg0 : i32, i32
  }
}

module attributes {stable_mosaic.version = 11 : i64} {
  func.func @_conv_mm_kernel(%arg0: i32, %arg1: memref<32x288xf32, #tpu.memory_space<vmem>>, %arg2: memref<288x256xf32, #tpu.memory_space<vmem>>, %arg3: memref<32x1xf32, #tpu.memory_space<vmem>>, %arg4: memref<32x256xf32, #tpu.memory_space<vmem>>) attributes {dimension_semantics = [#tpu.dimension_semantics<parallel>], iteration_bounds = array<i64: 1>, scalar_prefetch = 0 : i64, scratch_operands = 0 : i64, tpu.core_type = #tpu.core_type<tc>, window_params = [{pipeline_mode = #tpu.pipeline_mode<synchronous>, transform_indices = @transform_0, window_bounds = array<i64: 32, 288>}, {transform_indices = @transform_1, window_bounds = array<i64: 288, 256>}, {pipeline_mode = #tpu.pipeline_mode<synchronous>, transform_indices = @transform_2, window_bounds = array<i64: 32, 1>}, {transform_indices = @transform_3, window_bounds = array<i64: 32, 256>}]} {
    %c0 = arith.constant 0 : index
    %c0_0 = arith.constant 0 : index
    %0 = vector.load %arg1[%c0, %c0_0] : memref<32x288xf32, #tpu.memory_space<vmem>>, vector<32x288xf32>
    %c0_1 = arith.constant 0 : index
    %c0_2 = arith.constant 0 : index
    %1 = vector.load %arg2[%c0_1, %c0_2] : memref<288x256xf32, #tpu.memory_space<vmem>>, vector<288x256xf32>
    %cst = arith.constant dense<0.000000e+00> : vector<32x256xf32>
    %2 = tpu.matmul %0, %1, %cst {dimension_numbers = #tpu.dot_dimension_numbers<[1], [0], [0], [1], [0, 0, 1, 1], [], []>} : vector<32x288xf32>, vector<288x256xf32>, vector<32x256xf32> -> vector<32x256xf32>
    %c0_3 = arith.constant 0 : index
    %c0_4 = arith.constant 0 : index
    %3 = vector.load %arg3[%c0_3, %c0_4] : memref<32x1xf32, #tpu.memory_space<vmem>>, vector<32x1xf32>
    %4 = vector.broadcast %3 : vector<32x1xf32> to vector<32x256xf32>
    %5 = arith.addf %2, %4 : vector<32x256xf32>
    %cst_5 = arith.constant 0.000000e+00 : f32
    %6 = vector.broadcast %cst_5 : f32 to vector<32x256xf32>
    %7 = arith.maximumf %5, %6 : vector<32x256xf32>
    %c0_6 = arith.constant 0 : index
    %c0_7 = arith.constant 0 : index
    %8 = vector.load %arg4[%c0_6, %c0_7] : memref<32x256xf32, #tpu.memory_space<vmem>>, vector<32x256xf32>
    tpu.vector_store %arg4[%c0_6, %c0_7], %7 {strides = array<i32>} : memref<32x256xf32, #tpu.memory_space<vmem>>, vector<32x256xf32>,
    return
  }
  func.func @transform_0(%arg0: i32) -> (i32, i32) {
    %c0_i32 = arith.constant 0 : i32
    %c0_i32_0 = arith.constant 0 : i32
    %c0_i32_1 = arith.constant 0 : i32
    return %c0_i32, %c0_i32_0 : i32, i32
  }
  func.func @transform_1(%arg0: i32) -> (i32, i32) {
    %c0_i32 = arith.constant 0 : i32
    %c0_i32_0 = arith.constant 0 : i32
    return %c0_i32, %arg0 : i32, i32
  }
  func.func @transform_2(%arg0: i32) -> (i32, i32) {
    %c0_i32 = arith.constant 0 : i32
    %c0_i32_0 = arith.constant 0 : i32
    %c0_i32_1 = arith.constant 0 : i32
    return %c0_i32, %c0_i32_0 : i32, i32
  }
  func.func @transform_3(%arg0: i32) -> (i32, i32) {
    %c0_i32 = arith.constant 0 : i32
    %c0_i32_0 = arith.constant 0 : i32
    return %c0_i32, %arg0 : i32, i32
  }
}

module attributes {stable_mosaic.version = 11 : i64} {
  func.func @_lstm_layer_kernel(%arg0: memref<8x2x32xf32, #tpu.memory_space<vmem>>, %arg1: memref<32x128xf32, #tpu.memory_space<vmem>>, %arg2: memref<32x128xf32, #tpu.memory_space<vmem>>, %arg3: memref<1x128xf32, #tpu.memory_space<vmem>>, %arg4: memref<8x2x32xf32, #tpu.memory_space<vmem>>, %arg5: memref<2x32xf32, #tpu.memory_space<vmem>>, %arg6: memref<2x32xf32, #tpu.memory_space<vmem>>) attributes {dimension_semantics = [], scalar_prefetch = 0 : i64, scratch_operands = 2 : i64, tpu.core_type = #tpu.core_type<tc>} {
    %cst = arith.constant 0.000000e+00 : f32
    %0 = vector.broadcast %cst : f32 to vector<2x32xf32>
    %c0 = arith.constant 0 : index
    %c0_0 = arith.constant 0 : index
    %1 = vector.load %arg5[%c0, %c0_0] : memref<2x32xf32, #tpu.memory_space<vmem>>, vector<2x32xf32>
    tpu.vector_store %arg5[%c0, %c0_0], %0 {strides = array<i32>} : memref<2x32xf32, #tpu.memory_space<vmem>>, vector<2x32xf32>,
    %cst_1 = arith.constant 0.000000e+00 : f32
    %2 = vector.broadcast %cst_1 : f32 to vector<2x32xf32>
    %c0_2 = arith.constant 0 : index
    %c0_3 = arith.constant 0 : index
    %3 = vector.load %arg6[%c0_2, %c0_3] : memref<2x32xf32, #tpu.memory_space<vmem>>, vector<2x32xf32>
    tpu.vector_store %arg6[%c0_2, %c0_3], %2 {strides = array<i32>} : memref<2x32xf32, #tpu.memory_space<vmem>>, vector<2x32xf32>,
    %c0_4 = arith.constant 0 : index
    %c0_5 = arith.constant 0 : index
    %4 = vector.load %arg1[%c0_4, %c0_5] : memref<32x128xf32, #tpu.memory_space<vmem>>, vector<32x128xf32>
    %c0_6 = arith.constant 0 : index
    %c0_7 = arith.constant 0 : index
    %5 = vector.load %arg2[%c0_6, %c0_7] : memref<32x128xf32, #tpu.memory_space<vmem>>, vector<32x128xf32>
    %c0_8 = arith.constant 0 : index
    %c0_9 = arith.constant 0 : index
    %6 = vector.load %arg3[%c0_8, %c0_9] : memref<1x128xf32, #tpu.memory_space<vmem>>, vector<1x128xf32>
    %c0_i32 = arith.constant 0 : i32
    %7 = arith.index_cast %c0_i32 : i32 to index
    %c0_10 = arith.constant 0 : index
    %c0_11 = arith.constant 0 : index
    %8 = vector.load %arg0[%7, %c0_10, %c0_11] : memref<8x2x32xf32, #tpu.memory_space<vmem>>, vector<1x2x32xf32>
    %9 = vector.shape_cast %8 : vector<1x2x32xf32> to vector<2x32xf32>
    %c0_12 = arith.constant 0 : index
    %c0_13 = arith.constant 0 : index
    %10 = vector.load %arg5[%c0_12, %c0_13] : memref<2x32xf32, #tpu.memory_space<vmem>>, vector<2x32xf32>
    %c0_14 = arith.constant 0 : index
    %c0_15 = arith.constant 0 : index
    %11 = vector.load %arg6[%c0_14, %c0_15] : memref<2x32xf32, #tpu.memory_space<vmem>>, vector<2x32xf32>
    %cst_16 = arith.constant dense<0.000000e+00> : vector<2x128xf32>
    %12 = tpu.matmul %9, %4, %cst_16 {dimension_numbers = #tpu.dot_dimension_numbers<[1], [0], [0], [1], [0, 0, 1, 1], [], []>} : vector<2x32xf32>, vector<32x128xf32>, vector<2x128xf32> -> vector<2x128xf32>
    %cst_17 = arith.constant dense<0.000000e+00> : vector<2x128xf32>
    %13 = tpu.matmul %10, %5, %cst_17 {dimension_numbers = #tpu.dot_dimension_numbers<[1], [0], [0], [1], [0, 0, 1, 1], [], []>} : vector<2x32xf32>, vector<32x128xf32>, vector<2x128xf32> -> vector<2x128xf32>
    %14 = arith.addf %12, %13 : vector<2x128xf32>
    %15 = vector.broadcast %6 : vector<1x128xf32> to vector<2x128xf32>
    %16 = arith.addf %14, %15 : vector<2x128xf32>
    %17 = vector.extract_strided_slice %16 {offsets = [0, 0], sizes = [2, 32], strides = [1, 1]} : vector<2x128xf32> to vector<2x32xf32>
    %18 = arith.negf %17 : vector<2x32xf32>
    %19 = math.exp %18 : vector<2x32xf32>
    %cst_18 = arith.constant 1.000000e+00 : f32
    %20 = vector.broadcast %cst_18 : f32 to vector<2x32xf32>
    %21 = arith.addf %20, %19 : vector<2x32xf32>
    %22 = arith.divf %20, %21 : vector<2x32xf32>
    %23 = vector.extract_strided_slice %16 {offsets = [0, 32], sizes = [2, 32], strides = [1, 1]} : vector<2x128xf32> to vector<2x32xf32>
    %24 = arith.negf %23 : vector<2x32xf32>
    %25 = math.exp %24 : vector<2x32xf32>
    %cst_19 = arith.constant 1.000000e+00 : f32
    %26 = vector.broadcast %cst_19 : f32 to vector<2x32xf32>
    %27 = arith.addf %26, %25 : vector<2x32xf32>
    %28 = arith.divf %26, %27 : vector<2x32xf32>
    %29 = vector.extract_strided_slice %16 {offsets = [0, 64], sizes = [2, 32], strides = [1, 1]} : vector<2x128xf32> to vector<2x32xf32>
    %30 = math.tanh %29 : vector<2x32xf32>
    %31 = vector.extract_strided_slice %16 {offsets = [0, 96], sizes = [2, 32], strides = [1, 1]} : vector<2x128xf32> to vector<2x32xf32>
    %32 = arith.negf %31 : vector<2x32xf32>
    %33 = math.exp %32 : vector<2x32xf32>
    %cst_20 = arith.constant 1.000000e+00 : f32
    %34 = vector.broadcast %cst_20 : f32 to vector<2x32xf32>
    %35 = arith.addf %34, %33 : vector<2x32xf32>
    %36 = arith.divf %34, %35 : vector<2x32xf32>
    %37 = arith.mulf %22, %11 : vector<2x32xf32>
    %38 = arith.mulf %28, %30 : vector<2x32xf32>
    %39 = arith.addf %37, %38 : vector<2x32xf32>
    %40 = math.tanh %39 : vector<2x32xf32>
    %41 = arith.mulf %36, %40 : vector<2x32xf32>
    %c0_21 = arith.constant 0 : index
    %c0_22 = arith.constant 0 : index
    %42 = vector.load %arg6[%c0_21, %c0_22] : memref<2x32xf32, #tpu.memory_space<vmem>>, vector<2x32xf32>
    tpu.vector_store %arg6[%c0_21, %c0_22], %39 {strides = array<i32>} : memref<2x32xf32, #tpu.memory_space<vmem>>, vector<2x32xf32>,
    %c0_23 = arith.constant 0 : index
    %c0_24 = arith.constant 0 : index
    %43 = vector.load %arg5[%c0_23, %c0_24] : memref<2x32xf32, #tpu.memory_space<vmem>>, vector<2x32xf32>
    tpu.vector_store %arg5[%c0_23, %c0_24], %41 {strides = array<i32>} : memref<2x32xf32, #tpu.memory_space<vmem>>, vector<2x32xf32>,
    %44 = arith.index_cast %c0_i32 : i32 to index
    %c0_25 = arith.constant 0 : index
    %c0_26 = arith.constant 0 : index
    %45 = vector.load %arg4[%44, %c0_25, %c0_26] : memref<8x2x32xf32, #tpu.memory_space<vmem>>, vector<1x2x32xf32>
    %46 = vector.shape_cast %45 : vector<1x2x32xf32> to vector<2x32xf32>
    %47 = vector.shape_cast %41 : vector<2x32xf32> to vector<1x2x32xf32>
    tpu.vector_store %arg4[%44, %c0_25, %c0_26], %47 {strides = array<i32>} : memref<8x2x32xf32, #tpu.memory_space<vmem>>, vector<1x2x32xf32>,
    %c1_i32 = arith.constant 1 : i32
    %48 = arith.index_cast %c1_i32 : i32 to index
    %c0_27 = arith.constant 0 : index
    %c0_28 = arith.constant 0 : index
    %49 = vector.load %arg0[%48, %c0_27, %c0_28] : memref<8x2x32xf32, #tpu.memory_space<vmem>>, vector<1x2x32xf32>
    %50 = vector.shape_cast %49 : vector<1x2x32xf32> to vector<2x32xf32>
    %c0_29 = arith.constant 0 : index
    %c0_30 = arith.constant 0 : index
    %51 = vector.load %arg5[%c0_29, %c0_30] : memref<2x32xf32, #tpu.memory_space<vmem>>, vector<2x32xf32>
    %c0_31 = arith.constant 0 : index
    %c0_32 = arith.constant 0 : index
    %52 = vector.load %arg6[%c0_31, %c0_32] : memref<2x32xf32, #tpu.memory_space<vmem>>, vector<2x32xf32>
    %cst_33 = arith.constant dense<0.000000e+00> : vector<2x128xf32>
    %53 = tpu.matmul %50, %4, %cst_33 {dimension_numbers = #tpu.dot_dimension_numbers<[1], [0], [0], [1], [0, 0, 1, 1], [], []>} : vector<2x32xf32>, vector<32x128xf32>, vector<2x128xf32> -> vector<2x128xf32>
    %cst_34 = arith.constant dense<0.000000e+00> : vector<2x128xf32>
    %54 = tpu.matmul %51, %5, %cst_34 {dimension_numbers = #tpu.dot_dimension_numbers<[1], [0], [0], [1], [0, 0, 1, 1], [], []>} : vector<2x32xf32>, vector<32x128xf32>, vector<2x128xf32> -> vector<2x128xf32>
    %55 = arith.addf %53, %54 : vector<2x128xf32>
    %56 = vector.broadcast %6 : vector<1x128xf32> to vector<2x128xf32>
    %57 = arith.addf %55, %56 : vector<2x128xf32>
    %58 = vector.extract_strided_slice %57 {offsets = [0, 0], sizes = [2, 32], strides = [1, 1]} : vector<2x128xf32> to vector<2x32xf32>
    %59 = arith.negf %58 : vector<2x32xf32>
    %60 = math.exp %59 : vector<2x32xf32>
    %cst_35 = arith.constant 1.000000e+00 : f32
    %61 = vector.broadcast %cst_35 : f32 to vector<2x32xf32>
    %62 = arith.addf %61, %60 : vector<2x32xf32>
    %63 = arith.divf %61, %62 : vector<2x32xf32>
    %64 = vector.extract_strided_slice %57 {offsets = [0, 32], sizes = [2, 32], strides = [1, 1]} : vector<2x128xf32> to vector<2x32xf32>
    %65 = arith.negf %64 : vector<2x32xf32>
    %66 = math.exp %65 : vector<2x32xf32>
    %cst_36 = arith.constant 1.000000e+00 : f32
    %67 = vector.broadcast %cst_36 : f32 to vector<2x32xf32>
    %68 = arith.addf %67, %66 : vector<2x32xf32>
    %69 = arith.divf %67, %68 : vector<2x32xf32>
    %70 = vector.extract_strided_slice %57 {offsets = [0, 64], sizes = [2, 32], strides = [1, 1]} : vector<2x128xf32> to vector<2x32xf32>
    %71 = math.tanh %70 : vector<2x32xf32>
    %72 = vector.extract_strided_slice %57 {offsets = [0, 96], sizes = [2, 32], strides = [1, 1]} : vector<2x128xf32> to vector<2x32xf32>
    %73 = arith.negf %72 : vector<2x32xf32>
    %74 = math.exp %73 : vector<2x32xf32>
    %cst_37 = arith.constant 1.000000e+00 : f32
    %75 = vector.broadcast %cst_37 : f32 to vector<2x32xf32>
    %76 = arith.addf %75, %74 : vector<2x32xf32>
    %77 = arith.divf %75, %76 : vector<2x32xf32>
    %78 = arith.mulf %63, %52 : vector<2x32xf32>
    %79 = arith.mulf %69, %71 : vector<2x32xf32>
    %80 = arith.addf %78, %79 : vector<2x32xf32>
    %81 = math.tanh %80 : vector<2x32xf32>
    %82 = arith.mulf %77, %81 : vector<2x32xf32>
    %c0_38 = arith.constant 0 : index
    %c0_39 = arith.constant 0 : index
    %83 = vector.load %arg6[%c0_38, %c0_39] : memref<2x32xf32, #tpu.memory_space<vmem>>, vector<2x32xf32>
    tpu.vector_store %arg6[%c0_38, %c0_39], %80 {strides = array<i32>} : memref<2x32xf32, #tpu.memory_space<vmem>>, vector<2x32xf32>,
    %c0_40 = arith.constant 0 : index
    %c0_41 = arith.constant 0 : index
    %84 = vector.load %arg5[%c0_40, %c0_41] : memref<2x32xf32, #tpu.memory_space<vmem>>, vector<2x32xf32>
    tpu.vector_store %arg5[%c0_40, %c0_41], %82 {strides = array<i32>} : memref<2x32xf32, #tpu.memory_space<vmem>>, vector<2x32xf32>,
    %85 = arith.index_cast %c1_i32 : i32 to index
    %c0_42 = arith.constant 0 : index
    %c0_43 = arith.constant 0 : index
    %86 = vector.load %arg4[%85, %c0_42, %c0_43] : memref<8x2x32xf32, #tpu.memory_space<vmem>>, vector<1x2x32xf32>
    %87 = vector.shape_cast %86 : vector<1x2x32xf32> to vector<2x32xf32>
    %88 = vector.shape_cast %82 : vector<2x32xf32> to vector<1x2x32xf32>
    tpu.vector_store %arg4[%85, %c0_42, %c0_43], %88 {strides = array<i32>} : memref<8x2x32xf32, #tpu.memory_space<vmem>>, vector<1x2x32xf32>,
    %c2_i32 = arith.constant 2 : i32
    %89 = arith.index_cast %c2_i32 : i32 to index
    %c0_44 = arith.constant 0 : index
    %c0_45 = arith.constant 0 : index
    %90 = vector.load %arg0[%89, %c0_44, %c0_45] : memref<8x2x32xf32, #tpu.memory_space<vmem>>, vector<1x2x32xf32>
    %91 = vector.shape_cast %90 : vector<1x2x32xf32> to vector<2x32xf32>
    %c0_46 = arith.constant 0 : index
    %c0_47 = arith.constant 0 : index
    %92 = vector.load %arg5[%c0_46, %c0_47] : memref<2x32xf32, #tpu.memory_space<vmem>>, vector<2x32xf32>
    %c0_48 = arith.constant 0 : index
    %c0_49 = arith.constant 0 : index
    %93 = vector.load %arg6[%c0_48, %c0_49] : memref<2x32xf32, #tpu.memory_space<vmem>>, vector<2x32xf32>
    %cst_50 = arith.constant dense<0.000000e+00> : vector<2x128xf32>
    %94 = tpu.matmul %91, %4, %cst_50 {dimension_numbers = #tpu.dot_dimension_numbers<[1], [0], [0], [1], [0, 0, 1, 1], [], []>} : vector<2x32xf32>, vector<32x128xf32>, vector<2x128xf32> -> vector<2x128xf32>
    %cst_51 = arith.constant dense<0.000000e+00> : vector<2x128xf32>
    %95 = tpu.matmul %92, %5, %cst_51 {dimension_numbers = #tpu.dot_dimension_numbers<[1], [0], [0], [1], [0, 0, 1, 1], [], []>} : vector<2x32xf32>, vector<32x128xf32>, vector<2x128xf32> -> vector<2x128xf32>
    %96 = arith.addf %94, %95 : vector<2x128xf32>
    %97 = vector.broadcast %6 : vector<1x128xf32> to vector<2x128xf32>
    %98 = arith.addf %96, %97 : vector<2x128xf32>
    %99 = vector.extract_strided_slice %98 {offsets = [0, 0], sizes = [2, 32], strides = [1, 1]} : vector<2x128xf32> to vector<2x32xf32>
    %100 = arith.negf %99 : vector<2x32xf32>
    %101 = math.exp %100 : vector<2x32xf32>
    %cst_52 = arith.constant 1.000000e+00 : f32
    %102 = vector.broadcast %cst_52 : f32 to vector<2x32xf32>
    %103 = arith.addf %102, %101 : vector<2x32xf32>
    %104 = arith.divf %102, %103 : vector<2x32xf32>
    %105 = vector.extract_strided_slice %98 {offsets = [0, 32], sizes = [2, 32], strides = [1, 1]} : vector<2x128xf32> to vector<2x32xf32>
    %106 = arith.negf %105 : vector<2x32xf32>
    %107 = math.exp %106 : vector<2x32xf32>
    %cst_53 = arith.constant 1.000000e+00 : f32
    %108 = vector.broadcast %cst_53 : f32 to vector<2x32xf32>
    %109 = arith.addf %108, %107 : vector<2x32xf32>
    %110 = arith.divf %108, %109 : vector<2x32xf32>
    %111 = vector.extract_strided_slice %98 {offsets = [0, 64], sizes = [2, 32], strides = [1, 1]} : vector<2x128xf32> to vector<2x32xf32>
    %112 = math.tanh %111 : vector<2x32xf32>
    %113 = vector.extract_strided_slice %98 {offsets = [0, 96], sizes = [2, 32], strides = [1, 1]} : vector<2x128xf32> to vector<2x32xf32>
    %114 = arith.negf %113 : vector<2x32xf32>
    %115 = math.exp %114 : vector<2x32xf32>
    %cst_54 = arith.constant 1.000000e+00 : f32
    %116 = vector.broadcast %cst_54 : f32 to vector<2x32xf32>
    %117 = arith.addf %116, %115 : vector<2x32xf32>
    %118 = arith.divf %116, %117 : vector<2x32xf32>
    %119 = arith.mulf %104, %93 : vector<2x32xf32>
    %120 = arith.mulf %110, %112 : vector<2x32xf32>
    %121 = arith.addf %119, %120 : vector<2x32xf32>
    %122 = math.tanh %121 : vector<2x32xf32>
    %123 = arith.mulf %118, %122 : vector<2x32xf32>
    %c0_55 = arith.constant 0 : index
    %c0_56 = arith.constant 0 : index
    %124 = vector.load %arg6[%c0_55, %c0_56] : memref<2x32xf32, #tpu.memory_space<vmem>>, vector<2x32xf32>
    tpu.vector_store %arg6[%c0_55, %c0_56], %121 {strides = array<i32>} : memref<2x32xf32, #tpu.memory_space<vmem>>, vector<2x32xf32>,
    %c0_57 = arith.constant 0 : index
    %c0_58 = arith.constant 0 : index
    %125 = vector.load %arg5[%c0_57, %c0_58] : memref<2x32xf32, #tpu.memory_space<vmem>>, vector<2x32xf32>
    tpu.vector_store %arg5[%c0_57, %c0_58], %123 {strides = array<i32>} : memref<2x32xf32, #tpu.memory_space<vmem>>, vector<2x32xf32>,
    %126 = arith.index_cast %c2_i32 : i32 to index
    %c0_59 = arith.constant 0 : index
    %c0_60 = arith.constant 0 : index
    %127 = vector.load %arg4[%126, %c0_59, %c0_60] : memref<8x2x32xf32, #tpu.memory_space<vmem>>, vector<1x2x32xf32>
    %128 = vector.shape_cast %127 : vector<1x2x32xf32> to vector<2x32xf32>
    %129 = vector.shape_cast %123 : vector<2x32xf32> to vector<1x2x32xf32>
    tpu.vector_store %arg4[%126, %c0_59, %c0_60], %129 {strides = array<i32>} : memref<8x2x32xf32, #tpu.memory_space<vmem>>, vector<1x2x32xf32>,
    %c3_i32 = arith.constant 3 : i32
    %130 = arith.index_cast %c3_i32 : i32 to index
    %c0_61 = arith.constant 0 : index
    %c0_62 = arith.constant 0 : index
    %131 = vector.load %arg0[%130, %c0_61, %c0_62] : memref<8x2x32xf32, #tpu.memory_space<vmem>>, vector<1x2x32xf32>
    %132 = vector.shape_cast %131 : vector<1x2x32xf32> to vector<2x32xf32>
    %c0_63 = arith.constant 0 : index
    %c0_64 = arith.constant 0 : index
    %133 = vector.load %arg5[%c0_63, %c0_64] : memref<2x32xf32, #tpu.memory_space<vmem>>, vector<2x32xf32>
    %c0_65 = arith.constant 0 : index
    %c0_66 = arith.constant 0 : index
    %134 = vector.load %arg6[%c0_65, %c0_66] : memref<2x32xf32, #tpu.memory_space<vmem>>, vector<2x32xf32>
    %cst_67 = arith.constant dense<0.000000e+00> : vector<2x128xf32>
    %135 = tpu.matmul %132, %4, %cst_67 {dimension_numbers = #tpu.dot_dimension_numbers<[1], [0], [0], [1], [0, 0, 1, 1], [], []>} : vector<2x32xf32>, vector<32x128xf32>, vector<2x128xf32> -> vector<2x128xf32>
    %cst_68 = arith.constant dense<0.000000e+00> : vector<2x128xf32>
    %136 = tpu.matmul %133, %5, %cst_68 {dimension_numbers = #tpu.dot_dimension_numbers<[1], [0], [0], [1], [0, 0, 1, 1], [], []>} : vector<2x32xf32>, vector<32x128xf32>, vector<2x128xf32> -> vector<2x128xf32>
    %137 = arith.addf %135, %136 : vector<2x128xf32>
    %138 = vector.broadcast %6 : vector<1x128xf32> to vector<2x128xf32>
    %139 = arith.addf %137, %138 : vector<2x128xf32>
    %140 = vector.extract_strided_slice %139 {offsets = [0, 0], sizes = [2, 32], strides = [1, 1]} : vector<2x128xf32> to vector<2x32xf32>
    %141 = arith.negf %140 : vector<2x32xf32>
    %142 = math.exp %141 : vector<2x32xf32>
    %cst_69 = arith.constant 1.000000e+00 : f32
    %143 = vector.broadcast %cst_69 : f32 to vector<2x32xf32>
    %144 = arith.addf %143, %142 : vector<2x32xf32>
    %145 = arith.divf %143, %144 : vector<2x32xf32>
    %146 = vector.extract_strided_slice %139 {offsets = [0, 32], sizes = [2, 32], strides = [1, 1]} : vector<2x128xf32> to vector<2x32xf32>
    %147 = arith.negf %146 : vector<2x32xf32>
    %148 = math.exp %147 : vector<2x32xf32>
    %cst_70 = arith.constant 1.000000e+00 : f32
    %149 = vector.broadcast %cst_70 : f32 to vector<2x32xf32>
    %150 = arith.addf %149, %148 : vector<2x32xf32>
    %151 = arith.divf %149, %150 : vector<2x32xf32>
    %152 = vector.extract_strided_slice %139 {offsets = [0, 64], sizes = [2, 32], strides = [1, 1]} : vector<2x128xf32> to vector<2x32xf32>
    %153 = math.tanh %152 : vector<2x32xf32>
    %154 = vector.extract_strided_slice %139 {offsets = [0, 96], sizes = [2, 32], strides = [1, 1]} : vector<2x128xf32> to vector<2x32xf32>
    %155 = arith.negf %154 : vector<2x32xf32>
    %156 = math.exp %155 : vector<2x32xf32>
    %cst_71 = arith.constant 1.000000e+00 : f32
    %157 = vector.broadcast %cst_71 : f32 to vector<2x32xf32>
    %158 = arith.addf %157, %156 : vector<2x32xf32>
    %159 = arith.divf %157, %158 : vector<2x32xf32>
    %160 = arith.mulf %145, %134 : vector<2x32xf32>
    %161 = arith.mulf %151, %153 : vector<2x32xf32>
    %162 = arith.addf %160, %161 : vector<2x32xf32>
    %163 = math.tanh %162 : vector<2x32xf32>
    %164 = arith.mulf %159, %163 : vector<2x32xf32>
    %c0_72 = arith.constant 0 : index
    %c0_73 = arith.constant 0 : index
    %165 = vector.load %arg6[%c0_72, %c0_73] : memref<2x32xf32, #tpu.memory_space<vmem>>, vector<2x32xf32>
    tpu.vector_store %arg6[%c0_72, %c0_73], %162 {strides = array<i32>} : memref<2x32xf32, #tpu.memory_space<vmem>>, vector<2x32xf32>,
    %c0_74 = arith.constant 0 : index
    %c0_75 = arith.constant 0 : index
    %166 = vector.load %arg5[%c0_74, %c0_75] : memref<2x32xf32, #tpu.memory_space<vmem>>, vector<2x32xf32>
    tpu.vector_store %arg5[%c0_74, %c0_75], %164 {strides = array<i32>} : memref<2x32xf32, #tpu.memory_space<vmem>>, vector<2x32xf32>,
    %167 = arith.index_cast %c3_i32 : i32 to index
    %c0_76 = arith.constant 0 : index
    %c0_77 = arith.constant 0 : index
    %168 = vector.load %arg4[%167, %c0_76, %c0_77] : memref<8x2x32xf32, #tpu.memory_space<vmem>>, vector<1x2x32xf32>
    %169 = vector.shape_cast %168 : vector<1x2x32xf32> to vector<2x32xf32>
    %170 = vector.shape_cast %164 : vector<2x32xf32> to vector<1x2x32xf32>
    tpu.vector_store %arg4[%167, %c0_76, %c0_77], %170 {strides = array<i32>} : memref<8x2x32xf32, #tpu.memory_space<vmem>>, vector<1x2x32xf32>,
    %c4_i32 = arith.constant 4 : i32
    %171 = arith.index_cast %c4_i32 : i32 to index
    %c0_78 = arith.constant 0 : index
    %c0_79 = arith.constant 0 : index
    %172 = vector.load %arg0[%171, %c0_78, %c0_79] : memref<8x2x32xf32, #tpu.memory_space<vmem>>, vector<1x2x32xf32>
    %173 = vector.shape_cast %172 : vector<1x2x32xf32> to vector<2x32xf32>
    %c0_80 = arith.constant 0 : index
    %c0_81 = arith.constant 0 : index
    %174 = vector.load %arg5[%c0_80, %c0_81] : memref<2x32xf32, #tpu.memory_space<vmem>>, vector<2x32xf32>
    %c0_82 = arith.constant 0 : index
    %c0_83 = arith.constant 0 : index
    %175 = vector.load %arg6[%c0_82, %c0_83] : memref<2x32xf32, #tpu.memory_space<vmem>>, vector<2x32xf32>
    %cst_84 = arith.constant dense<0.000000e+00> : vector<2x128xf32>
    %176 = tpu.matmul %173, %4, %cst_84 {dimension_numbers = #tpu.dot_dimension_numbers<[1], [0], [0], [1], [0, 0, 1, 1], [], []>} : vector<2x32xf32>, vector<32x128xf32>, vector<2x128xf32> -> vector<2x128xf32>
    %cst_85 = arith.constant dense<0.000000e+00> : vector<2x128xf32>
    %177 = tpu.matmul %174, %5, %cst_85 {dimension_numbers = #tpu.dot_dimension_numbers<[1], [0], [0], [1], [0, 0, 1, 1], [], []>} : vector<2x32xf32>, vector<32x128xf32>, vector<2x128xf32> -> vector<2x128xf32>
    %178 = arith.addf %176, %177 : vector<2x128xf32>
    %179 = vector.broadcast %6 : vector<1x128xf32> to vector<2x128xf32>
    %180 = arith.addf %178, %179 : vector<2x128xf32>
    %181 = vector.extract_strided_slice %180 {offsets = [0, 0], sizes = [2, 32], strides = [1, 1]} : vector<2x128xf32> to vector<2x32xf32>
    %182 = arith.negf %181 : vector<2x32xf32>
    %183 = math.exp %182 : vector<2x32xf32>
    %cst_86 = arith.constant 1.000000e+00 : f32
    %184 = vector.broadcast %cst_86 : f32 to vector<2x32xf32>
    %185 = arith.addf %184, %183 : vector<2x32xf32>
    %186 = arith.divf %184, %185 : vector<2x32xf32>
    %187 = vector.extract_strided_slice %180 {offsets = [0, 32], sizes = [2, 32], strides = [1, 1]} : vector<2x128xf32> to vector<2x32xf32>
    %188 = arith.negf %187 : vector<2x32xf32>
    %189 = math.exp %188 : vector<2x32xf32>
    %cst_87 = arith.constant 1.000000e+00 : f32
    %190 = vector.broadcast %cst_87 : f32 to vector<2x32xf32>
    %191 = arith.addf %190, %189 : vector<2x32xf32>
    %192 = arith.divf %190, %191 : vector<2x32xf32>
    %193 = vector.extract_strided_slice %180 {offsets = [0, 64], sizes = [2, 32], strides = [1, 1]} : vector<2x128xf32> to vector<2x32xf32>
    %194 = math.tanh %193 : vector<2x32xf32>
    %195 = vector.extract_strided_slice %180 {offsets = [0, 96], sizes = [2, 32], strides = [1, 1]} : vector<2x128xf32> to vector<2x32xf32>
    %196 = arith.negf %195 : vector<2x32xf32>
    %197 = math.exp %196 : vector<2x32xf32>
    %cst_88 = arith.constant 1.000000e+00 : f32
    %198 = vector.broadcast %cst_88 : f32 to vector<2x32xf32>
    %199 = arith.addf %198, %197 : vector<2x32xf32>
    %200 = arith.divf %198, %199 : vector<2x32xf32>
    %201 = arith.mulf %186, %175 : vector<2x32xf32>
    %202 = arith.mulf %192, %194 : vector<2x32xf32>
    %203 = arith.addf %201, %202 : vector<2x32xf32>
    %204 = math.tanh %203 : vector<2x32xf32>
    %205 = arith.mulf %200, %204 : vector<2x32xf32>
    %c0_89 = arith.constant 0 : index
    %c0_90 = arith.constant 0 : index
    %206 = vector.load %arg6[%c0_89, %c0_90] : memref<2x32xf32, #tpu.memory_space<vmem>>, vector<2x32xf32>
    tpu.vector_store %arg6[%c0_89, %c0_90], %203 {strides = array<i32>} : memref<2x32xf32, #tpu.memory_space<vmem>>, vector<2x32xf32>,
    %c0_91 = arith.constant 0 : index
    %c0_92 = arith.constant 0 : index
    %207 = vector.load %arg5[%c0_91, %c0_92] : memref<2x32xf32, #tpu.memory_space<vmem>>, vector<2x32xf32>
    tpu.vector_store %arg5[%c0_91, %c0_92], %205 {strides = array<i32>} : memref<2x32xf32, #tpu.memory_space<vmem>>, vector<2x32xf32>,
    %208 = arith.index_cast %c4_i32 : i32 to index
    %c0_93 = arith.constant 0 : index
    %c0_94 = arith.constant 0 : index
    %209 = vector.load %arg4[%208, %c0_93, %c0_94] : memref<8x2x32xf32, #tpu.memory_space<vmem>>, vector<1x2x32xf32>
    %210 = vector.shape_cast %209 : vector<1x2x32xf32> to vector<2x32xf32>
    %211 = vector.shape_cast %205 : vector<2x32xf32> to vector<1x2x32xf32>
    tpu.vector_store %arg4[%208, %c0_93, %c0_94], %211 {strides = array<i32>} : memref<8x2x32xf32, #tpu.memory_space<vmem>>, vector<1x2x32xf32>,
    %c5_i32 = arith.constant 5 : i32
    %212 = arith.index_cast %c5_i32 : i32 to index
    %c0_95 = arith.constant 0 : index
    %c0_96 = arith.constant 0 : index
    %213 = vector.load %arg0[%212, %c0_95, %c0_96] : memref<8x2x32xf32, #tpu.memory_space<vmem>>, vector<1x2x32xf32>
    %214 = vector.shape_cast %213 : vector<1x2x32xf32> to vector<2x32xf32>
    %c0_97 = arith.constant 0 : index
    %c0_98 = arith.constant 0 : index
    %215 = vector.load %arg5[%c0_97, %c0_98] : memref<2x32xf32, #tpu.memory_space<vmem>>, vector<2x32xf32>
    %c0_99 = arith.constant 0 : index
    %c0_100 = arith.constant 0 : index
    %216 = vector.load %arg6[%c0_99, %c0_100] : memref<2x32xf32, #tpu.memory_space<vmem>>, vector<2x32xf32>
    %cst_101 = arith.constant dense<0.000000e+00> : vector<2x128xf32>
    %217 = tpu.matmul %214, %4, %cst_101 {dimension_numbers = #tpu.dot_dimension_numbers<[1], [0], [0], [1], [0, 0, 1, 1], [], []>} : vector<2x32xf32>, vector<32x128xf32>, vector<2x128xf32> -> vector<2x128xf32>
    %cst_102 = arith.constant dense<0.000000e+00> : vector<2x128xf32>
    %218 = tpu.matmul %215, %5, %cst_102 {dimension_numbers = #tpu.dot_dimension_numbers<[1], [0], [0], [1], [0, 0, 1, 1], [], []>} : vector<2x32xf32>, vector<32x128xf32>, vector<2x128xf32> -> vector<2x128xf32>
    %219 = arith.addf %217, %218 : vector<2x128xf32>
    %220 = vector.broadcast %6 : vector<1x128xf32> to vector<2x128xf32>
    %221 = arith.addf %219, %220 : vector<2x128xf32>
    %222 = vector.extract_strided_slice %221 {offsets = [0, 0], sizes = [2, 32], strides = [1, 1]} : vector<2x128xf32> to vector<2x32xf32>
    %223 = arith.negf %222 : vector<2x32xf32>
    %224 = math.exp %223 : vector<2x32xf32>
    %cst_103 = arith.constant 1.000000e+00 : f32
    %225 = vector.broadcast %cst_103 : f32 to vector<2x32xf32>
    %226 = arith.addf %225, %224 : vector<2x32xf32>
    %227 = arith.divf %225, %226 : vector<2x32xf32>
    %228 = vector.extract_strided_slice %221 {offsets = [0, 32], sizes = [2, 32], strides = [1, 1]} : vector<2x128xf32> to vector<2x32xf32>
    %229 = arith.negf %228 : vector<2x32xf32>
    %230 = math.exp %229 : vector<2x32xf32>
    %cst_104 = arith.constant 1.000000e+00 : f32
    %231 = vector.broadcast %cst_104 : f32 to vector<2x32xf32>
    %232 = arith.addf %231, %230 : vector<2x32xf32>
    %233 = arith.divf %231, %232 : vector<2x32xf32>
    %234 = vector.extract_strided_slice %221 {offsets = [0, 64], sizes = [2, 32], strides = [1, 1]} : vector<2x128xf32> to vector<2x32xf32>
    %235 = math.tanh %234 : vector<2x32xf32>
    %236 = vector.extract_strided_slice %221 {offsets = [0, 96], sizes = [2, 32], strides = [1, 1]} : vector<2x128xf32> to vector<2x32xf32>
    %237 = arith.negf %236 : vector<2x32xf32>
    %238 = math.exp %237 : vector<2x32xf32>
    %cst_105 = arith.constant 1.000000e+00 : f32
    %239 = vector.broadcast %cst_105 : f32 to vector<2x32xf32>
    %240 = arith.addf %239, %238 : vector<2x32xf32>
    %241 = arith.divf %239, %240 : vector<2x32xf32>
    %242 = arith.mulf %227, %216 : vector<2x32xf32>
    %243 = arith.mulf %233, %235 : vector<2x32xf32>
    %244 = arith.addf %242, %243 : vector<2x32xf32>
    %245 = math.tanh %244 : vector<2x32xf32>
    %246 = arith.mulf %241, %245 : vector<2x32xf32>
    %c0_106 = arith.constant 0 : index
    %c0_107 = arith.constant 0 : index
    %247 = vector.load %arg6[%c0_106, %c0_107] : memref<2x32xf32, #tpu.memory_space<vmem>>, vector<2x32xf32>
    tpu.vector_store %arg6[%c0_106, %c0_107], %244 {strides = array<i32>} : memref<2x32xf32, #tpu.memory_space<vmem>>, vector<2x32xf32>,
    %c0_108 = arith.constant 0 : index
    %c0_109 = arith.constant 0 : index
    %248 = vector.load %arg5[%c0_108, %c0_109] : memref<2x32xf32, #tpu.memory_space<vmem>>, vector<2x32xf32>
    tpu.vector_store %arg5[%c0_108, %c0_109], %246 {strides = array<i32>} : memref<2x32xf32, #tpu.memory_space<vmem>>, vector<2x32xf32>,
    %249 = arith.index_cast %c5_i32 : i32 to index
    %c0_110 = arith.constant 0 : index
    %c0_111 = arith.constant 0 : index
    %250 = vector.load %arg4[%249, %c0_110, %c0_111] : memref<8x2x32xf32, #tpu.memory_space<vmem>>, vector<1x2x32xf32>
    %251 = vector.shape_cast %250 : vector<1x2x32xf32> to vector<2x32xf32>
    %252 = vector.shape_cast %246 : vector<2x32xf32> to vector<1x2x32xf32>
    tpu.vector_store %arg4[%249, %c0_110, %c0_111], %252 {strides = array<i32>} : memref<8x2x32xf32, #tpu.memory_space<vmem>>, vector<1x2x32xf32>,
    %c6_i32 = arith.constant 6 : i32
    %253 = arith.index_cast %c6_i32 : i32 to index
    %c0_112 = arith.constant 0 : index
    %c0_113 = arith.constant 0 : index
    %254 = vector.load %arg0[%253, %c0_112, %c0_113] : memref<8x2x32xf32, #tpu.memory_space<vmem>>, vector<1x2x32xf32>
    %255 = vector.shape_cast %254 : vector<1x2x32xf32> to vector<2x32xf32>
    %c0_114 = arith.constant 0 : index
    %c0_115 = arith.constant 0 : index
    %256 = vector.load %arg5[%c0_114, %c0_115] : memref<2x32xf32, #tpu.memory_space<vmem>>, vector<2x32xf32>
    %c0_116 = arith.constant 0 : index
    %c0_117 = arith.constant 0 : index
    %257 = vector.load %arg6[%c0_116, %c0_117] : memref<2x32xf32, #tpu.memory_space<vmem>>, vector<2x32xf32>
    %cst_118 = arith.constant dense<0.000000e+00> : vector<2x128xf32>
    %258 = tpu.matmul %255, %4, %cst_118 {dimension_numbers = #tpu.dot_dimension_numbers<[1], [0], [0], [1], [0, 0, 1, 1], [], []>} : vector<2x32xf32>, vector<32x128xf32>, vector<2x128xf32> -> vector<2x128xf32>
    %cst_119 = arith.constant dense<0.000000e+00> : vector<2x128xf32>
    %259 = tpu.matmul %256, %5, %cst_119 {dimension_numbers = #tpu.dot_dimension_numbers<[1], [0], [0], [1], [0, 0, 1, 1], [], []>} : vector<2x32xf32>, vector<32x128xf32>, vector<2x128xf32> -> vector<2x128xf32>
    %260 = arith.addf %258, %259 : vector<2x128xf32>
    %261 = vector.broadcast %6 : vector<1x128xf32> to vector<2x128xf32>
    %262 = arith.addf %260, %261 : vector<2x128xf32>
    %263 = vector.extract_strided_slice %262 {offsets = [0, 0], sizes = [2, 32], strides = [1, 1]} : vector<2x128xf32> to vector<2x32xf32>
    %264 = arith.negf %263 : vector<2x32xf32>
    %265 = math.exp %264 : vector<2x32xf32>
    %cst_120 = arith.constant 1.000000e+00 : f32
    %266 = vector.broadcast %cst_120 : f32 to vector<2x32xf32>
    %267 = arith.addf %266, %265 : vector<2x32xf32>
    %268 = arith.divf %266, %267 : vector<2x32xf32>
    %269 = vector.extract_strided_slice %262 {offsets = [0, 32], sizes = [2, 32], strides = [1, 1]} : vector<2x128xf32> to vector<2x32xf32>
    %270 = arith.negf %269 : vector<2x32xf32>
    %271 = math.exp %270 : vector<2x32xf32>
    %cst_121 = arith.constant 1.000000e+00 : f32
    %272 = vector.broadcast %cst_121 : f32 to vector<2x32xf32>
    %273 = arith.addf %272, %271 : vector<2x32xf32>
    %274 = arith.divf %272, %273 : vector<2x32xf32>
    %275 = vector.extract_strided_slice %262 {offsets = [0, 64], sizes = [2, 32], strides = [1, 1]} : vector<2x128xf32> to vector<2x32xf32>
    %276 = math.tanh %275 : vector<2x32xf32>
    %277 = vector.extract_strided_slice %262 {offsets = [0, 96], sizes = [2, 32], strides = [1, 1]} : vector<2x128xf32> to vector<2x32xf32>
    %278 = arith.negf %277 : vector<2x32xf32>
    %279 = math.exp %278 : vector<2x32xf32>
    %cst_122 = arith.constant 1.000000e+00 : f32
    %280 = vector.broadcast %cst_122 : f32 to vector<2x32xf32>
    %281 = arith.addf %280, %279 : vector<2x32xf32>
    %282 = arith.divf %280, %281 : vector<2x32xf32>
    %283 = arith.mulf %268, %257 : vector<2x32xf32>
    %284 = arith.mulf %274, %276 : vector<2x32xf32>
    %285 = arith.addf %283, %284 : vector<2x32xf32>
    %286 = math.tanh %285 : vector<2x32xf32>
    %287 = arith.mulf %282, %286 : vector<2x32xf32>
    %c0_123 = arith.constant 0 : index
    %c0_124 = arith.constant 0 : index
    %288 = vector.load %arg6[%c0_123, %c0_124] : memref<2x32xf32, #tpu.memory_space<vmem>>, vector<2x32xf32>
    tpu.vector_store %arg6[%c0_123, %c0_124], %285 {strides = array<i32>} : memref<2x32xf32, #tpu.memory_space<vmem>>, vector<2x32xf32>,
    %c0_125 = arith.constant 0 : index
    %c0_126 = arith.constant 0 : index
    %289 = vector.load %arg5[%c0_125, %c0_126] : memref<2x32xf32, #tpu.memory_space<vmem>>, vector<2x32xf32>
    tpu.vector_store %arg5[%c0_125, %c0_126], %287 {strides = array<i32>} : memref<2x32xf32, #tpu.memory_space<vmem>>, vector<2x32xf32>,
    %290 = arith.index_cast %c6_i32 : i32 to index
    %c0_127 = arith.constant 0 : index
    %c0_128 = arith.constant 0 : index
    %291 = vector.load %arg4[%290, %c0_127, %c0_128] : memref<8x2x32xf32, #tpu.memory_space<vmem>>, vector<1x2x32xf32>
    %292 = vector.shape_cast %291 : vector<1x2x32xf32> to vector<2x32xf32>
    %293 = vector.shape_cast %287 : vector<2x32xf32> to vector<1x2x32xf32>
    tpu.vector_store %arg4[%290, %c0_127, %c0_128], %293 {strides = array<i32>} : memref<8x2x32xf32, #tpu.memory_space<vmem>>, vector<1x2x32xf32>,
    %c7_i32 = arith.constant 7 : i32
    %294 = arith.index_cast %c7_i32 : i32 to index
    %c0_129 = arith.constant 0 : index
    %c0_130 = arith.constant 0 : index
    %295 = vector.load %arg0[%294, %c0_129, %c0_130] : memref<8x2x32xf32, #tpu.memory_space<vmem>>, vector<1x2x32xf32>
    %296 = vector.shape_cast %295 : vector<1x2x32xf32> to vector<2x32xf32>
    %c0_131 = arith.constant 0 : index
    %c0_132 = arith.constant 0 : index
    %297 = vector.load %arg5[%c0_131, %c0_132] : memref<2x32xf32, #tpu.memory_space<vmem>>, vector<2x32xf32>
    %c0_133 = arith.constant 0 : index
    %c0_134 = arith.constant 0 : index
    %298 = vector.load %arg6[%c0_133, %c0_134] : memref<2x32xf32, #tpu.memory_space<vmem>>, vector<2x32xf32>
    %cst_135 = arith.constant dense<0.000000e+00> : vector<2x128xf32>
    %299 = tpu.matmul %296, %4, %cst_135 {dimension_numbers = #tpu.dot_dimension_numbers<[1], [0], [0], [1], [0, 0, 1, 1], [], []>} : vector<2x32xf32>, vector<32x128xf32>, vector<2x128xf32> -> vector<2x128xf32>
    %cst_136 = arith.constant dense<0.000000e+00> : vector<2x128xf32>
    %300 = tpu.matmul %297, %5, %cst_136 {dimension_numbers = #tpu.dot_dimension_numbers<[1], [0], [0], [1], [0, 0, 1, 1], [], []>} : vector<2x32xf32>, vector<32x128xf32>, vector<2x128xf32> -> vector<2x128xf32>
    %301 = arith.addf %299, %300 : vector<2x128xf32>
    %302 = vector.broadcast %6 : vector<1x128xf32> to vector<2x128xf32>
    %303 = arith.addf %301, %302 : vector<2x128xf32>
    %304 = vector.extract_strided_slice %303 {offsets = [0, 0], sizes = [2, 32], strides = [1, 1]} : vector<2x128xf32> to vector<2x32xf32>
    %305 = arith.negf %304 : vector<2x32xf32>
    %306 = math.exp %305 : vector<2x32xf32>
    %cst_137 = arith.constant 1.000000e+00 : f32
    %307 = vector.broadcast %cst_137 : f32 to vector<2x32xf32>
    %308 = arith.addf %307, %306 : vector<2x32xf32>
    %309 = arith.divf %307, %308 : vector<2x32xf32>
    %310 = vector.extract_strided_slice %303 {offsets = [0, 32], sizes = [2, 32], strides = [1, 1]} : vector<2x128xf32> to vector<2x32xf32>
    %311 = arith.negf %310 : vector<2x32xf32>
    %312 = math.exp %311 : vector<2x32xf32>
    %cst_138 = arith.constant 1.000000e+00 : f32
    %313 = vector.broadcast %cst_138 : f32 to vector<2x32xf32>
    %314 = arith.addf %313, %312 : vector<2x32xf32>
    %315 = arith.divf %313, %314 : vector<2x32xf32>
    %316 = vector.extract_strided_slice %303 {offsets = [0, 64], sizes = [2, 32], strides = [1, 1]} : vector<2x128xf32> to vector<2x32xf32>
    %317 = math.tanh %316 : vector<2x32xf32>
    %318 = vector.extract_strided_slice %303 {offsets = [0, 96], sizes = [2, 32], strides = [1, 1]} : vector<2x128xf32> to vector<2x32xf32>
    %319 = arith.negf %318 : vector<2x32xf32>
    %320 = math.exp %319 : vector<2x32xf32>
    %cst_139 = arith.constant 1.000000e+00 : f32
    %321 = vector.broadcast %cst_139 : f32 to vector<2x32xf32>
    %322 = arith.addf %321, %320 : vector<2x32xf32>
    %323 = arith.divf %321, %322 : vector<2x32xf32>
    %324 = arith.mulf %309, %298 : vector<2x32xf32>
    %325 = arith.mulf %315, %317 : vector<2x32xf32>
    %326 = arith.addf %324, %325 : vector<2x32xf32>
    %327 = math.tanh %326 : vector<2x32xf32>
    %328 = arith.mulf %323, %327 : vector<2x32xf32>
    %c0_140 = arith.constant 0 : index
    %c0_141 = arith.constant 0 : index
    %329 = vector.load %arg6[%c0_140, %c0_141] : memref<2x32xf32, #tpu.memory_space<vmem>>, vector<2x32xf32>
    tpu.vector_store %arg6[%c0_140, %c0_141], %326 {strides = array<i32>} : memref<2x32xf32, #tpu.memory_space<vmem>>, vector<2x32xf32>,
    %c0_142 = arith.constant 0 : index
    %c0_143 = arith.constant 0 : index
    %330 = vector.load %arg5[%c0_142, %c0_143] : memref<2x32xf32, #tpu.memory_space<vmem>>, vector<2x32xf32>
    tpu.vector_store %arg5[%c0_142, %c0_143], %328 {strides = array<i32>} : memref<2x32xf32, #tpu.memory_space<vmem>>, vector<2x32xf32>,
    %331 = arith.index_cast %c7_i32 : i32 to index
    %c0_144 = arith.constant 0 : index
    %c0_145 = arith.constant 0 : index
    %332 = vector.load %arg4[%331, %c0_144, %c0_145] : memref<8x2x32xf32, #tpu.memory_space<vmem>>, vector<1x2x32xf32>
    %333 = vector.shape_cast %332 : vector<1x2x32xf32> to vector<2x32xf32>
    %334 = vector.shape_cast %328 : vector<2x32xf32> to vector<1x2x32xf32>
    tpu.vector_store %arg4[%331, %c0_144, %c0_145], %334 {strides = array<i32>} : memref<8x2x32xf32, #tpu.memory_space<vmem>>, vector<1x2x32xf32>,
    %c8_i32 = arith.constant 8 : i32
    return
  }
}

module attributes {stable_mosaic.version = 11 : i64} {
  func.func @_classifier_kernel(%arg0: memref<2x32xf32, #tpu.memory_space<vmem>>, %arg1: memref<32x128xf32, #tpu.memory_space<vmem>>, %arg2: memref<1x128xf32, #tpu.memory_space<vmem>>, %arg3: memref<128x64xf32, #tpu.memory_space<vmem>>, %arg4: memref<1x64xf32, #tpu.memory_space<vmem>>, %arg5: memref<64x6xf32, #tpu.memory_space<vmem>>, %arg6: memref<1x6xf32, #tpu.memory_space<vmem>>, %arg7: memref<2x6xf32, #tpu.memory_space<vmem>>) attributes {dimension_semantics = [], scalar_prefetch = 0 : i64, scratch_operands = 0 : i64, tpu.core_type = #tpu.core_type<tc>} {
    %c0 = arith.constant 0 : index
    %c0_0 = arith.constant 0 : index
    %0 = vector.load %arg0[%c0, %c0_0] : memref<2x32xf32, #tpu.memory_space<vmem>>, vector<2x32xf32>
    %c0_1 = arith.constant 0 : index
    %c0_2 = arith.constant 0 : index
    %1 = vector.load %arg1[%c0_1, %c0_2] : memref<32x128xf32, #tpu.memory_space<vmem>>, vector<32x128xf32>
    %cst = arith.constant dense<0.000000e+00> : vector<2x128xf32>
    %2 = tpu.matmul %0, %1, %cst {dimension_numbers = #tpu.dot_dimension_numbers<[1], [0], [0], [1], [0, 0, 1, 1], [], []>} : vector<2x32xf32>, vector<32x128xf32>, vector<2x128xf32> -> vector<2x128xf32>
    %c0_3 = arith.constant 0 : index
    %c0_4 = arith.constant 0 : index
    %3 = vector.load %arg2[%c0_3, %c0_4] : memref<1x128xf32, #tpu.memory_space<vmem>>, vector<1x128xf32>
    %4 = vector.broadcast %3 : vector<1x128xf32> to vector<2x128xf32>
    %5 = arith.addf %2, %4 : vector<2x128xf32>
    %cst_5 = arith.constant 0.000000e+00 : f32
    %6 = vector.broadcast %cst_5 : f32 to vector<2x128xf32>
    %7 = arith.maximumf %5, %6 : vector<2x128xf32>
    %c0_6 = arith.constant 0 : index
    %c0_7 = arith.constant 0 : index
    %8 = vector.load %arg3[%c0_6, %c0_7] : memref<128x64xf32, #tpu.memory_space<vmem>>, vector<128x64xf32>
    %cst_8 = arith.constant dense<0.000000e+00> : vector<2x64xf32>
    %9 = tpu.matmul %7, %8, %cst_8 {dimension_numbers = #tpu.dot_dimension_numbers<[1], [0], [0], [1], [0, 0, 1, 1], [], []>} : vector<2x128xf32>, vector<128x64xf32>, vector<2x64xf32> -> vector<2x64xf32>
    %c0_9 = arith.constant 0 : index
    %c0_10 = arith.constant 0 : index
    %10 = vector.load %arg4[%c0_9, %c0_10] : memref<1x64xf32, #tpu.memory_space<vmem>>, vector<1x64xf32>
    %11 = vector.broadcast %10 : vector<1x64xf32> to vector<2x64xf32>
    %12 = arith.addf %9, %11 : vector<2x64xf32>
    %cst_11 = arith.constant 0.000000e+00 : f32
    %13 = vector.broadcast %cst_11 : f32 to vector<2x64xf32>
    %14 = arith.maximumf %12, %13 : vector<2x64xf32>
    %c0_12 = arith.constant 0 : index
    %c0_13 = arith.constant 0 : index
    %15 = vector.load %arg5[%c0_12, %c0_13] : memref<64x6xf32, #tpu.memory_space<vmem>>, vector<64x6xf32>
    %cst_14 = arith.constant dense<0.000000e+00> : vector<2x6xf32>
    %16 = tpu.matmul %14, %15, %cst_14 {dimension_numbers = #tpu.dot_dimension_numbers<[1], [0], [0], [1], [0, 0, 1, 1], [], []>} : vector<2x64xf32>, vector<64x6xf32>, vector<2x6xf32> -> vector<2x6xf32>
    %c0_15 = arith.constant 0 : index
    %c0_16 = arith.constant 0 : index
    %17 = vector.load %arg6[%c0_15, %c0_16] : memref<1x6xf32, #tpu.memory_space<vmem>>, vector<1x6xf32>
    %18 = vector.broadcast %17 : vector<1x6xf32> to vector<2x6xf32>
    %19 = arith.addf %16, %18 : vector<2x6xf32>
    %c0_17 = arith.constant 0 : index
    %c0_18 = arith.constant 0 : index
    %20 = vector.load %arg7[%c0_17, %c0_18] : memref<2x6xf32, #tpu.memory_space<vmem>>, vector<2x6xf32>
    tpu.vector_store %arg7[%c0_17, %c0_18], %19 {strides = array<i32>} : memref<2x6xf32, #tpu.memory_space<vmem>>, vector<2x6xf32>,
    return
  }
}

</mosaic_0001>

<bundles_post_ra>
// kernel: forward.6
= control target key start
LH: loop header
LB: loop body
LE: loop exit
PB: predicated region body
PF: predicated region fallthrough
CT: control target
= control target key end

     0   :  { %s720_s12 = smov 0   ;;  %s722_s13 = smov 0   ;;  %s890_s0 = inlined_call_operand.vmem [shape: f32[16,9], index: 0, kind: input, shape index: {}]   ;;  %s891_s1 = inlined_call_operand.vmem [shape: f32[9,4096], index: 1, kind: input, shape index: {}]   ;;  %s892_s2 = inlined_call_operand.vmem [shape: f32[16,1], index: 2, kind: input, shape index: {}]   ;;  %s893_s3 = inlined_call_operand.vmem [shape: f32[16,4096], index: 3, kind: output, shape index: {}]  }
   0x1   :  { %s724_s14 = smov 0  }
   0x2 LB: > { %s608_s15 = sadd.s32 4294967295, %s697_s14   ;;  %s737_s16 = sadd.s32 1, %s697_s14   ;;  %s697_s14 = sphi %s724_s14, %s897_s14   ;;  %s693_s13 = sphi %s722_s13, %s896_s13   ;;  %s689_s12 = sphi %s720_s12, %s895_s12  }
   0x3   : > { %s38_s17 = ssub.s32 %s697_s14, %s737_s16  ;;  %s41_s18 = sadd.s32 1, %s693_s13 }
   0x4   : > { %p39_p0 = scmp.eq.s32.totalorder %s38_s17, 0  ;;  %p48_p1 = scmp.ne.s32.totalorder %s693_s13, %s689_s12 }
   0x5   : > { %p49_p2 = scmp.eq.s32.totalorder %s697_s14, 0  ;;  %p99_p3 = scmp.eq.s32.totalorder %s608_s15, 3 }
   0x6   : > { %s748_s19 = scalar_select %p39_p0, %s693_s13, %s41_s18  }
   0x7   : > { %p50_p4 = por %p49_p2, %p48_p1  ;;  %p750_p5 = por %p99_p3, %p48_p1 }
   0x8   : > { %p611_p6 = scmp.ge.s32.totalorder %s697_s14, 4 }
   0xa   : > { %127 = sbr.rel (%p611_p6) target bundleno = 35 (0x23), region = 24 }
   0xf   : > { %130 = sbr.rel (!%p50_p4) target bundleno = 35 (0x23), region = 28  ;;  %s132_s21 = sand.u32 (%p50_p4), 1, %s693_s13  }
  0x10   : > { %s647_s22 = sshll.u32 (%p50_p4), %s697_s14, 6  ;;  %s612_s23 = sshll.u32 (%p50_p4), %s132_s21, 7 }
  0x11   : > { %s760_s26 = scalar_lea.vmem (%p50_p4), %s891_s1, %s647_s22  ;;  %s134_s27 = scalar_lea.vmem (%p50_p4), [#allocation2], %s612_s23 }
  0x12   : > { %v150_v0 = vld [vmem:[%s760_s26] sm:$0xff] (%p50_p4)  ;;  %v152_v1 = vld [vmem:[%s760_s26 + $0x8] sm:$0xff] (%p50_p4)  ;;  %v154_v2 = vld [vmem:[%s760_s26 + $0x10] sm:$0xff] (%p50_p4) }
  0x13   : > { %151 = vst [vmem:[%s134_s27] sm:$0xff] (%p50_p4), %v150_v0  ;;  %v156_v3 = vld [vmem:[%s760_s26 + $0x18] sm:$0xff] (%p50_p4)  ;;  %v158_v4 = vld [vmem:[%s760_s26 + $0x20] sm:$0xff] (%p50_p4)  ;;  %v160_v5 = vld [vmem:[%s760_s26 + $0x28] sm:$0xff] (%p50_p4) }
  0x14   : > { %153 = vst [vmem:[%s134_s27 + $0x8] sm:$0xff] %v152_v1  ;;  %v162_v6 = vld [vmem:[%s760_s26 + $0x30] sm:$0xff]  ;;  %v164_v7 = vld [vmem:[%s760_s26 + $0x38] sm:$0xff]  ;;  %v166_v8 = vld [vmem:[%s760_s26 + $0x100] sm:$0xff] }
  0x15   : > { %155 = vst [vmem:[%s134_s27 + $0x10] sm:$0xff] %v154_v2  ;;  %v168_v9 = vld [vmem:[%s760_s26 + $0x108] sm:$0xff]  ;;  %v170_v10 = vld [vmem:[%s760_s26 + $0x110] sm:$0xff]  ;;  %v172_v11 = vld [vmem:[%s760_s26 + $0x118] sm:$0xff] }
  0x16   : > { %157 = vst [vmem:[%s134_s27 + $0x18] sm:$0xff] %v156_v3  ;;  %v174_v12 = vld [vmem:[%s760_s26 + $0x120] sm:$0xff]  ;;  %v176_v13 = vld [vmem:[%s760_s26 + $0x128] sm:$0xff]  ;;  %v178_v14 = vld [vmem:[%s760_s26 + $0x130] sm:$0xff] }
  0x17   : > { %159 = vst [vmem:[%s134_s27 + $0x20] sm:$0xff] %v158_v4  ;;  %v180_v15 = vld [vmem:[%s760_s26 + $0x138] sm:$0xff] }
  0x18   : > { %161 = vst [vmem:[%s134_s27 + $0x28] sm:$0xff] %v160_v5 }
  0x19   : > { %163 = vst [vmem:[%s134_s27 + $0x30] sm:$0xff] %v162_v6 }
  0x1a   : > { %165 = vst [vmem:[%s134_s27 + $0x38] sm:$0xff] %v164_v7 }
  0x1b   : > { %167 = vst [vmem:[%s134_s27 + $0x40] sm:$0xff] %v166_v8 }
  0x1c   : > { %169 = vst [vmem:[%s134_s27 + $0x48] sm:$0xff] %v168_v9 }
  0x1d   : > { %171 = vst [vmem:[%s134_s27 + $0x50] sm:$0xff] %v170_v10 }
  0x1e   : > { %173 = vst [vmem:[%s134_s27 + $0x58] sm:$0xff] %v172_v11 }
  0x1f   : > { %175 = vst [vmem:[%s134_s27 + $0x60] sm:$0xff] %v174_v12 }
  0x20   : > { %177 = vst [vmem:[%s134_s27 + $0x68] sm:$0xff] %v176_v13 }
  0x21   : > { %179 = vst [vmem:[%s134_s27 + $0x70] sm:$0xff] %v178_v14 }
  0x22   : > { %181 = vst [vmem:[%s134_s27 + $0x78] sm:$0xff] %v180_v15 }
  0x23 PF: > { %p615_p7 = scmp.ge.s32.totalorder %s697_s14, 1  ;;  %p186_p8 = scmp.lt.s32.totalorder %s697_s14, 5 }
  0x25   : > { %p187_p9 = pnand %p615_p7, %p186_p8 }
  0x26   : > { %s193_s28 = sand.u32 (!%p187_p9), 1, %s689_s12  }
  0x27   : > { %190 = sbr.rel (%p187_p9) target bundleno = 221 (0xdd), region = 51  ;;  %s781_s29 = sshll.u32 (!%p187_p9), %s193_s28, 7 }
  0x28   : > { %s787_s5 = scalar_lea.vmem (!%p187_p9), [#allocation2], %s781_s29  ;;  %s839_s12 = scalar_lea.vmem (!%p187_p9), [#allocation3], %s781_s29 }
  0x2c   : > { %vm254_vm0 = vcmask 1040384   ;;  %v699_v16 = vmov 0   ;;  %v235_v17 = vld [vmem:[%s892_s2] sm:$0xff]  ;;  %v228_v19 = vld [vmem:[%s787_s5 + $0x48] sm:$0x1]  ;;  %v221_v24 = vld [vmem:[%s787_s5 + $0x10] sm:$0xff] }
  0x2d   : > { %674 = vset.pattern.permute.xlu0 %v699_v16  ;;  %v227_v18 = vld [vmem:[%s787_s5 + $0x40] sm:$0x1]  ;;  %v229_v20 = vld [vmem:[%s787_s5 + $0x50] sm:$0x1]  ;;  %621 = vmatpush.msk.msra.mxu1 %vm254_vm0, %v228_v19  ;;  %v230_v21 = vld [vmem:[%s787_s5 + $0x58] sm:$0x1] }
  0x2e   : > { %239 = vperm.xlu0 %674, %v235_v17   ;;  %618 = vmatpush.msk.msra.mxu0 %vm254_vm0, %v227_v18  ;;  %v219_v22 = vld [vmem:[%s787_s5] sm:$0xff]  ;;  %v220_v23 = vld [vmem:[%s787_s5 + $0x8] sm:$0xff]  ;;  %v222_v25 = vld [vmem:[%s787_s5 + $0x18] sm:$0xff]  ;;  %vm247_vm1 = vcmask 72704   ;;  %s648_s17 = sshll.u32 (%p750_p5), %s608_s15, 6 }
  0x2f   : > { %624 = vmatpush.msk.msra.mxu2 %vm254_vm0, %v229_v20  ;;  %627 = vmatpush.msk.msra.mxu3 %vm254_vm0, %v230_v21  ;;  %v217_v26 = vld [vmem:[%s890_s0] sm:$0xff]  ;;  %v233_v27 = vld [vmem:[%s787_s5 + $0x70] sm:$0x1]  ;;  %v234_v28 = vld [vmem:[%s787_s5 + $0x78] sm:$0x1]  ;;  %s504_s20 = scalar_lea.vmem (%p750_p5), %s893_s3, %s648_s17 }
  0x30   : > { %294 = vmatpush.msra.mxu0 %v219_v22  ;;  %317 = vmatpush.msra.mxu1 %v220_v23  ;;  %v231_v29 = vld [vmem:[%s787_s5 + $0x60] sm:$0x1]  ;;  %v232_v30 = vld [vmem:[%s787_s5 + $0x68] sm:$0x1]  ;;  %v225_v31 = vld [vmem:[%s787_s5 + $0x30] sm:$0xff] }
  0x31   : > { %340 = vmatpush.msra.mxu2 %v221_v24  ;;  %363 = vmatpush.msra.mxu3 %v222_v25  ;;  %v226_v32 = vld [vmem:[%s787_s5 + $0x38] sm:$0xff]  ;;  %v223_v33 = vld [vmem:[%s787_s5 + $0x20] sm:$0xff]  ;;  %v224_v34 = vld [vmem:[%s787_s5 + $0x28] sm:$0xff] }
  0x32   : > { %619 = vmatmul.msk.f32.vlgmr.msra.gmra.mxu0 %vm247_vm1, %v217_v26  ;;  %622 = vmatmul.msk.f32.vlgmr.msra.gmra.mxu1 %vm247_vm1, %v217_v26  ;;  %v236_v35 = vld [vmem:[%s892_s2 + $0x8] sm:$0xff] }
  0x33   : > { %625 = vmatmul.msk.f32.vlgmr.msra.gmra.mxu2 %vm247_vm1, %v217_v26  ;;  %628 = vmatmul.msk.f32.vlgmr.msra.gmra.mxu3 %vm247_vm1, %v217_v26  ;;  %v218_v36 = vld [vmem:[%s890_s0 + $0x8] sm:$0xff] }
  0x34   : > { %636 = vmatpush.msk.msrb.mxu2 %vm254_vm0, %v233_v27  ;;  %639 = vmatpush.msk.msrb.mxu3 %vm254_vm0, %v234_v28 }
  0x35   : > { %630 = vmatpush.msk.msrb.mxu0 %vm254_vm0, %v231_v29  ;;  %633 = vmatpush.msk.msrb.mxu1 %vm254_vm0, %v232_v30 }
  0x36   : > { %432 = vmatpush.msrb.mxu2 %v225_v31  ;;  %455 = vmatpush.msrb.mxu3 %v226_v32 }
  0x37   : > { %386 = vmatpush.msrb.mxu0 %v223_v33  ;;  %409 = vmatpush.msrb.mxu1 %v224_v34 }
  0x38   : > { %244 = vperm.xlu0 %674, %v236_v35  }
  0x3a   : > { %620 = vmatmul.msk.f32.gmra.mxu0 %vm247_vm1, %v218_v36  ;;  %623 = vmatmul.msk.f32.gmra.mxu1 %vm247_vm1, %v218_v36 }
  0x3b   : > { %626 = vmatmul.msk.f32.gmra.mxu2 %vm247_vm1, %v218_v36  ;;  %629 = vmatmul.msk.f32.gmra.mxu3 %vm247_vm1, %v218_v36 }
  0x42   : > { %631 = vmatmul.msk.f32.vlgmr.msrb.gmra.mxu0 %vm247_vm1, %v217_v26  ;;  %634 = vmatmul.msk.f32.vlgmr.msrb.gmra.mxu1 %vm247_vm1, %v217_v26 }
  0x43   : > { %637 = vmatmul.msk.f32.vlgmr.msrb.gmra.mxu2 %vm247_vm1, %v217_v26  ;;  %640 = vmatmul.msk.f32.vlgmr.msrb.gmra.mxu3 %vm247_vm1, %v217_v26 }
  0x4a   : > { %632 = vmatmul.msk.f32.gmra.mxu0 %vm247_vm1, %v218_v36  ;;  %635 = vmatmul.msk.f32.gmra.mxu1 %vm247_vm1, %v218_v36 }
  0x4b   : > { %638 = vmatmul.msk.f32.gmra.mxu2 %vm247_vm1, %v218_v36  ;;  %641 = vmatmul.msk.f32.gmra.mxu3 %vm247_vm1, %v218_v36 }
  0xa0   : > { %v240_v37 = vpop.permute.xlu0 %239 }
  0xaa   : > { %v245_v44 = vpop.permute.xlu0 %244 }
  0xaf   : > { %v296_v38 = vpop.f32.mrf.mxu0  ;;  %v319_v39 = vpop.f32.mrf.mxu1 }
  0xb0   : > { %v297_v40 = vadd.f32 %v296_v38, %v240_v37  ;;  %v320_v41 = vadd.f32 %v319_v39, %v240_v37 }
  0xb2   : > { %v463_v42 = vmax.f32 %v297_v40, 0.0  ;;  %v464_v43 = vmax.f32 %v320_v41, 0.0 }
  0xb4   : > { %479 = vst [vmem:[%s839_s12] sm:$0xff] %v463_v42 }
  0xb5   : > { %480 = vst [vmem:[%s839_s12 + $0x8] sm:$0xff] %v464_v43 }
  0xb6   : > { %v342_v45 = vpop.f32.mrf.mxu2  ;;  %v365_v46 = vpop.f32.mrf.mxu3 }
  0xb7   : > { %v343_v47 = vadd.f32 %v342_v45, %v240_v37  ;;  %v366_v48 = vadd.f32 %v365_v46, %v240_v37  ;;  %v299_v49 = vpop.f32.mrf.mxu0  ;;  %v322_v50 = vpop.f32.mrf.mxu1 }
  0xb8   : > { %v300_v51 = vadd.f32 %v299_v49, %v245_v44  ;;  %v323_v52 = vadd.f32 %v322_v50, %v245_v44 }
  0xb9   : > { %v465_v53 = vmax.f32 %v343_v47, 0.0  ;;  %v466_v54 = vmax.f32 %v366_v48, 0.0 }
  0xba   : > { %v471_v55 = vmax.f32 %v300_v51, 0.0  ;;  %v472_v56 = vmax.f32 %v323_v52, 0.0 }
  0xbb   : > { %481 = vst [vmem:[%s839_s12 + $0x10] sm:$0xff] %v465_v53  ;;  %v517_v23 = vld [vmem:[%s839_s12] sm:$0xff] (%p750_p5) }
  0xbc   : > { %482 = vst [vmem:[%s839_s12 + $0x18] sm:$0xff] %v466_v54  ;;  %v519_v24 = vld [vmem:[%s839_s12 + $0x8] sm:$0xff] (%p750_p5) }
  0xbd   : > { %487 = vst [vmem:[%s839_s12 + $0x40] sm:$0xff] %v471_v55 }
  0xbe   : > { %488 = vst [vmem:[%s839_s12 + $0x48] sm:$0xff] %v472_v56  ;;  %v345_v57 = vpop.f32.mrf.mxu2  ;;  %v368_v58 = vpop.f32.mrf.mxu3 }
  0xbf   : > { %v346_v59 = vadd.f32 %v345_v57, %v245_v44  ;;  %v369_v60 = vadd.f32 %v368_v58, %v245_v44  ;;  %v388_v61 = vpop.f32.mrf.mxu0  ;;  %v411_v62 = vpop.f32.mrf.mxu1  ;;  %518 = vst [vmem:[%s504_s20] sm:$0xff] (%p750_p5), %v517_v23 }
  0xc0   : > { %v389_v63 = vadd.f32 %v388_v61, %v240_v37  ;;  %v412_v0 = vadd.f32 %v411_v62, %v240_v37  ;;  %520 = vst [vmem:[%s504_s20 + $0x8] sm:$0xff] (%p750_p5), %v519_v24 }
  0xc1   : > { %v473_v1 = vmax.f32 %v346_v59, 0.0  ;;  %v474_v2 = vmax.f32 %v369_v60, 0.0 }
  0xc2   : > { %v467_v3 = vmax.f32 %v389_v63, 0.0  ;;  %v468_v4 = vmax.f32 %v412_v0, 0.0  ;;  %v521_v25 = vld [vmem:[%s839_s12 + $0x10] sm:$0xff] (%p750_p5) }
  0xc3   : > { %489 = vst [vmem:[%s839_s12 + $0x50] sm:$0xff] %v473_v1  ;;  %v523_v26 = vld [vmem:[%s839_s12 + $0x18] sm:$0xff] (%p750_p5) }
  0xc4   : > { %490 = vst [vmem:[%s839_s12 + $0x58] sm:$0xff] %v474_v2  ;;  %v533_v31 = vld [vmem:[%s839_s12 + $0x40] sm:$0xff] (%p750_p5) }
  0xc5   : > { %483 = vst [vmem:[%s839_s12 + $0x20] sm:$0xff] %v467_v3  ;;  %v535_v32 = vld [vmem:[%s839_s12 + $0x48] sm:$0xff] (%p750_p5) }
  0xc6   : > { %484 = vst [vmem:[%s839_s12 + $0x28] sm:$0xff] %v468_v4  ;;  %v434_v5 = vpop.f32.mrf.mxu2  ;;  %v457_v6 = vpop.f32.mrf.mxu3 }
  0xc7   : > { %v435_v7 = vadd.f32 %v434_v5, %v240_v37  ;;  %v458_v8 = vadd.f32 %v457_v6, %v240_v37  ;;  %v391_v9 = vpop.f32.mrf.mxu0  ;;  %v414_v10 = vpop.f32.mrf.mxu1  ;;  %522 = vst [vmem:[%s504_s20 + $0x10] sm:$0xff] (%p750_p5), %v521_v25 }
  0xc8   : > { %v392_v11 = vadd.f32 %v391_v9, %v245_v44  ;;  %v415_v12 = vadd.f32 %v414_v10, %v245_v44  ;;  %524 = vst [vmem:[%s504_s20 + $0x18] sm:$0xff] (%p750_p5), %v523_v26 }
  0xc9   : > { %v469_v13 = vmax.f32 %v435_v7, 0.0  ;;  %v470_v14 = vmax.f32 %v458_v8, 0.0  ;;  %534 = vst [vmem:[%s504_s20 + $0x100] sm:$0xff] (%p750_p5), %v533_v31 }
  0xca   : > { %v475_v15 = vmax.f32 %v392_v11, 0.0  ;;  %v476_v16 = vmax.f32 %v415_v12, 0.0  ;;  %v537_v33 = vld [vmem:[%s839_s12 + $0x50] sm:$0xff] (%p750_p5)  ;;  %536 = vst [vmem:[%s504_s20 + $0x108] sm:$0xff] (%p750_p5), %v535_v32 }
  0xcb   : > { %485 = vst [vmem:[%s839_s12 + $0x30] sm:$0xff] %v469_v13  ;;  %v539_v34 = vld [vmem:[%s839_s12 + $0x58] sm:$0xff] (%p750_p5) }
  0xcc   : > { %486 = vst [vmem:[%s839_s12 + $0x38] sm:$0xff] %v470_v14  ;;  %v525_v27 = vld [vmem:[%s839_s12 + $0x20] sm:$0xff] (%p750_p5) }
  0xcd   : > { %491 = vst [vmem:[%s839_s12 + $0x60] sm:$0xff] %v475_v15  ;;  %v527_v28 = vld [vmem:[%s839_s12 + $0x28] sm:$0xff] (%p750_p5) }
  0xce   : > { %492 = vst [vmem:[%s839_s12 + $0x68] sm:$0xff] %v476_v16  ;;  %v437_v17 = vpop.f32.mrf.mxu2  ;;  %v460_v18 = vpop.f32.mrf.mxu3 }
  0xcf   : > { %v438_v19 = vadd.f32 %v437_v17, %v245_v44  ;;  %v461_v20 = vadd.f32 %v460_v18, %v245_v44  ;;  %526 = vst [vmem:[%s504_s20 + $0x20] sm:$0xff] (%p750_p5), %v525_v27 }
  0xd0   : > { %501 = sbr.rel (!%p750_p5) target bundleno = 221 (0xdd), region = 59  ;;  %528 = vst [vmem:[%s504_s20 + $0x28] sm:$0xff] (%p750_p5), %v527_v28 }
  0xd1   : > { %v477_v21 = vmax.f32 %v438_v19, 0.0  ;;  %v478_v22 = vmax.f32 %v461_v20, 0.0  ;;  %538 = vst [vmem:[%s504_s20 + $0x110] sm:$0xff] (%p750_p5), %v537_v33 }
  0xd2   : > { %v529_v29 = vld [vmem:[%s839_s12 + $0x30] sm:$0xff] (%p750_p5)  ;;  %540 = vst [vmem:[%s504_s20 + $0x118] sm:$0xff] (%p750_p5), %v539_v34 }
  0xd3   : > { %493 = vst [vmem:[%s839_s12 + $0x70] sm:$0xff] %v477_v21  ;;  %v531_v30 = vld [vmem:[%s839_s12 + $0x38] sm:$0xff] (%p750_p5) }
  0xd4   : > { %494 = vst [vmem:[%s839_s12 + $0x78] sm:$0xff] %v478_v22  ;;  %v541_v35 = vld [vmem:[%s839_s12 + $0x60] sm:$0xff] (%p750_p5) }
  0xd5   : > { %530 = vst [vmem:[%s504_s20 + $0x30] sm:$0xff] %v529_v29  ;;  %v543_v36 = vld [vmem:[%s839_s12 + $0x68] sm:$0xff] }
  0xd6   : > { %532 = vst [vmem:[%s504_s20 + $0x38] sm:$0xff] %v531_v30 }
  0xd7   : > { %542 = vst [vmem:[%s504_s20 + $0x120] sm:$0xff] %v541_v35 }
  0xd8   : > { %544 = vst [vmem:[%s504_s20 + $0x128] sm:$0xff] %v543_v36 }
  0xda   : > { %v545_v37 = vld [vmem:[%s839_s12 + $0x70] sm:$0xff] }
  0xdb   : > { %v547_v38 = vld [vmem:[%s839_s12 + $0x78] sm:$0xff]  ;;  %546 = vst [vmem:[%s504_s20 + $0x130] sm:$0xff] %v545_v37 }
  0xdc   : > { %548 = vst [vmem:[%s504_s20 + $0x138] sm:$0xff] %v547_v38 }
  0xdd PF: > { %p10_p10 = scmp.ge.s32.totalorder %s737_s16, 6   ;;  %s895_s12 = smov %s693_s13 }
  0xde   : > { %s896_s13 = smov %s748_s19  ;;  %s897_s14 = smov %s737_s16 }
  0xdf   :  { %12 = sbr.rel (!%p10_p10) target bundleno = 2 (0x2), region = 113 }

// kernel: forward.7
= control target key start
LH: loop header
LB: loop body
LE: loop exit
PB: predicated region body
PF: predicated region fallthrough
CT: control target
= control target key end

     0   :  { %vm190_vm0 = vcmask 130048   ;;  %v788_v28 = vmov 0   ;;  %s1525_s1 = inlined_call_operand.vmem [shape: f32[144,1024], index: 1, kind: input, shape index: {}]   ;;  %s1526_s0 = inlined_call_operand.vmem [shape: f32[32,144], index: 0, kind: input, shape index: {}]   ;;  %s1527_s2 = inlined_call_operand.vmem [shape: f32[32,1], index: 2, kind: input, shape index: {}]   ;;  %s1528_s3 = inlined_call_operand.vmem [shape: f32[32,1024], index: 3, kind: output, shape index: {}]  }
   0x1   :  { %v142_v0 = vld [vmem:[%s1525_s1 + $0x3c0] sm:$0xff]  ;;  %v143_v1 = vld [vmem:[%s1525_s1 + $0x3c8] sm:$0xff]  ;;  %v160_v17 = vld [vmem:[%s1525_s1 + $0x450] sm:$0xff]  ;;  %786 = vset.pattern.permute.xlu0 %v788_v28  ;;  %787 = vset.pattern.permute.xlu1 %v788_v28 }
   0x2   :  { %v134_v2 = vld [vmem:[%s1525_s1 + $0x380] sm:$0xff]  ;;  %203 = vmatpush.msra.mxu0 %v142_v0  ;;  %261 = vmatpush.msra.mxu2 %v143_v1  ;;  %v135_v3 = vld [vmem:[%s1525_s1 + $0x388] sm:$0xff]  ;;  %v144_v18 = vld [vmem:[%s1525_s1 + $0x3d0] sm:$0xff] }
   0x3   :  { %v126_v4 = vld [vmem:[%s1525_s1 + $0x340] sm:$0xff]  ;;  %v127_v5 = vld [vmem:[%s1525_s1 + $0x348] sm:$0xff]  ;;  %v136_v21 = vld [vmem:[%s1525_s1 + $0x390] sm:$0xff] }
   0x4   :  { %v159_v6 = vld [vmem:[%s1525_s1 + $0x448] sm:$0xff]  ;;  %204 = vmatpush.msra.mxu0 %v134_v2  ;;  %262 = vmatpush.msra.mxu2 %v135_v3  ;;  %v118_v8 = vld [vmem:[%s1525_s1 + $0x300] sm:$0xff]  ;;  %v890_v24 = vld [vmem:[%s1526_s0 + $0x18] sm:$0xff] }
   0x5   :  { %v151_v7 = vld [vmem:[%s1525_s1 + $0x408] sm:$0xff]  ;;  %304 = vmatpush.msra.mxu3 %v159_v6  ;;  %v158_v10 = vld [vmem:[%s1525_s1 + $0x440] sm:$0xff]  ;;  %v128_v25 = vld [vmem:[%s1525_s1 + $0x350] sm:$0xff] }
   0x6   :  { %v119_v9 = vld [vmem:[%s1525_s1 + $0x308] sm:$0xff]  ;;  %205 = vmatpush.msra.mxu0 %v126_v4  ;;  %263 = vmatpush.msra.mxu2 %v127_v5  ;;  %v150_v12 = vld [vmem:[%s1525_s1 + $0x400] sm:$0xff]  ;;  %v120_v29 = vld [vmem:[%s1525_s1 + $0x310] sm:$0xff] }
   0x7   :  { %v845_v11 = vld [vmem:[%s1526_s0 + $0x8] sm:$0xff]  ;;  %305 = vmatpush.msra.mxu3 %v151_v7  ;;  %v110_v13 = vld [vmem:[%s1525_s1 + $0x2c0] sm:$0xff]  ;;  %246 = vmatpush.msra.mxu1 %v158_v10  ;;  %v152_v32 = vld [vmem:[%s1525_s1 + $0x410] sm:$0xff] }
   0x8   :  { %v111_v14 = vld [vmem:[%s1525_s1 + $0x2c8] sm:$0xff]  ;;  %206 = vmatpush.msra.mxu0 %v118_v8  ;;  %264 = vmatpush.msra.mxu2 %v119_v9  ;;  %v102_v15 = vld [vmem:[%s1525_s1 + $0x280] sm:$0xff]  ;;  %v112_v35 = vld [vmem:[%s1525_s1 + $0x2d0] sm:$0xff] }
   0x9   :  { %739 = vmatmul.msk.f32.vlgmr.msra.gmra.mxu3 %vm190_vm0, %v845_v11  ;;  %247 = vmatpush.msra.mxu1 %v150_v12  ;;  %v103_v16 = vld [vmem:[%s1525_s1 + $0x288] sm:$0xff]  ;;  %v94_v19 = vld [vmem:[%s1525_s1 + $0x240] sm:$0xff]  ;;  %v161_v36 = vld [vmem:[%s1525_s1 + $0x458] sm:$0xff] }
   0xa   :  { %207 = vmatpush.msra.mxu0 %v110_v13  ;;  %265 = vmatpush.msra.mxu2 %v111_v14  ;;  %v95_v20 = vld [vmem:[%s1525_s1 + $0x248] sm:$0xff]  ;;  %v86_v22 = vld [vmem:[%s1525_s1 + $0x200] sm:$0xff]  ;;  %v104_v39 = vld [vmem:[%s1525_s1 + $0x290] sm:$0xff] }
   0xb   :  { %735 = vmatmul.msk.f32.vlgmr.msra.gmra.mxu1 %vm190_vm0, %v845_v11  ;;  %362 = vmatpush.msrb.mxu3 %v160_v17  ;;  %v87_v23 = vld [vmem:[%s1525_s1 + $0x208] sm:$0xff]  ;;  %v78_v26 = vld [vmem:[%s1525_s1 + $0x1c0] sm:$0xff]  ;;  %v96_v44 = vld [vmem:[%s1525_s1 + $0x250] sm:$0xff] }
   0xc   :  { %208 = vmatpush.msra.mxu0 %v102_v15  ;;  %266 = vmatpush.msra.mxu2 %v103_v16  ;;  %v79_v27 = vld [vmem:[%s1525_s1 + $0x1c8] sm:$0xff]  ;;  %v70_v30 = vld [vmem:[%s1525_s1 + $0x180] sm:$0xff]  ;;  %v88_v47 = vld [vmem:[%s1525_s1 + $0x210] sm:$0xff] }
   0xd   :  { %319 = vmatpush.msrb.mxu1 %v144_v18  ;;  %v71_v31 = vld [vmem:[%s1525_s1 + $0x188] sm:$0xff]  ;;  %v62_v33 = vld [vmem:[%s1525_s1 + $0x140] sm:$0xff]  ;;  %363 = vmatpush.msrb.mxu3 %v152_v32  ;;  %v80_v50 = vld [vmem:[%s1525_s1 + $0x1d0] sm:$0xff] }
   0xe   :  { %209 = vmatpush.msra.mxu0 %v94_v19  ;;  %267 = vmatpush.msra.mxu2 %v95_v20  ;;  %v63_v34 = vld [vmem:[%s1525_s1 + $0x148] sm:$0xff]  ;;  %v54_v37 = vld [vmem:[%s1525_s1 + $0x100] sm:$0xff]  ;;  %v153_v51 = vld [vmem:[%s1525_s1 + $0x418] sm:$0xff] }
   0xf   :  { %320 = vmatpush.msrb.mxu1 %v136_v21  ;;  %v55_v38 = vld [vmem:[%s1525_s1 + $0x108] sm:$0xff]  ;;  %767 = vmatpush.msra.mxu3 %v161_v36  ;;  %v166_v41 = vld [vmem:[%s1527_s2] sm:$0xff]  ;;  %v72_v55 = vld [vmem:[%s1525_s1 + $0x190] sm:$0xff] }
  0x10   :  { %210 = vmatpush.msra.mxu0 %v86_v22  ;;  %268 = vmatpush.msra.mxu2 %v87_v23  ;;  %v941_v40 = vld [vmem:[%s1526_s0 + $0x28] sm:$0xff]  ;;  %v46_v42 = vld [vmem:[%s1525_s1 + $0xc0] sm:$0xff]  ;;  %v1000_v57 = vld [vmem:[%s1526_s0 + $0x38] sm:$0xff] }
  0x11   :  { %740 = vmatmul.msk.f32.gmra.mxu3 %vm190_vm0, %v890_v24  ;;  %321 = vmatpush.msrb.mxu1 %v128_v25  ;;  %v47_v43 = vld [vmem:[%s1525_s1 + $0xc8] sm:$0xff]  ;;  %v38_v45 = vld [vmem:[%s1525_s1 + $0x80] sm:$0xff]  ;;  %v64_v58 = vld [vmem:[%s1525_s1 + $0x150] sm:$0xff] }
  0x12   :  { %211 = vmatpush.msra.mxu0 %v78_v26  ;;  %269 = vmatpush.msra.mxu2 %v79_v27  ;;  %v39_v46 = vld [vmem:[%s1525_s1 + $0x88] sm:$0xff]  ;;  %v30_v48 = vld [vmem:[%s1525_s1 + $0x40] sm:$0xff]  ;;  %v145_v59 = vld [vmem:[%s1525_s1 + $0x3d8] sm:$0xff] }
  0x13   :  { %322 = vmatpush.msrb.mxu1 %v120_v29  ;;  %172 = vperm.xlu0 %786, %v166_v41   ;;  %v31_v49 = vld [vmem:[%s1525_s1 + $0x48] sm:$0xff]  ;;  %v22_v52 = vld [vmem:[%s1525_s1] sm:$0xff]  ;;  %v168_v60 = vld [vmem:[%s1527_s2 + $0x10] sm:$0xff] }
  0x14   :  { %212 = vmatpush.msra.mxu0 %v70_v30  ;;  %270 = vmatpush.msra.mxu2 %v71_v31  ;;  %v167_v53 = vld [vmem:[%s1527_s2 + $0x8] sm:$0xff]  ;;  %v995_v56 = vld [vmem:[%s1526_s0] sm:$0xff]  ;;  %v56_v61 = vld [vmem:[%s1525_s1 + $0x110] sm:$0xff] }
  0x15   :  { %736 = vmatmul.msk.f32.gmra.mxu1 %vm190_vm0, %v890_v24  ;;  %768 = vmatpush.msra.mxu3 %v153_v51  ;;  %v23_v54 = vld [vmem:[%s1525_s1 + $0x8] sm:$0xff]  ;;  %v137_v62 = vld [vmem:[%s1525_s1 + $0x398] sm:$0xff]  ;;  %v48_v63 = vld [vmem:[%s1525_s1 + $0xd0] sm:$0xff] }
  0x16   :  { %213 = vmatpush.msra.mxu0 %v62_v33  ;;  %271 = vmatpush.msra.mxu2 %v63_v34  ;;  %v129_v0 = vld [vmem:[%s1525_s1 + $0x358] sm:$0xff]  ;;  %v163_v1 = vld [vmem:[%s1525_s1 + $0x468] sm:$0xff]  ;;  %v40_v2 = vld [vmem:[%s1525_s1 + $0x90] sm:$0xff] }
  0x17   :  { %323 = vmatpush.msrb.mxu1 %v112_v35  ;;  %182 = vperm.xlu1 %787, %v168_v60   ;;  %v121_v3 = vld [vmem:[%s1525_s1 + $0x318] sm:$0xff]  ;;  %v1041_v4 = vld [vmem:[%s1526_s0 + $0x10] sm:$0xff]  ;;  %v146_v10 = vld [vmem:[%s1525_s1 + $0x3e0] sm:$0xff] }
  0x18   :  { %214 = vmatpush.msra.mxu0 %v54_v37  ;;  %272 = vmatpush.msra.mxu2 %v55_v38  ;;  %v32_v5 = vld [vmem:[%s1525_s1 + $0x50] sm:$0xff]  ;;  %v113_v6 = vld [vmem:[%s1525_s1 + $0x2d8] sm:$0xff]  ;;  %v138_v13 = vld [vmem:[%s1525_s1 + $0x3a0] sm:$0xff] }
  0x19   :  { %324 = vmatpush.msrb.mxu1 %v104_v39  ;;  %741 = vmatmul.msk.f32.gmra.mxu3 %vm190_vm0, %v941_v40  ;;  %v169_v7 = vld [vmem:[%s1527_s2 + $0x18] sm:$0xff]  ;;  %v24_v8 = vld [vmem:[%s1525_s1 + $0x10] sm:$0xff]  ;;  %v1078_v15 = vld [vmem:[%s1526_s0 + $0x20] sm:$0xff] }
  0x1a   :  { %215 = vmatpush.msra.mxu0 %v46_v42  ;;  %273 = vmatpush.msra.mxu2 %v47_v43  ;;  %v105_v9 = vld [vmem:[%s1525_s1 + $0x298] sm:$0xff]  ;;  %v155_v16 = vld [vmem:[%s1525_s1 + $0x428] sm:$0xff]  ;;  %v130_v18 = vld [vmem:[%s1525_s1 + $0x360] sm:$0xff] }
  0x1b   :  { %325 = vmatpush.msrb.mxu1 %v96_v44  ;;  %177 = vperm.xlu0 %786, %v167_v53   ;;  %v97_v12 = vld [vmem:[%s1525_s1 + $0x258] sm:$0xff]  ;;  %v162_v19 = vld [vmem:[%s1525_s1 + $0x460] sm:$0xff]  ;;  %v1121_v28 = vld [vmem:[%s1526_s0 + $0x30] sm:$0xff] }
  0x1c   :  { %216 = vmatpush.msra.mxu0 %v38_v45  ;;  %274 = vmatpush.msra.mxu2 %v39_v46  ;;  %v89_v14 = vld [vmem:[%s1525_s1 + $0x218] sm:$0xff]  ;;  %v122_v21 = vld [vmem:[%s1525_s1 + $0x320] sm:$0xff]  ;;  %v147_v38 = vld [vmem:[%s1525_s1 + $0x3e8] sm:$0xff] }
  0x1d   :  { %326 = vmatpush.msrb.mxu1 %v88_v47  ;;  %v81_v17 = vld [vmem:[%s1525_s1 + $0x1d8] sm:$0xff]  ;;  %v154_v22 = vld [vmem:[%s1525_s1 + $0x420] sm:$0xff]  ;;  %v139_v42 = vld [vmem:[%s1525_s1 + $0x3a8] sm:$0xff] }
  0x1e   :  { %737 = vmatmul.msk.f32.gmra.mxu1 %vm190_vm0, %v941_v40  ;;  %217 = vmatpush.msra.mxu0 %v30_v48  ;;  %v73_v20 = vld [vmem:[%s1525_s1 + $0x198] sm:$0xff]  ;;  %v114_v25 = vld [vmem:[%s1525_s1 + $0x2e0] sm:$0xff]  ;;  %v131_v44 = vld [vmem:[%s1525_s1 + $0x368] sm:$0xff] }
  0x1f   :  { %275 = vmatpush.msra.mxu2 %v31_v49  ;;  %327 = vmatpush.msrb.mxu1 %v80_v50  ;;  %v65_v23 = vld [vmem:[%s1525_s1 + $0x158] sm:$0xff]  ;;  %v106_v27 = vld [vmem:[%s1525_s1 + $0x2a0] sm:$0xff]  ;;  %v123_v46 = vld [vmem:[%s1525_s1 + $0x328] sm:$0xff] }
  0x20   :  { %218 = vmatpush.msra.mxu0 %v22_v52  ;;  %187 = vperm.xlu1 %787, %v169_v7   ;;  %v57_v26 = vld [vmem:[%s1525_s1 + $0x118] sm:$0xff]  ;;  %v98_v30 = vld [vmem:[%s1525_s1 + $0x260] sm:$0xff]  ;;  %v115_v48 = vld [vmem:[%s1525_s1 + $0x2e8] sm:$0xff] }
  0x21   :  { %276 = vmatpush.msra.mxu2 %v23_v54  ;;  %328 = vmatpush.msrb.mxu1 %v72_v55  ;;  %v49_v29 = vld [vmem:[%s1525_s1 + $0xd8] sm:$0xff]  ;;  %v90_v32 = vld [vmem:[%s1525_s1 + $0x220] sm:$0xff]  ;;  %v164_v49 = vld [vmem:[%s1525_s1 + $0x470] sm:$0xff] }
  0x22   :  { %219 = vmatmul.f32.vlgmr.msra.gmra.mxu0 %v995_v56  ;;  %277 = vmatmul.f32.vlgmr.msra.gmra.mxu2 %v995_v56  ;;  %v41_v31 = vld [vmem:[%s1525_s1 + $0x98] sm:$0xff]  ;;  %v82_v34 = vld [vmem:[%s1525_s1 + $0x1e0] sm:$0xff]  ;;  %v148_v52 = vld [vmem:[%s1525_s1 + $0x3f0] sm:$0xff] }
  0x23   :  { %742 = vmatmul.msk.f32.gmra.mxu3 %vm190_vm0, %v1000_v57  ;;  %420 = vmatpush.msrb.mxu2 %v161_v36  ;;  %v33_v33 = vld [vmem:[%s1525_s1 + $0x58] sm:$0xff]  ;;  %v74_v36 = vld [vmem:[%s1525_s1 + $0x1a0] sm:$0xff]  ;;  %v99_v53 = vld [vmem:[%s1525_s1 + $0x268] sm:$0xff] }
  0x24   :  { %329 = vmatpush.msrb.mxu1 %v64_v58  ;;  %377 = vmatpush.msrb.mxu0 %v145_v59  ;;  %v25_v35 = vld [vmem:[%s1525_s1 + $0x18] sm:$0xff]  ;;  %v66_v37 = vld [vmem:[%s1525_s1 + $0x160] sm:$0xff]  ;;  %v156_v54 = vld [vmem:[%s1525_s1 + $0x430] sm:$0xff] }
  0x25   :  { %421 = vmatpush.msrb.mxu2 %v153_v51  ;;  %v165_v39 = vld [vmem:[%s1525_s1 + $0x478] sm:$0xff]  ;;  %v58_v41 = vld [vmem:[%s1525_s1 + $0x120] sm:$0xff]  ;;  %v107_v51 = vld [vmem:[%s1525_s1 + $0x2a8] sm:$0xff] }
  0x26   :  { %330 = vmatpush.msrb.mxu1 %v56_v61  ;;  %378 = vmatpush.msrb.mxu0 %v137_v62  ;;  %v50_v43 = vld [vmem:[%s1525_s1 + $0xe0] sm:$0xff]  ;;  %v157_v55 = vld [vmem:[%s1525_s1 + $0x438] sm:$0xff]  ;;  %v140_v58 = vld [vmem:[%s1525_s1 + $0x3b0] sm:$0xff] }
  0x27   :  { %738 = vmatmul.msk.f32.gmra.mxu1 %vm190_vm0, %v1000_v57  ;;  %536 = vmatpush.msra.mxu2 %v163_v1  ;;  %v42_v45 = vld [vmem:[%s1525_s1 + $0xa0] sm:$0xff]  ;;  %v91_v59 = vld [vmem:[%s1525_s1 + $0x228] sm:$0xff]  ;;  %v132_v61 = vld [vmem:[%s1525_s1 + $0x370] sm:$0xff] }
  0x28   :  { %331 = vmatpush.msrb.mxu1 %v48_v63  ;;  %379 = vmatpush.msrb.mxu0 %v129_v0  ;;  %v34_v47 = vld [vmem:[%s1525_s1 + $0x60] sm:$0xff]  ;;  %v83_v60 = vld [vmem:[%s1525_s1 + $0x1e8] sm:$0xff]  ;;  %v124_v63 = vld [vmem:[%s1525_s1 + $0x330] sm:$0xff] }
  0x29   :  { %537 = vmatpush.msra.mxu2 %v155_v16  ;;  %v26_v50 = vld [vmem:[%s1525_s1 + $0x20] sm:$0xff]  ;;  %v75_v62 = vld [vmem:[%s1525_s1 + $0x1a8] sm:$0xff]  ;;  %v116_v1 = vld [vmem:[%s1525_s1 + $0x2f0] sm:$0xff] }
  0x2a   :  { %332 = vmatpush.msrb.mxu1 %v40_v2  ;;  %380 = vmatpush.msrb.mxu0 %v121_v3  ;;  %v67_v0 = vld [vmem:[%s1525_s1 + $0x168] sm:$0xff]  ;;  %v108_v3 = vld [vmem:[%s1525_s1 + $0x2b0] sm:$0xff]  ;;  %v149_v16 = vld [vmem:[%s1525_s1 + $0x3f8] sm:$0xff] }
  0x2b   :  { %222 = vmatmul.f32.gmra.mxu0 %v1041_v4  ;;  %280 = vmatmul.f32.gmra.mxu2 %v1041_v4  ;;  %v59_v2 = vld [vmem:[%s1525_s1 + $0x128] sm:$0xff] }
  0x2c   :  { %743 = vmatmul.msk.f32.vlgmr.msrb.gmra.mxu3 %vm190_vm0, %v845_v11  ;;  %333 = vmatpush.msrb.mxu1 %v32_v5  ;;  %v51_v5 = vld [vmem:[%s1525_s1 + $0xe8] sm:$0xff] }
  0x2d   :  { %381 = vmatpush.msrb.mxu0 %v113_v6  ;;  %478 = vmatpush.msrb.mxu3 %v162_v19  ;;  %v100_v6 = vld [vmem:[%s1525_s1 + $0x270] sm:$0xff]  ;;  %v43_v7 = vld [vmem:[%s1525_s1 + $0xa8] sm:$0xff] }
  0x2e   :  { %334 = vmatpush.msrb.mxu1 %v24_v8  ;;  %v92_v8 = vld [vmem:[%s1525_s1 + $0x230] sm:$0xff] }
  0x2f   :  { %382 = vmatpush.msrb.mxu0 %v105_v9  ;;  %335 = vmatmul.f32.vlgmr.msrb.gmra.mxu1 %v995_v56  ;;  %v35_v9 = vld [vmem:[%s1525_s1 + $0x68] sm:$0xff]  ;;  %v52_v19 = vld [vmem:[%s1525_s1 + $0xf0] sm:$0xff] }
  0x30   :  { %435 = vmatpush.msra.mxu1 %v146_v10  ;;  %479 = vmatpush.msrb.mxu3 %v154_v22  ;;  %v84_v10 = vld [vmem:[%s1525_s1 + $0x1f0] sm:$0xff]  ;;  %v125_v22 = vld [vmem:[%s1525_s1 + $0x338] sm:$0xff] }
  0x31   :  { %383 = vmatpush.msrb.mxu0 %v97_v12  ;;  %v27_v12 = vld [vmem:[%s1525_s1 + $0x28] sm:$0xff] }
  0x32   :  { %436 = vmatpush.msra.mxu1 %v138_v13  ;;  %v76_v13 = vld [vmem:[%s1525_s1 + $0x1b0] sm:$0xff] }
  0x33   :  { %384 = vmatpush.msrb.mxu0 %v89_v14  ;;  %283 = vmatmul.f32.gmra.mxu2 %v1078_v15  ;;  %v68_v14 = vld [vmem:[%s1525_s1 + $0x170] sm:$0xff] }
  0x34   :  { %225 = vmatmul.f32.gmra.mxu0 %v1078_v15  ;;  %744 = vmatmul.msk.f32.gmra.mxu3 %vm190_vm0, %v890_v24 }
  0x35   :  { %385 = vmatpush.msrb.mxu0 %v81_v17  ;;  %437 = vmatpush.msra.mxu1 %v130_v18  ;;  %v60_v17 = vld [vmem:[%s1525_s1 + $0x130] sm:$0xff]  ;;  %v141_v18 = vld [vmem:[%s1525_s1 + $0x3b8] sm:$0xff] }
  0x37   :  { %386 = vmatpush.msrb.mxu0 %v73_v20  ;;  %438 = vmatpush.msra.mxu1 %v122_v21  ;;  %v133_v20 = vld [vmem:[%s1525_s1 + $0x378] sm:$0xff]  ;;  %v44_v21 = vld [vmem:[%s1525_s1 + $0xb0] sm:$0xff] }
  0x38   :  { %338 = vmatmul.f32.gmra.mxu1 %v1041_v4 }
  0x39   :  { %387 = vmatpush.msrb.mxu0 %v65_v23  ;;  %439 = vmatpush.msra.mxu1 %v114_v25  ;;  %v36_v23 = vld [vmem:[%s1525_s1 + $0x70] sm:$0xff]  ;;  %v117_v25 = vld [vmem:[%s1525_s1 + $0x2f8] sm:$0xff] }
  0x3b   :  { %388 = vmatpush.msrb.mxu0 %v57_v26  ;;  %440 = vmatpush.msra.mxu1 %v106_v27  ;;  %v28_v26 = vld [vmem:[%s1525_s1 + $0x30] sm:$0xff]  ;;  %v109_v27 = vld [vmem:[%s1525_s1 + $0x2b8] sm:$0xff] }
  0x3c   :  { %228 = vmatmul.f32.gmra.mxu0 %v1121_v28  ;;  %286 = vmatmul.f32.gmra.mxu2 %v1121_v28 }
  0x3d   :  { %745 = vmatmul.msk.f32.gmra.mxu3 %vm190_vm0, %v941_v40  ;;  %389 = vmatpush.msrb.mxu0 %v49_v29  ;;  %v101_v29 = vld [vmem:[%s1525_s1 + $0x278] sm:$0xff] }
  0x3e   :  { %441 = vmatpush.msra.mxu1 %v98_v30  ;;  %v93_v30 = vld [vmem:[%s1525_s1 + $0x238] sm:$0xff] }
  0x3f   :  { %390 = vmatpush.msrb.mxu0 %v41_v31  ;;  %v85_v31 = vld [vmem:[%s1525_s1 + $0x1f8] sm:$0xff] }
  0x40   :  { %442 = vmatpush.msra.mxu1 %v90_v32  ;;  %v77_v32 = vld [vmem:[%s1525_s1 + $0x1b8] sm:$0xff] }
  0x41   :  { %341 = vmatmul.f32.gmra.mxu1 %v1078_v15  ;;  %391 = vmatpush.msrb.mxu0 %v33_v33  ;;  %v69_v33 = vld [vmem:[%s1525_s1 + $0x178] sm:$0xff] }
  0x42   :  { %443 = vmatpush.msra.mxu1 %v82_v34  ;;  %v61_v34 = vld [vmem:[%s1525_s1 + $0x138] sm:$0xff] }
  0x43   :  { %392 = vmatpush.msrb.mxu0 %v25_v35  ;;  %v53_v35 = vld [vmem:[%s1525_s1 + $0xf8] sm:$0xff] }
  0x44   :  { %444 = vmatpush.msra.mxu1 %v74_v36  ;;  %393 = vmatmul.f32.vlgmr.msrb.gmra.mxu0 %v995_v56  ;;  %v45_v36 = vld [vmem:[%s1525_s1 + $0xb8] sm:$0xff] }
  0x45   :  { %746 = vmatmul.msk.f32.gmra.mxu3 %vm190_vm0, %v1000_v57  ;;  %747 = vmatmul.msk.f32.vlgmr.msrb.gmra.mxu2 %vm190_vm0, %v845_v11 }
  0x46   :  { %445 = vmatpush.msra.mxu1 %v66_v37  ;;  %493 = vmatpush.msra.mxu0 %v147_v38  ;;  %v37_v37 = vld [vmem:[%s1525_s1 + $0x78] sm:$0xff] }
  0x47   :  { %652 = vmatpush.msrb.mxu2 %v165_v39  ;;  %v29_v38 = vld [vmem:[%s1525_s1 + $0x38] sm:$0xff] }
  0x48   :  { %446 = vmatpush.msra.mxu1 %v58_v41  ;;  %494 = vmatpush.msra.mxu0 %v139_v42 }
  0x49   :  { %344 = vmatmul.f32.gmra.mxu1 %v1121_v28  ;;  %653 = vmatpush.msrb.mxu2 %v157_v55 }
  0x4a   :  { %447 = vmatpush.msra.mxu1 %v50_v43  ;;  %495 = vmatpush.msra.mxu0 %v131_v44 }
  0x4c   :  { %448 = vmatpush.msra.mxu1 %v42_v45  ;;  %496 = vmatpush.msra.mxu0 %v123_v46 }
  0x4d   :  { %396 = vmatmul.f32.gmra.mxu0 %v1041_v4  ;;  %748 = vmatmul.msk.f32.gmra.mxu2 %vm190_vm0, %v890_v24 }
  0x4e   :  { %750 = vmatmul.msk.f32.vlgmr.msra.gmra.mxu3 %vm190_vm0, %v1000_v57  ;;  %449 = vmatpush.msra.mxu1 %v34_v47 }
  0x4f   :  { %497 = vmatpush.msra.mxu0 %v115_v48  ;;  %594 = vmatpush.msra.mxu3 %v164_v49 }
  0x50   :  { %450 = vmatpush.msra.mxu1 %v26_v50 }
  0x51   :  { %498 = vmatpush.msra.mxu0 %v107_v51  ;;  %451 = vmatmul.f32.vlgmr.msra.gmra.mxu1 %v995_v56 }
  0x52   :  { %551 = vmatpush.msrb.mxu1 %v148_v52  ;;  %595 = vmatpush.msra.mxu3 %v156_v54 }
  0x53   :  { %499 = vmatpush.msra.mxu0 %v99_v53 }
  0x54   :  { %552 = vmatpush.msrb.mxu1 %v140_v58 }
  0x55   :  { %500 = vmatpush.msra.mxu0 %v91_v59  ;;  %749 = vmatmul.msk.f32.gmra.mxu2 %vm190_vm0, %v941_v40 }
  0x56   :  { %399 = vmatmul.f32.gmra.mxu0 %v1078_v15  ;;  %751 = vmatmul.msk.f32.vlgmr.msrb.gmra.mxu3 %vm190_vm0, %v845_v11 }
  0x57   :  { %501 = vmatpush.msra.mxu0 %v83_v60  ;;  %553 = vmatpush.msrb.mxu1 %v132_v61 }
  0x59   :  { %502 = vmatpush.msra.mxu0 %v75_v62  ;;  %554 = vmatpush.msrb.mxu1 %v124_v63 }
  0x5a   :  { %454 = vmatmul.f32.gmra.mxu1 %v1041_v4 }
  0x5b   :  { %503 = vmatpush.msra.mxu0 %v67_v0  ;;  %555 = vmatpush.msrb.mxu1 %v116_v1 }
  0x5d   :  { %504 = vmatpush.msra.mxu0 %v59_v2  ;;  %556 = vmatpush.msrb.mxu1 %v108_v3 }
  0x5e   :  { %402 = vmatmul.f32.gmra.mxu0 %v1121_v28  ;;  %752 = vmatmul.msk.f32.gmra.mxu3 %vm190_vm0, %v890_v24 }
  0x5f   :  { %755 = vmatmul.msk.f32.vlgmr.msra.gmra.mxu2 %vm190_vm0, %v845_v11  ;;  %505 = vmatpush.msra.mxu0 %v51_v5 }
  0x60   :  { %557 = vmatpush.msrb.mxu1 %v100_v6 }
  0x61   :  { %506 = vmatpush.msra.mxu0 %v43_v7 }
  0x62   :  { %558 = vmatpush.msrb.mxu1 %v92_v8 }
  0x63   :  { %457 = vmatmul.f32.gmra.mxu1 %v1078_v15  ;;  %507 = vmatpush.msra.mxu0 %v35_v9 }
  0x64   :  { %559 = vmatpush.msrb.mxu1 %v84_v10 }
  0x65   :  { %508 = vmatpush.msra.mxu0 %v27_v12 }
  0x66   :  { %560 = vmatpush.msrb.mxu1 %v76_v13  ;;  %753 = vmatmul.msk.f32.gmra.mxu3 %vm190_vm0, %v941_v40 }
  0x67   :  { %509 = vmatmul.f32.vlgmr.msra.gmra.mxu0 %v995_v56  ;;  %756 = vmatmul.msk.f32.gmra.mxu2 %vm190_vm0, %v890_v24 }
  0x68   :  { %561 = vmatpush.msrb.mxu1 %v68_v14  ;;  %609 = vmatpush.msrb.mxu0 %v149_v16 }
  0x6a   :  { %562 = vmatpush.msrb.mxu1 %v60_v17  ;;  %610 = vmatpush.msrb.mxu0 %v141_v18 }
  0x6b   :  { %460 = vmatmul.f32.gmra.mxu1 %v1121_v28 }
  0x6c   :  { %563 = vmatpush.msrb.mxu1 %v52_v19  ;;  %611 = vmatpush.msrb.mxu0 %v133_v20 }
  0x6e   :  { %564 = vmatpush.msrb.mxu1 %v44_v21  ;;  %612 = vmatpush.msrb.mxu0 %v125_v22 }
  0x6f   :  { %754 = vmatmul.msk.f32.gmra.mxu3 %vm190_vm0, %v1000_v57  ;;  %512 = vmatmul.f32.gmra.mxu0 %v1041_v4 }
  0x70   :  { %757 = vmatmul.msk.f32.gmra.mxu2 %vm190_vm0, %v941_v40  ;;  %565 = vmatpush.msrb.mxu1 %v36_v23 }
  0x71   :  { %613 = vmatpush.msrb.mxu0 %v117_v25 }
  0x72   :  { %566 = vmatpush.msrb.mxu1 %v28_v26 }
  0x73   :  { %614 = vmatpush.msrb.mxu0 %v109_v27  ;;  %567 = vmatmul.f32.vlgmr.msrb.gmra.mxu1 %v995_v56 }
  0x74   :  { %769 = vmatpush.msra.mxu1 %v149_v16 }
  0x75   :  { %615 = vmatpush.msrb.mxu0 %v101_v29 }
  0x76   :  { %770 = vmatpush.msra.mxu1 %v141_v18 }
  0x77   :  { %616 = vmatpush.msrb.mxu0 %v93_v30  ;;  %759 = vmatmul.msk.f32.vlgmr.msra.gmra.mxu3 %vm190_vm0, %v845_v11 }
  0x78   :  { %515 = vmatmul.f32.gmra.mxu0 %v1078_v15  ;;  %758 = vmatmul.msk.f32.gmra.mxu2 %vm190_vm0, %v1000_v57 }
  0x79   :  { %771 = vmatpush.msra.mxu1 %v133_v20  ;;  %617 = vmatpush.msrb.mxu0 %v85_v31 }
  0x7b   :  { %772 = vmatpush.msra.mxu1 %v125_v22  ;;  %618 = vmatpush.msrb.mxu0 %v77_v32 }
  0x7c   :  { %570 = vmatmul.f32.gmra.mxu1 %v1041_v4 }
  0x7d   :  { %773 = vmatpush.msra.mxu1 %v117_v25  ;;  %619 = vmatpush.msrb.mxu0 %v69_v33 }
  0x7f   :  { %774 = vmatpush.msra.mxu1 %v109_v27  ;;  %620 = vmatpush.msrb.mxu0 %v61_v34 }
  0x80   :  { %518 = vmatmul.f32.gmra.mxu0 %v1121_v28  ;;  %760 = vmatmul.msk.f32.gmra.mxu3 %vm190_vm0, %v890_v24 }
  0x81   :  { %763 = vmatmul.msk.f32.vlgmr.msrb.gmra.mxu2 %vm190_vm0, %v845_v11  ;;  %775 = vmatpush.msra.mxu1 %v101_v29 }
  0x82   :  { %621 = vmatpush.msrb.mxu0 %v53_v35 }
  0x83   :  { %776 = vmatpush.msra.mxu1 %v93_v30 }
  0x84   :  { %622 = vmatpush.msrb.mxu0 %v45_v36  ;;  %573 = vmatmul.f32.gmra.mxu1 %v1078_v15 }
  0x85   :  { %777 = vmatpush.msra.mxu1 %v85_v31  ;;  %v1389_v43 = vpop.permute.xlu0 %172 }
  0x86   :  { %623 = vmatpush.msrb.mxu0 %v37_v37 }
  0x87   :  { %778 = vmatpush.msra.mxu1 %v77_v32 }
  0x88   :  { %624 = vmatpush.msrb.mxu0 %v29_v38  ;;  %761 = vmatmul.msk.f32.gmra.mxu3 %vm190_vm0, %v941_v40  ;;  %v249_v11 = vpop.f32.mrf.mxu1 }
  0x89   :  { %625 = vmatmul.f32.vlgmr.msrb.gmra.mxu0 %v995_v56  ;;  %764 = vmatmul.msk.f32.gmra.mxu2 %vm190_vm0, %v890_v24  ;;  %v1403_v58 = vpop.permute.xlu1 %182 }
  0x8a   :  { %779 = vmatpush.msra.mxu1 %v69_v33 }
  0x8c   :  { %780 = vmatpush.msra.mxu1 %v61_v34  ;;  %v307_v39 = vpop.f32.mrf.mxu3 }
  0x8d   :  { %576 = vmatmul.f32.gmra.mxu1 %v1121_v28  ;;  %v1396_v48 = vpop.permute.xlu0 %177 }
  0x8e   :  { %781 = vmatpush.msra.mxu1 %v53_v35 }
  0x90   :  { %782 = vmatpush.msra.mxu1 %v45_v36  ;;  %762 = vmatmul.msk.f32.gmra.mxu3 %vm190_vm0, %v1000_v57 }
  0x91   :  { %628 = vmatmul.f32.gmra.mxu0 %v1041_v4  ;;  %765 = vmatmul.msk.f32.gmra.mxu2 %vm190_vm0, %v941_v40 }
  0x92   :  { %783 = vmatpush.msra.mxu1 %v37_v37  ;;  %v252_v56 = vpop.f32.mrf.mxu1  ;;  %v1418_v13 = vpop.permute.xlu1 %187 }
  0x94   :  { %784 = vmatpush.msra.mxu1 %v29_v38  ;;  %v310_v41 = vpop.f32.mrf.mxu3 }
  0x95   :  { %634 = vmatmul.f32.vlgmr.msra.gmra.mxu1 %v1121_v28 }
  0x99   :  { %631 = vmatmul.f32.gmra.mxu0 %v1078_v15  ;;  %766 = vmatmul.msk.f32.gmra.mxu2 %vm190_vm0, %v1000_v57 }
  0x9b   :  { %v255_v24 = vpop.f32.mrf.mxu1 }
  0x9c   :  { %v313_v42 = vpop.f32.mrf.mxu3 }
  0x9f   :  { %v220_v44 = vpop.f32.mrf.mxu0 }
  0xa0   :  { %v221_v4 = vadd.f32 %v220_v44, %v1389_v43 }
  0xa2   :  { %v250_v45 = vadd.f32 %v249_v11, %v221_v4 }
  0xa4   :  { %v667_v40 = vmax.f32 %v250_v45, 0.0  ;;  %v258_v46 = vpop.f32.mrf.mxu1 }
  0xa5   :  { %v278_v47 = vpop.f32.mrf.mxu2 }
  0xa6   :  { %699 = vst [vmem:[%s1528_s3] sm:$0xff] %v667_v40  ;;  %v279_v15 = vadd.f32 %v278_v47, %v1389_v43  ;;  %v316_v28 = vpop.f32.mrf.mxu3 }
  0xa8   :  { %v308_v57 = vadd.f32 %v307_v39, %v279_v15  ;;  %v223_v49 = vpop.f32.mrf.mxu0 }
  0xa9   :  { %v224_v50 = vadd.f32 %v223_v49, %v1396_v48 }
  0xaa   :  { %v668_v51 = vmax.f32 %v308_v57, 0.0 }
  0xab   :  { %v253_v52 = vadd.f32 %v252_v56, %v224_v50 }
  0xac   :  { %700 = vst [vmem:[%s1528_s3 + $0x8] sm:$0xff] %v668_v51  ;;  %v336_v53 = vpop.f32.mrf.mxu1 }
  0xad   :  { %v675_v54 = vmax.f32 %v253_v52, 0.0  ;;  %v337_v55 = vadd.f32 %v336_v53, %v1389_v43 }
  0xae   :  { %v281_v59 = vpop.f32.mrf.mxu2 }
  0xaf   :  { %707 = vst [vmem:[%s1528_s3 + $0x40] sm:$0xff] %v675_v54  ;;  %v282_v60 = vadd.f32 %v281_v59, %v1396_v48  ;;  %v365_v61 = vpop.f32.mrf.mxu3 }
  0xb0   :  { %v366_v62 = vadd.f32 %v365_v61, %v337_v55 }
  0xb1   :  { %v311_v63 = vadd.f32 %v310_v41, %v282_v60  ;;  %v226_v0 = vpop.f32.mrf.mxu0 }
  0xb2   :  { %v669_v1 = vmax.f32 %v366_v62, 0.0  ;;  %v227_v2 = vadd.f32 %v226_v0, %v1403_v58 }
  0xb3   :  { %v676_v3 = vmax.f32 %v311_v63, 0.0 }
  0xb4   :  { %701 = vst [vmem:[%s1528_s3 + $0x10] sm:$0xff] %v669_v1  ;;  %v256_v5 = vadd.f32 %v255_v24, %v227_v2 }
  0xb5   :  { %708 = vst [vmem:[%s1528_s3 + $0x48] sm:$0xff] %v676_v3  ;;  %v339_v6 = vpop.f32.mrf.mxu1 }
  0xb6   :  { %v683_v7 = vmax.f32 %v256_v5, 0.0  ;;  %v340_v8 = vadd.f32 %v339_v6, %v1396_v48  ;;  %v284_v9 = vpop.f32.mrf.mxu2 }
  0xb7   :  { %v285_v10 = vadd.f32 %v284_v9, %v1403_v58  ;;  %v368_v12 = vpop.f32.mrf.mxu3 }
  0xb8   :  { %715 = vst [vmem:[%s1528_s3 + $0x80] sm:$0xff] %v683_v7  ;;  %v369_v14 = vadd.f32 %v368_v12, %v340_v8 }
  0xb9   :  { %v314_v16 = vadd.f32 %v313_v42, %v285_v10  ;;  %v229_v17 = vpop.f32.mrf.mxu0 }
  0xba   :  { %v677_v18 = vmax.f32 %v369_v14, 0.0  ;;  %v230_v19 = vadd.f32 %v229_v17, %v1418_v13 }
  0xbb   :  { %v684_v20 = vmax.f32 %v314_v16, 0.0 }
  0xbc   :  { %709 = vst [vmem:[%s1528_s3 + $0x50] sm:$0xff] %v677_v18  ;;  %v259_v21 = vadd.f32 %v258_v46, %v230_v19 }
  0xbd   :  { %716 = vst [vmem:[%s1528_s3 + $0x88] sm:$0xff] %v684_v20 }
  0xbe   :  { %v691_v22 = vmax.f32 %v259_v21, 0.0  ;;  %v342_v23 = vpop.f32.mrf.mxu1 }
  0xbf   :  { %v343_v25 = vadd.f32 %v342_v23, %v1403_v58  ;;  %v287_v26 = vpop.f32.mrf.mxu2 }
  0xc0   :  { %723 = vst [vmem:[%s1528_s3 + $0xc0] sm:$0xff] %v691_v22  ;;  %v288_v27 = vadd.f32 %v287_v26, %v1418_v13  ;;  %v371_v29 = vpop.f32.mrf.mxu3 }
  0xc1   :  { %v372_v30 = vadd.f32 %v371_v29, %v343_v25  ;;  %v394_v31 = vpop.f32.mrf.mxu0 }
  0xc2   :  { %v317_v32 = vadd.f32 %v316_v28, %v288_v27  ;;  %v395_v35 = vadd.f32 %v394_v31, %v1389_v43 }
  0xc3   :  { %v685_v33 = vmax.f32 %v372_v30, 0.0 }
  0xc4   :  { %v692_v34 = vmax.f32 %v317_v32, 0.0 }
  0xc5   :  { %717 = vst [vmem:[%s1528_s3 + $0x90] sm:$0xff] %v685_v33 }
  0xc6   :  { %724 = vst [vmem:[%s1528_s3 + $0xc8] sm:$0xff] %v692_v34  ;;  %v345_v36 = vpop.f32.mrf.mxu1 }
  0xc7   :  { %v346_v37 = vadd.f32 %v345_v36, %v1418_v13 }
  0xc8   :  { %v374_v38 = vpop.f32.mrf.mxu3  ;;  %v423_v11 = vpop.f32.mrf.mxu2 }
  0xc9   :  { %v375_v39 = vadd.f32 %v374_v38, %v346_v37  ;;  %v424_v56 = vadd.f32 %v423_v11, %v395_v35 }
  0xca   :  { %v397_v41 = vpop.f32.mrf.mxu0 }
  0xcb   :  { %v693_v24 = vmax.f32 %v375_v39, 0.0  ;;  %v670_v42 = vmax.f32 %v424_v56, 0.0  ;;  %v398_v44 = vadd.f32 %v397_v41, %v1396_v48 }
  0xcd   :  { %725 = vst [vmem:[%s1528_s3 + $0xd0] sm:$0xff] %v693_v24 }
  0xce   :  { %702 = vst [vmem:[%s1528_s3 + $0x18] sm:$0xff] %v670_v42  ;;  %v452_v4 = vpop.f32.mrf.mxu1 }
  0xcf   :  { %v453_v57 = vadd.f32 %v452_v4, %v1389_v43 }
  0xd0   :  { %v426_v45 = vpop.f32.mrf.mxu2 }
  0xd1   :  { %v427_v40 = vadd.f32 %v426_v45, %v398_v44  ;;  %v432_v46 = vpop.f32.mrf.mxu3 }
  0xd3   :  { %v678_v47 = vmax.f32 %v427_v40, 0.0  ;;  %v400_v15 = vpop.f32.mrf.mxu0 }
  0xd4   :  { %v401_v28 = vadd.f32 %v400_v15, %v1403_v58 }
  0xd5   :  { %710 = vst [vmem:[%s1528_s3 + $0x58] sm:$0xff] %v678_v47 }
  0xd7   :  { %v455_v49 = vpop.f32.mrf.mxu1 }
  0xd8   :  { %v429_v50 = vpop.f32.mrf.mxu2  ;;  %v456_v61 = vadd.f32 %v455_v49, %v1396_v48 }
  0xd9   :  { %v430_v51 = vadd.f32 %v429_v50, %v401_v28  ;;  %v481_v52 = vpop.f32.mrf.mxu3 }
  0xda   :  { %v482_v53 = vadd.f32 %v481_v52, %v453_v57 }
  0xdb   :  { %v686_v54 = vmax.f32 %v430_v51, 0.0  ;;  %v403_v55 = vpop.f32.mrf.mxu0 }
  0xdc   :  { %v671_v59 = vmax.f32 %v482_v53, 0.0  ;;  %v404_v60 = vadd.f32 %v403_v55, %v1418_v13 }
  0xdd   :  { %718 = vst [vmem:[%s1528_s3 + $0x98] sm:$0xff] %v686_v54 }
  0xde   :  { %703 = vst [vmem:[%s1528_s3 + $0x20] sm:$0xff] %v671_v59  ;;  %v433_v62 = vadd.f32 %v432_v46, %v404_v60 }
  0xe0   :  { %v694_v63 = vmax.f32 %v433_v62, 0.0  ;;  %v458_v0 = vpop.f32.mrf.mxu1 }
  0xe1   :  { %v484_v1 = vpop.f32.mrf.mxu3  ;;  %v459_v8 = vadd.f32 %v458_v0, %v1403_v58 }
  0xe2   :  { %726 = vst [vmem:[%s1528_s3 + $0xd8] sm:$0xff] %v694_v63  ;;  %v485_v2 = vadd.f32 %v484_v1, %v456_v61  ;;  %v539_v3 = vpop.f32.mrf.mxu2 }
  0xe4   :  { %v679_v5 = vmax.f32 %v485_v2, 0.0  ;;  %v510_v6 = vpop.f32.mrf.mxu0 }
  0xe5   :  { %v511_v7 = vadd.f32 %v510_v6, %v1389_v43 }
  0xe6   :  { %711 = vst [vmem:[%s1528_s3 + $0x60] sm:$0xff] %v679_v5 }
  0xe7   :  { %v540_v9 = vadd.f32 %v539_v3, %v511_v7 }
  0xe8   :  { %v461_v10 = vpop.f32.mrf.mxu1 }
  0xe9   :  { %v672_v12 = vmax.f32 %v540_v9, 0.0  ;;  %v487_v14 = vpop.f32.mrf.mxu3  ;;  %v462_v21 = vadd.f32 %v461_v10, %v1418_v13 }
  0xea   :  { %v488_v16 = vadd.f32 %v487_v14, %v459_v8  ;;  %v542_v17 = vpop.f32.mrf.mxu2 }
  0xeb   :  { %704 = vst [vmem:[%s1528_s3 + $0x28] sm:$0xff] %v672_v12 }
  0xec   :  { %v687_v18 = vmax.f32 %v488_v16, 0.0  ;;  %v513_v19 = vpop.f32.mrf.mxu0 }
  0xed   :  { %v514_v20 = vadd.f32 %v513_v19, %v1396_v48 }
  0xee   :  { %719 = vst [vmem:[%s1528_s3 + $0xa0] sm:$0xff] %v687_v18 }
  0xef   :  { %v543_v22 = vadd.f32 %v542_v17, %v514_v20 }
  0xf0   :  { %v568_v23 = vpop.f32.mrf.mxu1 }
  0xf1   :  { %v680_v25 = vmax.f32 %v543_v22, 0.0  ;;  %v569_v33 = vadd.f32 %v568_v23, %v1389_v43 }
  0xf2   :  { %v490_v26 = vpop.f32.mrf.mxu3 }
  0xf3   :  { %712 = vst [vmem:[%s1528_s3 + $0x68] sm:$0xff] %v680_v25  ;;  %v491_v27 = vadd.f32 %v490_v26, %v462_v21  ;;  %v545_v29 = vpop.f32.mrf.mxu2 }
  0xf5   :  { %v695_v30 = vmax.f32 %v491_v27, 0.0  ;;  %v516_v31 = vpop.f32.mrf.mxu0 }
  0xf6   :  { %v517_v32 = vadd.f32 %v516_v31, %v1403_v58 }
  0xf7   :  { %727 = vst [vmem:[%s1528_s3 + $0xe0] sm:$0xff] %v695_v30 }
  0xf8   :  { %v546_v34 = vadd.f32 %v545_v29, %v517_v32 }
  0xf9   :  { %v571_v36 = vpop.f32.mrf.mxu1 }
  0xfa   :  { %v688_v35 = vmax.f32 %v546_v34, 0.0  ;;  %v597_v37 = vpop.f32.mrf.mxu3  ;;  %v572_v24 = vadd.f32 %v571_v36, %v1396_v48 }
  0xfb   :  { %v548_v38 = vpop.f32.mrf.mxu2  ;;  %v598_v11 = vadd.f32 %v597_v37, %v569_v33 }
  0xfc   :  { %720 = vst [vmem:[%s1528_s3 + $0xa8] sm:$0xff] %v688_v35 }
  0xfd   :  { %v673_v39 = vmax.f32 %v598_v11, 0.0  ;;  %v519_v56 = vpop.f32.mrf.mxu0 }
  0xfe   :  { %v520_v41 = vadd.f32 %v519_v56, %v1418_v13 }
  0xff   :  { %705 = vst [vmem:[%s1528_s3 + $0x30] sm:$0xff] %v673_v39 }
 0x100   :  { %v549_v42 = vadd.f32 %v548_v38, %v520_v41 }
 0x101   :  { %v574_v45 = vpop.f32.mrf.mxu1 }
 0x102   :  { %v696_v44 = vmax.f32 %v549_v42, 0.0  ;;  %v575_v57 = vadd.f32 %v574_v45, %v1403_v58 }
 0x103   :  { %v600_v4 = vpop.f32.mrf.mxu3 }
 0x104   :  { %728 = vst [vmem:[%s1528_s3 + $0xe8] sm:$0xff] %v696_v44  ;;  %v601_v40 = vadd.f32 %v600_v4, %v572_v24  ;;  %v655_v46 = vpop.f32.mrf.mxu2 }
 0x106   :  { %v681_v47 = vmax.f32 %v601_v40, 0.0  ;;  %v626_v15 = vpop.f32.mrf.mxu0 }
 0x107   :  { %v627_v28 = vadd.f32 %v626_v15, %v1389_v43 }
 0x108   :  { %713 = vst [vmem:[%s1528_s3 + $0x70] sm:$0xff] %v681_v47 }
 0x109   :  { %v656_v49 = vadd.f32 %v655_v46, %v627_v28 }
 0x10a   :  { %v577_v54 = vpop.f32.mrf.mxu1 }
 0x10b   :  { %v674_v50 = vmax.f32 %v656_v49, 0.0  ;;  %v603_v51 = vpop.f32.mrf.mxu3  ;;  %v578_v60 = vadd.f32 %v577_v54, %v1418_v13 }
 0x10c   :  { %v604_v52 = vadd.f32 %v603_v51, %v575_v57  ;;  %v658_v53 = vpop.f32.mrf.mxu2 }
 0x10d   :  { %706 = vst [vmem:[%s1528_s3 + $0x38] sm:$0xff] %v674_v50 }
 0x10e   :  { %v689_v55 = vmax.f32 %v604_v52, 0.0  ;;  %v629_v59 = vpop.f32.mrf.mxu0 }
 0x10f   :  { %v630_v43 = vadd.f32 %v629_v59, %v1396_v48 }
 0x110   :  { %721 = vst [vmem:[%s1528_s3 + $0xb0] sm:$0xff] %v689_v55 }
 0x111   :  { %v659_v61 = vadd.f32 %v658_v53, %v630_v43 }
 0x112   :  { %v635_v48 = vpop.f32.mrf.mxu1 }
 0x113   :  { %v682_v62 = vmax.f32 %v659_v61, 0.0  ;;  %v606_v63 = vpop.f32.mrf.mxu3  ;;  %v636_v7 = vadd.f32 %v635_v48, %v1418_v13 }
 0x114   :  { %v607_v0 = vadd.f32 %v606_v63, %v578_v60  ;;  %v661_v1 = vpop.f32.mrf.mxu2 }
 0x115   :  { %714 = vst [vmem:[%s1528_s3 + $0x78] sm:$0xff] %v682_v62 }
 0x116   :  { %v697_v2 = vmax.f32 %v607_v0, 0.0  ;;  %v632_v3 = vpop.f32.mrf.mxu0 }
 0x117   :  { %v633_v5 = vadd.f32 %v632_v3, %v1403_v58 }
 0x118   :  { %729 = vst [vmem:[%s1528_s3 + $0xf0] sm:$0xff] %v697_v2 }
 0x119   :  { %v662_v6 = vadd.f32 %v661_v1, %v633_v5 }
 0x11b   :  { %v690_v8 = vmax.f32 %v662_v6, 0.0 }
 0x11c   :  { %v664_v9 = vpop.f32.mrf.mxu2 }
 0x11d   :  { %722 = vst [vmem:[%s1528_s3 + $0xb8] sm:$0xff] %v690_v8  ;;  %v665_v10 = vadd.f32 %v664_v9, %v636_v7 }
 0x11f   :  { %v698_v12 = vmax.f32 %v665_v10, 0.0 }
 0x121   :  { %730 = vst [vmem:[%s1528_s3 + $0xf8] sm:$0xff] %v698_v12 }

// kernel: forward.8
= control target key start
LH: loop header
LB: loop body
LE: loop exit
PB: predicated region body
PF: predicated region fallthrough
CT: control target
= control target key end

     0   :  { %vm122_vm0 = vcmask 261120   ;;  %s681_s1 = inlined_call_operand.vmem [shape: f32[288,256], index: 1, kind: input, shape index: {}]   ;;  %s682_s0 = inlined_call_operand.vmem [shape: f32[32,288], index: 0, kind: input, shape index: {}]   ;;  %s683_s2 = inlined_call_operand.vmem [shape: f32[32,1], index: 2, kind: input, shape index: {}]   ;;  %s684_s3 = inlined_call_operand.vmem [shape: f32[32,256], index: 3, kind: output, shape index: {}]  }
   0x1   :  { %v56_v0 = vld [vmem:[%s681_s1 + $0xf0] sm:$0xff]  ;;  %v57_v3 = vld [vmem:[%s681_s1 + $0xf8] sm:$0xff]  ;;  %v54_v4 = vld [vmem:[%s681_s1 + $0xe0] sm:$0xff] }
   0x2   :  { %v88_v1 = vld [vmem:[%s681_s1 + $0x1f0] sm:$0xff]  ;;  %135 = vmatpush.msra.mxu0 %v56_v0  ;;  %v86_v5 = vld [vmem:[%s681_s1 + $0x1e0] sm:$0xff]  ;;  %222 = vmatpush.msra.mxu3 %v57_v3  ;;  %v55_v7 = vld [vmem:[%s681_s1 + $0xe8] sm:$0xff] }
   0x3   :  { %v96_v2 = vld [vmem:[%s681_s1 + $0x230] sm:$0xff]  ;;  %164 = vmatpush.msra.mxu1 %v88_v1  ;;  %v94_v6 = vld [vmem:[%s681_s1 + $0x220] sm:$0xff]  ;;  %v53_v11 = vld [vmem:[%s681_s1 + $0xd8] sm:$0xff] }
   0x4   :  { %205 = vmatpush.msra.mxu2 %v96_v2  ;;  %v52_v8 = vld [vmem:[%s681_s1 + $0xd0] sm:$0xff]  ;;  %136 = vmatpush.msra.mxu0 %v54_v4  ;;  %v50_v12 = vld [vmem:[%s681_s1 + $0xc0] sm:$0xff]  ;;  %v51_v15 = vld [vmem:[%s681_s1 + $0xc8] sm:$0xff] }
   0x5   :  { %165 = vmatpush.msra.mxu1 %v86_v5  ;;  %v84_v9 = vld [vmem:[%s681_s1 + $0x1d0] sm:$0xff]  ;;  %223 = vmatpush.msra.mxu3 %v55_v7  ;;  %v82_v13 = vld [vmem:[%s681_s1 + $0x1c0] sm:$0xff]  ;;  %v89_v18 = vld [vmem:[%s681_s1 + $0x1f8] sm:$0xff] }
   0x6   :  { %v92_v10 = vld [vmem:[%s681_s1 + $0x210] sm:$0xff]  ;;  %206 = vmatpush.msra.mxu2 %v94_v6  ;;  %137 = vmatpush.msra.mxu0 %v52_v8  ;;  %v90_v14 = vld [vmem:[%s681_s1 + $0x200] sm:$0xff]  ;;  %v49_v20 = vld [vmem:[%s681_s1 + $0xb8] sm:$0xff] }
   0x7   :  { %166 = vmatpush.msra.mxu1 %v84_v9  ;;  %224 = vmatpush.msra.mxu3 %v53_v11  ;;  %v420_v16 = vld [vmem:[%s682_s0 + $0x10] sm:$0xff]  ;;  %v46_v21 = vld [vmem:[%s681_s1 + $0xa0] sm:$0xff]  ;;  %v87_v22 = vld [vmem:[%s681_s1 + $0x1e8] sm:$0xff] }
   0x8   :  { %207 = vmatpush.msra.mxu2 %v92_v10  ;;  %v48_v17 = vld [vmem:[%s681_s1 + $0xb0] sm:$0xff]  ;;  %138 = vmatpush.msra.mxu0 %v50_v12  ;;  %v78_v23 = vld [vmem:[%s681_s1 + $0x1a0] sm:$0xff]  ;;  %v47_v24 = vld [vmem:[%s681_s1 + $0xa8] sm:$0xff] }
   0x9   :  { %167 = vmatpush.msra.mxu1 %v82_v13  ;;  %v80_v19 = vld [vmem:[%s681_s1 + $0x1b0] sm:$0xff]  ;;  %225 = vmatpush.msra.mxu3 %v51_v15  ;;  %v85_v26 = vld [vmem:[%s681_s1 + $0x1d8] sm:$0xff]  ;;  %v42_v29 = vld [vmem:[%s681_s1 + $0x80] sm:$0xff] }
   0xa   :  { %208 = vmatpush.msra.mxu2 %v90_v14  ;;  %139 = vmatpush.msra.mxu0 %v48_v17  ;;  %v44_v25 = vld [vmem:[%s681_s1 + $0x90] sm:$0xff]  ;;  %v45_v28 = vld [vmem:[%s681_s1 + $0x98] sm:$0xff]  ;;  %v83_v30 = vld [vmem:[%s681_s1 + $0x1c8] sm:$0xff]  ;;  %v348_v14 = vmov 0  }
   0xb   :  { %329 = vmatmul.msk.f32.vlgmr.msra.gmra.mxu2 %vm122_vm0, %v420_v16  ;;  %168 = vmatpush.msra.mxu1 %v80_v19  ;;  %v76_v27 = vld [vmem:[%s681_s1 + $0x190] sm:$0xff]  ;;  %v74_v31 = vld [vmem:[%s681_s1 + $0x180] sm:$0xff]  ;;  %v43_v32 = vld [vmem:[%s681_s1 + $0x88] sm:$0xff] }
   0xc   :  { %251 = vmatpush.msrb.mxu2 %v89_v18  ;;  %226 = vmatpush.msra.mxu3 %v49_v20  ;;  %v475_v33 = vld [vmem:[%s682_s0 + $0x28] sm:$0xff]  ;;  %v81_v34 = vld [vmem:[%s681_s1 + $0x1b8] sm:$0xff]  ;;  %v40_v35 = vld [vmem:[%s681_s1 + $0x70] sm:$0xff] }
   0xd   :  { %140 = vmatpush.msra.mxu0 %v46_v21  ;;  %169 = vmatpush.msra.mxu1 %v78_v23  ;;  %v72_v36 = vld [vmem:[%s681_s1 + $0x170] sm:$0xff]  ;;  %v41_v37 = vld [vmem:[%s681_s1 + $0x78] sm:$0xff]  ;;  %v79_v38 = vld [vmem:[%s681_s1 + $0x1a8] sm:$0xff] }
   0xe   :  { %252 = vmatpush.msrb.mxu2 %v87_v22  ;;  %227 = vmatpush.msra.mxu3 %v47_v24  ;;  %v38_v39 = vld [vmem:[%s681_s1 + $0x60] sm:$0xff]  ;;  %v39_v41 = vld [vmem:[%s681_s1 + $0x68] sm:$0xff]  ;;  %v77_v42 = vld [vmem:[%s681_s1 + $0x198] sm:$0xff] }
   0xf   :  { %141 = vmatpush.msra.mxu0 %v44_v25  ;;  %170 = vmatpush.msra.mxu1 %v76_v27  ;;  %v70_v40 = vld [vmem:[%s681_s1 + $0x160] sm:$0xff]  ;;  %v36_v43 = vld [vmem:[%s681_s1 + $0x50] sm:$0xff]  ;;  %v37_v45 = vld [vmem:[%s681_s1 + $0x58] sm:$0xff] }
  0x10   :  { %253 = vmatpush.msrb.mxu2 %v85_v26  ;;  %228 = vmatpush.msra.mxu3 %v45_v28  ;;  %v68_v44 = vld [vmem:[%s681_s1 + $0x150] sm:$0xff]  ;;  %v75_v46 = vld [vmem:[%s681_s1 + $0x188] sm:$0xff]  ;;  %v34_v47 = vld [vmem:[%s681_s1 + $0x40] sm:$0xff] }
  0x11   :  { %142 = vmatpush.msra.mxu0 %v42_v29  ;;  %171 = vmatpush.msra.mxu1 %v74_v31  ;;  %v66_v48 = vld [vmem:[%s681_s1 + $0x140] sm:$0xff]  ;;  %v35_v49 = vld [vmem:[%s681_s1 + $0x48] sm:$0xff]  ;;  %v32_v51 = vld [vmem:[%s681_s1 + $0x30] sm:$0xff] }
  0x12   :  { %254 = vmatpush.msrb.mxu2 %v83_v30  ;;  %229 = vmatpush.msra.mxu3 %v43_v32  ;;  %v530_v50 = vld [vmem:[%s682_s0 + $0x40] sm:$0xff]  ;;  %v73_v52 = vld [vmem:[%s681_s1 + $0x178] sm:$0xff]  ;;  %v64_v53 = vld [vmem:[%s681_s1 + $0x130] sm:$0xff] }
  0x13   :  { %330 = vmatmul.msk.f32.gmra.mxu2 %vm122_vm0, %v475_v33  ;;  %143 = vmatpush.msra.mxu0 %v40_v35  ;;  %v33_v54 = vld [vmem:[%s681_s1 + $0x38] sm:$0xff]  ;;  %v30_v55 = vld [vmem:[%s681_s1 + $0x20] sm:$0xff]  ;;  %v71_v56 = vld [vmem:[%s681_s1 + $0x168] sm:$0xff] }
  0x14   :  { %255 = vmatpush.msrb.mxu2 %v81_v34  ;;  %172 = vmatpush.msra.mxu1 %v72_v36  ;;  %v62_v57 = vld [vmem:[%s681_s1 + $0x120] sm:$0xff]  ;;  %v31_v58 = vld [vmem:[%s681_s1 + $0x28] sm:$0xff]  ;;  %v28_v59 = vld [vmem:[%s681_s1 + $0x10] sm:$0xff] }
  0x15   :  { %230 = vmatpush.msra.mxu3 %v41_v37  ;;  %144 = vmatpush.msra.mxu0 %v38_v39  ;;  %v69_v60 = vld [vmem:[%s681_s1 + $0x158] sm:$0xff]  ;;  %v60_v61 = vld [vmem:[%s681_s1 + $0x110] sm:$0xff]  ;;  %v26_v63 = vld [vmem:[%s681_s1] sm:$0xff] }
  0x16   :  { %256 = vmatpush.msrb.mxu2 %v79_v38  ;;  %173 = vmatpush.msra.mxu1 %v70_v40  ;;  %v29_v62 = vld [vmem:[%s681_s1 + $0x18] sm:$0xff]  ;;  %v67_v0 = vld [vmem:[%s681_s1 + $0x148] sm:$0xff]  ;;  %v58_v1 = vld [vmem:[%s681_s1 + $0x100] sm:$0xff] }
  0x17   :  { %231 = vmatpush.msra.mxu3 %v39_v41  ;;  %145 = vmatpush.msra.mxu0 %v36_v43  ;;  %v27_v2 = vld [vmem:[%s681_s1 + $0x8] sm:$0xff]  ;;  %v14_v3 = vld [vmem:[%s682_s0] sm:$0xff]  ;;  %v591_v5 = vld [vmem:[%s682_s0 + $0x58] sm:$0xff] }
  0x18   :  { %257 = vmatpush.msrb.mxu2 %v77_v42  ;;  %174 = vmatpush.msra.mxu1 %v68_v44  ;;  %v15_v4 = vld [vmem:[%s682_s0 + $0x8] sm:$0xff]  ;;  %v65_v6 = vld [vmem:[%s681_s1 + $0x138] sm:$0xff]  ;;  %v98_v11 = vld [vmem:[%s683_s2] sm:$0xff] }
  0x19   :  { %232 = vmatpush.msra.mxu3 %v37_v45  ;;  %146 = vmatpush.msra.mxu0 %v34_v47  ;;  %v97_v7 = vld [vmem:[%s681_s1 + $0x238] sm:$0xff]  ;;  %v63_v8 = vld [vmem:[%s681_s1 + $0x128] sm:$0xff]  ;;  %v18_v15 = vld [vmem:[%s682_s0 + $0x20] sm:$0xff] }
  0x1a   :  { %258 = vmatpush.msrb.mxu2 %v75_v46  ;;  %175 = vmatpush.msra.mxu1 %v66_v48  ;;  %v95_v9 = vld [vmem:[%s681_s1 + $0x228] sm:$0xff]  ;;  %v61_v10 = vld [vmem:[%s681_s1 + $0x118] sm:$0xff]  ;;  %v100_v19 = vld [vmem:[%s683_s2 + $0x10] sm:$0xff] }
  0x1b   :  { %233 = vmatpush.msra.mxu3 %v35_v49  ;;  %331 = vmatmul.msk.f32.gmra.mxu2 %vm122_vm0, %v530_v50  ;;  %v59_v12 = vld [vmem:[%s681_s1 + $0x108] sm:$0xff]  ;;  %v17_v13 = vld [vmem:[%s682_s0 + $0x18] sm:$0xff]  ;;  %v20_v21 = vld [vmem:[%s682_s0 + $0x30] sm:$0xff] }
  0x1c   :  { %147 = vmatpush.msra.mxu0 %v32_v51  ;;  %259 = vmatpush.msrb.mxu2 %v73_v52  ;;  %v93_v17 = vld [vmem:[%s681_s1 + $0x218] sm:$0xff]  ;;  %v91_v18 = vld [vmem:[%s681_s1 + $0x208] sm:$0xff]  ;;  %v24_v25 = vld [vmem:[%s682_s0 + $0x50] sm:$0xff] }
  0x1d   :  { %176 = vmatpush.msra.mxu1 %v64_v53  ;;  %234 = vmatpush.msra.mxu3 %v33_v54  ;;  %v99_v20 = vld [vmem:[%s683_s2 + $0x8] sm:$0xff]  ;;  %v21_v22 = vld [vmem:[%s682_s0 + $0x38] sm:$0xff] }
  0x1e   :  { %148 = vmatpush.msra.mxu0 %v30_v55  ;;  %260 = vmatpush.msrb.mxu2 %v71_v56  ;;  %v101_v23 = vld [vmem:[%s683_s2 + $0x18] sm:$0xff]  ;;  %v23_v24 = vld [vmem:[%s682_s0 + $0x48] sm:$0xff] }
  0x1f   :  { %177 = vmatpush.msra.mxu1 %v62_v57  ;;  %235 = vmatpush.msra.mxu3 %v31_v58 }
  0x20   :  { %149 = vmatpush.msra.mxu0 %v28_v59  ;;  %261 = vmatpush.msrb.mxu2 %v69_v60 }
  0x21   :  { %178 = vmatpush.msra.mxu1 %v60_v61  ;;  %236 = vmatpush.msra.mxu3 %v29_v62 }
  0x22   :  { %150 = vmatpush.msra.mxu0 %v26_v63  ;;  %262 = vmatpush.msrb.mxu2 %v67_v0 }
  0x23   :  { %179 = vmatpush.msra.mxu1 %v58_v1  ;;  %237 = vmatpush.msra.mxu3 %v27_v2 }
  0x24   :  { %151 = vmatmul.f32.vlgmr.msra.gmra.mxu0 %v14_v3  ;;  %180 = vmatmul.f32.vlgmr.msra.gmra.mxu1 %v15_v4 }
  0x25   :  { %332 = vmatmul.msk.f32.gmra.mxu2 %vm122_vm0, %v591_v5  ;;  %238 = vmatmul.f32.vlgmr.msra.gmra.mxu3 %v14_v3 }
  0x26   :  { %263 = vmatpush.msrb.mxu2 %v65_v6  ;;  %337 = vmatpush.msrb.mxu1 %v97_v7 }
  0x27   :  { %338 = vmatpush.msrb.mxu3 %v97_v7  ;;  %292 = vmatpush.msrb.mxu0 %v97_v7 }
  0x28   :  { %264 = vmatpush.msrb.mxu2 %v63_v8  ;;  %339 = vmatpush.msrb.mxu1 %v95_v9 }
  0x29   :  { %346 = vset.pattern.permute.xlu0 %v348_v14  ;;  %340 = vmatpush.msrb.mxu3 %v95_v9 }
  0x2a   :  { %265 = vmatpush.msrb.mxu2 %v61_v10  ;;  %104 = vperm.xlu0 %346, %v98_v11  }
  0x2b   :  { %293 = vmatpush.msrb.mxu0 %v95_v9  ;;  %341 = vmatpush.msrb.mxu1 %v93_v17 }
  0x2c   :  { %266 = vmatpush.msrb.mxu2 %v59_v12  ;;  %154 = vmatmul.f32.gmra.mxu0 %v17_v13 }
  0x2d   :  { %183 = vmatmul.f32.gmra.mxu1 %v18_v15  ;;  %267 = vmatmul.f32.vlgmr.msrb.gmra.mxu2 %v15_v4 }
  0x2e   :  { %241 = vmatmul.f32.gmra.mxu3 %v17_v13  ;;  %294 = vmatpush.msrb.mxu0 %v93_v17 }
  0x2f   :  { %342 = vmatpush.msrb.mxu3 %v93_v17  ;;  %343 = vmatpush.msrb.mxu1 %v91_v18 }
  0x30   :  { %347 = vset.pattern.permute.xlu1 %v348_v14  ;;  %295 = vmatpush.msrb.mxu0 %v91_v18 }
  0x31   :  { %344 = vmatpush.msrb.mxu3 %v91_v18  ;;  %114 = vperm.xlu1 %347, %v100_v19  }
  0x32   :  { %109 = vperm.xlu0 %346, %v99_v20  }
  0x34   :  { %157 = vmatmul.f32.gmra.mxu0 %v20_v21 }
  0x35   :  { %186 = vmatmul.f32.gmra.mxu1 %v21_v22  ;;  %270 = vmatmul.f32.gmra.mxu2 %v18_v15 }
  0x36   :  { %244 = vmatmul.f32.gmra.mxu3 %v20_v21 }
  0x39   :  { %119 = vperm.xlu1 %347, %v101_v23  }
  0x3c   :  { %160 = vmatmul.f32.gmra.mxu0 %v23_v24 }
  0x3d   :  { %189 = vmatmul.f32.gmra.mxu1 %v24_v25  ;;  %273 = vmatmul.f32.gmra.mxu2 %v21_v22 }
  0x3e   :  { %247 = vmatmul.f32.gmra.mxu3 %v23_v24 }
  0x44   :  { %333 = vmatmul.msk.f32.vlgmr.msrb.gmra.mxu0 %vm122_vm0, %v420_v16 }
  0x45   :  { %276 = vmatmul.f32.gmra.mxu2 %v24_v25  ;;  %334 = vmatmul.msk.f32.vlgmr.msrb.gmra.mxu1 %vm122_vm0, %v475_v33 }
  0x46   :  { %336 = vmatmul.msk.f32.vlgmr.msrb.gmra.mxu3 %vm122_vm0, %v591_v5 }
  0x4d   :  { %335 = vmatmul.msk.f32.gmra.mxu1 %vm122_vm0, %v530_v50 }
  0x8e   :  { %v210_v26 = vpop.f32.mrf.mxu2 }
  0x96   :  { %v213_v27 = vpop.f32.mrf.mxu2 }
  0x9c   :  { %v105_v28 = vpop.permute.xlu0 %104 }
  0x9e   :  { %v216_v29 = vpop.f32.mrf.mxu2 }
  0xa1   :  { %v152_v30 = vpop.f32.mrf.mxu0  ;;  %v181_v32 = vpop.f32.mrf.mxu1 }
  0xa2   :  { %v153_v31 = vadd.f32 %v152_v30, %v105_v28 }
  0xa3   :  { %v115_v42 = vpop.permute.xlu1 %114 }
  0xa4   :  { %v182_v34 = vadd.f32 %v181_v32, %v153_v31  ;;  %v110_v16 = vpop.permute.xlu0 %109 }
  0xa6   :  { %v211_v35 = vadd.f32 %v210_v26, %v182_v34 }
  0xa8   :  { %v309_v36 = vmax.f32 %v211_v35, 0.0  ;;  %v219_v37 = vpop.f32.mrf.mxu2  ;;  %v239_v38 = vpop.f32.mrf.mxu3 }
  0xa9   :  { %v155_v33 = vpop.f32.mrf.mxu0  ;;  %v240_v60 = vadd.f32 %v239_v38, %v105_v28 }
  0xaa   :  { %317 = vst [vmem:[%s684_s3] sm:$0xff] %v309_v36  ;;  %v156_v39 = vadd.f32 %v155_v33, %v110_v16  ;;  %v184_v40 = vpop.f32.mrf.mxu1 }
  0xab   :  { %v120_v52 = vpop.permute.xlu1 %119 }
  0xac   :  { %v185_v41 = vadd.f32 %v184_v40, %v156_v39 }
  0xae   :  { %v214_v43 = vadd.f32 %v213_v27, %v185_v41 }
  0xb0   :  { %v311_v44 = vmax.f32 %v214_v43, 0.0  ;;  %v268_v45 = vpop.f32.mrf.mxu2 }
  0xb1   :  { %v242_v46 = vpop.f32.mrf.mxu3  ;;  %v158_v47 = vpop.f32.mrf.mxu0  ;;  %v269_v63 = vadd.f32 %v268_v45, %v240_v60 }
  0xb2   :  { %319 = vst [vmem:[%s684_s3 + $0x10] sm:$0xff] %v311_v44  ;;  %v159_v48 = vadd.f32 %v158_v47, %v115_v42  ;;  %v187_v49 = vpop.f32.mrf.mxu1  ;;  %v243_v62 = vadd.f32 %v242_v46, %v110_v16 }
  0xb4   :  { %v188_v50 = vadd.f32 %v187_v49, %v159_v48 }
  0xb6   :  { %v217_v51 = vadd.f32 %v216_v29, %v188_v50 }
  0xb8   :  { %v313_v53 = vmax.f32 %v217_v51, 0.0  ;;  %v271_v54 = vpop.f32.mrf.mxu2 }
  0xb9   :  { %v245_v55 = vpop.f32.mrf.mxu3  ;;  %v161_v56 = vpop.f32.mrf.mxu0  ;;  %v272_v2 = vadd.f32 %v271_v54, %v243_v62 }
  0xba   :  { %321 = vst [vmem:[%s684_s3 + $0x20] sm:$0xff] %v313_v53  ;;  %v162_v57 = vadd.f32 %v161_v56, %v120_v52  ;;  %v190_v58 = vpop.f32.mrf.mxu1  ;;  %v246_v10 = vadd.f32 %v245_v55, %v115_v42 }
  0xbc   :  { %v191_v59 = vadd.f32 %v190_v58, %v162_v57 }
  0xbe   :  { %v220_v61 = vadd.f32 %v219_v37, %v191_v59 }
  0xc0   :  { %v315_v0 = vmax.f32 %v220_v61, 0.0  ;;  %v274_v1 = vpop.f32.mrf.mxu2 }
  0xc1   :  { %v248_v3 = vpop.f32.mrf.mxu3  ;;  %v297_v4 = vpop.f32.mrf.mxu0  ;;  %v275_v13 = vadd.f32 %v274_v1, %v246_v10 }
  0xc2   :  { %323 = vst [vmem:[%s684_s3 + $0x30] sm:$0xff] %v315_v0  ;;  %v298_v5 = vadd.f32 %v297_v4, %v269_v63  ;;  %v300_v6 = vpop.f32.mrf.mxu1  ;;  %v249_v11 = vadd.f32 %v248_v3, %v120_v52 }
  0xc3   :  { %v301_v7 = vadd.f32 %v300_v6, %v272_v2 }
  0xc4   :  { %v310_v8 = vmax.f32 %v298_v5, 0.0 }
  0xc5   :  { %v312_v9 = vmax.f32 %v301_v7, 0.0 }
  0xc6   :  { %318 = vst [vmem:[%s684_s3 + $0x8] sm:$0xff] %v310_v8 }
  0xc7   :  { %320 = vst [vmem:[%s684_s3 + $0x18] sm:$0xff] %v312_v9 }
  0xc8   :  { %v277_v12 = vpop.f32.mrf.mxu2 }
  0xc9   :  { %v278_v14 = vadd.f32 %v277_v12, %v249_v11  ;;  %v306_v15 = vpop.f32.mrf.mxu3 }
  0xca   :  { %v303_v17 = vpop.f32.mrf.mxu1 }
  0xcb   :  { %v304_v18 = vadd.f32 %v303_v17, %v275_v13  ;;  %v307_v19 = vadd.f32 %v306_v15, %v278_v14 }
  0xcd   :  { %v314_v20 = vmax.f32 %v304_v18, 0.0  ;;  %v316_v21 = vmax.f32 %v307_v19, 0.0 }
  0xcf   :  { %322 = vst [vmem:[%s684_s3 + $0x28] sm:$0xff] %v314_v20 }
  0xd0   :  { %324 = vst [vmem:[%s684_s3 + $0x38] sm:$0xff] %v316_v21 }

// kernel: forward.11
= control target key start
LH: loop header
LB: loop body
LE: loop exit
PB: predicated region body
PF: predicated region fallthrough
CT: control target
= control target key end

     0   :  { %vm36_vm0 = vcmask 261120   ;;  %s328_s0 = inlined_call_operand.vmem [shape: f32[2,32], index: 0, kind: input, shape index: {}]   ;;  %s329_s1 = inlined_call_operand.vmem [shape: f32[32,128], index: 1, kind: input, shape index: {}]   ;;  %s330_s2 = inlined_call_operand.vmem [shape: f32[1,128], index: 2, kind: input, shape index: {}]   ;;  %s331_s3 = inlined_call_operand.vmem [shape: f32[128,64], index: 3, kind: input, shape index: {}]   ;;  %s332_s4 = inlined_call_operand.vmem [shape: f32[1,64], index: 4, kind: input, shape index: {}]   ;;  %s333_s5 = inlined_call_operand.vmem [shape: f32[64,6], index: 5, kind: input, shape index: {}]   ;;  %s334_s6 = inlined_call_operand.vmem [shape: f32[1,6], index: 6, kind: input, shape index: {}]   ;;  %s335_s7 = inlined_call_operand.hbm [shape: f32[2,6], index: 7, kind: output, shape index: {}]  }
   0x1   :  { %v31_v0 = vld [vmem:[%s329_s1 + $0x18] sm:$0xff]  ;;  %v30_v1 = vld [vmem:[%s329_s1 + $0x10] sm:$0xff]  ;;  %v29_v3 = vld [vmem:[%s329_s1 + $0x8] sm:$0xff] }
   0x2   :  { %52 = vmatpush.msra.mxu0 %v31_v0  ;;  %v76_v2 = vld [vmem:[%s331_s3 + $0x78] sm:$0xff]  ;;  %v75_v4 = vld [vmem:[%s331_s3 + $0x70] sm:$0xff]  ;;  %v74_v5 = vld [vmem:[%s331_s3 + $0x68] sm:$0xff] }
   0x3   :  { %81 = vmatpush.msra.mxu1 %v76_v2  ;;  %v28_v6 = vld [vmem:[%s329_s1] sm:$0xff]  ;;  %v72_v9 = vld [vmem:[%s331_s3 + $0x58] sm:$0xff] }
   0x4   :  { %53 = vmatpush.msra.mxu0 %v30_v1  ;;  %v27_v7 = vld [vmem:[%s328_s0] sm:$0x3] }
   0x5   :  { %82 = vmatpush.msra.mxu1 %v75_v4  ;;  %v73_v8 = vld [vmem:[%s331_s3 + $0x60] sm:$0xff] }
   0x6   :  { %54 = vmatpush.msra.mxu0 %v29_v3 }
   0x7   :  { %83 = vmatpush.msra.mxu1 %v74_v5 }
   0x8   :  { %55 = vmatpush.msra.mxu0 %v28_v6 }
   0x9   :  { %12 = vsyncpa [#allocation3], 0  ;;  %156 = vmatmul.msk.f32.vlgmr.msra.gmra.mxu0 %vm36_vm0, %v27_v7  ;;  %84 = vmatpush.msra.mxu1 %v73_v8  ;;  %v71_v10 = vld [vmem:[%s331_s3 + $0x50] sm:$0xff]  ;;  %v70_v11 = vld [vmem:[%s331_s3 + $0x48] sm:$0xff]  ;;  %vm114_vm1 = vcmask 523264   ;;  %s188_s13 = smov [#allocation2]  }
   0xa   :  { %v69_v12 = vld [vmem:[%s331_s3 + $0x40] sm:$0xff]  ;;  %v68_v13 = vld [vmem:[%s331_s3 + $0x38] sm:$0xff]  ;;  %v67_v14 = vld [vmem:[%s331_s3 + $0x30] sm:$0xff]  ;;  %s145_s14 = sshll.u32 %s188_s13, 4  ;;  %vm138_vm2 = vcmask 41984   ;;  %s146_s14 = int_to_ptr.vmem [resolvable:$true] %s145_s14 }
   0xb   :  { %85 = vmatpush.msra.mxu1 %v72_v9  ;;  %v66_v15 = vld [vmem:[%s331_s3 + $0x28] sm:$0xff]  ;;  %v65_v16 = vld [vmem:[%s331_s3 + $0x20] sm:$0xff]  ;;  %v64_v17 = vld [vmem:[%s331_s3 + $0x18] sm:$0xff] }
   0xc   :  { %v63_v18 = vld [vmem:[%s331_s3 + $0x10] sm:$0xff]  ;;  %v62_v19 = vld [vmem:[%s331_s3 + $0x8] sm:$0xff]  ;;  %v61_v20 = vld [vmem:[%s331_s3] sm:$0xff] }
   0xd   :  { %86 = vmatpush.msra.mxu1 %v71_v10  ;;  %v109_v21 = vld [vmem:[%s333_s5 + $0x38] sm:$0xff]  ;;  %v108_v22 = vld [vmem:[%s333_s5 + $0x30] sm:$0xff]  ;;  %v107_v23 = vld [vmem:[%s333_s5 + $0x28] sm:$0xff] }
   0xe   :  { %126 = vmatpush.msra.mxu2 %v109_v21  ;;  %v106_v24 = vld [vmem:[%s333_s5 + $0x20] sm:$0xff]  ;;  %v105_v25 = vld [vmem:[%s333_s5 + $0x18] sm:$0xff]  ;;  %v104_v30 = vld [vmem:[%s333_s5 + $0x10] sm:$0xff] }
   0xf   :  { %87 = vmatpush.msra.mxu1 %v70_v11  ;;  %v159_v26 = vld [vmem:[%s330_s2] ss:$0 sm:$0xff]  ;;  %v103_v31 = vld [vmem:[%s333_s5 + $0x8] sm:$0xff] }
  0x10   :  { %127 = vmatpush.msra.mxu2 %v108_v22  ;;  %v102_v32 = vld [vmem:[%s333_s5] sm:$0xff]  ;;  %s147_s5 = sshll.u32 %s335_s7, 4  ;;  %s148_s5 = int_to_ptr.hbm [resolvable:$true] %s147_s5 }
  0x11   :  { %88 = vmatpush.msra.mxu1 %v69_v12  ;;  %v160_v33 = vld [vmem:[%s332_s4] ss:$0 sm:$0xff] }
  0x12   :  { %128 = vmatpush.msra.mxu2 %v107_v23  ;;  %v161_v37 = vld [vmem:[%s334_s6] ss:$0 sm:$0xff] }
  0x13   :  { %89 = vmatpush.msra.mxu1 %v68_v13 }
  0x14   :  { %129 = vmatpush.msra.mxu2 %v106_v24 }
  0x15   :  { %90 = vmatpush.msra.mxu1 %v67_v14 }
  0x16   :  { %130 = vmatpush.msra.mxu2 %v105_v25 }
  0x17   :  { %91 = vmatpush.msra.mxu1 %v66_v15 }
  0x18   :  { %131 = vmatpush.msra.mxu2 %v104_v30 }
  0x19   :  { %92 = vmatpush.msra.mxu1 %v65_v16 }
  0x1a   :  { %132 = vmatpush.msra.mxu2 %v103_v31 }
  0x1b   :  { %93 = vmatpush.msra.mxu1 %v64_v17 }
  0x1c   :  { %133 = vmatpush.msra.mxu2 %v102_v32 }
  0x1d   :  { %94 = vmatpush.msra.mxu1 %v63_v18 }
  0x1f   :  { %95 = vmatpush.msra.mxu1 %v62_v19 }
  0x21   :  { %96 = vmatpush.msra.mxu1 %v61_v20 }
  0x86   :  { %v57_v27 = vpop.f32.mrf.mxu0 }
  0x87   :  { %v58_v28 = vadd.f32 %v159_v26, %v57_v27 }
  0x89   :  { %v60_v29 = vmax.f32 %v58_v28, 0.0 }
  0x8b   :  { %97 = vmatmul.f32.vlgmr.msra.gmra.mxu1 %v60_v29 }
 0x108   :  { %v98_v34 = vpop.f32.mrf.mxu1 }
 0x109   :  { %v99_v35 = vadd.f32 %v160_v33, %v98_v34 }
 0x10b   :  { %v101_v36 = vmax.f32 %v99_v35, 0.0 }
 0x10d   :  { %157 = vmatmul.msk.f32.vlgmr.msra.gmra.mxu2 %vm114_vm1, %v101_v36 }
 0x190   :  { %v135_v38 = vpop.f32.mrf.mxu2 }
 0x191   :  { %v136_v39 = vadd.f32 %v161_v37, %v135_v38 }
 0x193   :  { %139 = vst.msk [vmem:[#allocation2] sm:$0x3] %vm138_vm2, %v136_v39 }
 0x194   :  { %150 = dma.vmem_to_hbm [thread:$0]  %s146_s14, 32, %s148_s5, [#allocation3]  }
 0x195   :  { %186 = dma.done.wait [#allocation3], 32  }
 0x196   :  { %187 = vsyncadd [#allocation3], 4294967264 }
 0x197   :  { %155 = vsyncpa [#allocation3], 1 }

// kernel: forward.9
= control target key start
LH: loop header
LB: loop body
LE: loop exit
PB: predicated region body
PF: predicated region fallthrough
CT: control target
= control target key end

     0   :  { %vm17_vm0 = vcmask 254976   ;;  %v909_v3 = vmov 0.0   ;;  %vm32_vm1 = vcmask 261120   ;;  %s910_s7 = smov 96   ;;  %s1176_s2 = inlined_call_operand.vmem [shape: f32[32,128], index: 2, kind: input, shape index: {}]   ;;  %s1177_s1 = inlined_call_operand.vmem [shape: f32[32,128], index: 1, kind: input, shape index: {}]   ;;  %s1178_s0 = inlined_call_operand.vmem [shape: f32[8,2,32], index: 0, kind: input, shape index: {}]   ;;  %s1179_s3 = inlined_call_operand.vmem [shape: f32[1,128], index: 3, kind: input, shape index: {}]   ;;  %s1180_s4 = inlined_call_operand.vmem [shape: f32[8,2,32], index: 4, kind: output, shape index: {}]  }
   0x1   :  { %v940_v0 = vld [vmem:[%s1176_s2 + $0x18] sm:$0xff]  ;;  %v950_v2 = vld [vmem:[%s1176_s2 + $0x10] sm:$0xff]  ;;  %18 = vst.msk [vmem:[#allocation2] sm:$0x3] %vm17_vm0, %v909_v3  ;;  %v964_v5 = vld [vmem:[%s1176_s2 + $0x8] sm:$0xff] }
   0x2   :  { %v945_v1 = vld [vmem:[%s1177_s1 + $0x18] sm:$0xff]  ;;  %48 = vmatpush.msra.mxu0 %v940_v0  ;;  %v958_v4 = vld [vmem:[%s1177_s1 + $0x10] sm:$0xff]  ;;  %19 = vst.msk [vmem:[#allocation3] sm:$0x3] %vm17_vm0, %v909_v3  ;;  %v969_v6 = vld [vmem:[%s1177_s1 + $0x8] sm:$0xff]  ;;  %146 = vmatpush.msra.mxu2 %v940_v0 }
   0x3   :  { %71 = vmatpush.msra.mxu1 %v945_v1  ;;  %169 = vmatpush.msra.mxu3 %v945_v1  ;;  %v978_v7 = vld [vmem:[%s1176_s2] sm:$0xff] }
   0x4   :  { %49 = vmatpush.msra.mxu0 %v950_v2  ;;  %v983_v8 = vld [vmem:[%s1177_s1] sm:$0xff]  ;;  %147 = vmatpush.msra.mxu2 %v950_v2 }
   0x5   :  { %72 = vmatpush.msra.mxu1 %v958_v4  ;;  %170 = vmatpush.msra.mxu3 %v958_v4  ;;  %v29_v9 = vld [vmem:[%s1178_s0] sm:$0x3]  ;;  %v806_v39 = vld [vmem:[%s1178_s0 + $0x2] sm:$0x3] }
   0x6   :  { %50 = vmatpush.msra.mxu0 %v964_v5  ;;  %148 = vmatpush.msra.mxu2 %v964_v5  ;;  %v1027_v11 = vld [vmem:[%s1179_s3] ss:$0 sm:$0xff]  ;;  %s911_s3 = smov 32  }
   0x7   :  { %73 = vmatpush.msra.mxu1 %v969_v6  ;;  %171 = vmatpush.msra.mxu3 %v969_v6 }
   0x8   :  { %51 = vmatpush.msra.mxu0 %v978_v7  ;;  %v30_v10 = vld [vmem:[#allocation2] sm:$0x3]  ;;  %149 = vmatpush.msra.mxu2 %v978_v7 }
   0x9   :  { %74 = vmatpush.msra.mxu1 %v983_v8  ;;  %803 = vmatmul.msk.f32.vlgmr.msra.gmra.mxu0 %vm32_vm1, %v30_v10  ;;  %v31_v32 = vld [vmem:[#allocation3] sm:$0x3] }
   0xa   :  { %804 = vmatmul.msk.f32.vlgmr.msra.gmra.mxu1 %vm32_vm1, %v29_v9  ;;  %172 = vmatpush.msra.mxu3 %v983_v8 }
   0xb   :  { %242 = vmatpush.msrb.mxu0 %v940_v0  ;;  %265 = vmatpush.msrb.mxu1 %v945_v1 }
   0xc   :  { %338 = vmatpush.msrb.mxu2 %v940_v0  ;;  %361 = vmatpush.msrb.mxu3 %v945_v1 }
   0xd   :  { %243 = vmatpush.msrb.mxu0 %v950_v2  ;;  %266 = vmatpush.msrb.mxu1 %v958_v4 }
   0xe   :  { %339 = vmatpush.msrb.mxu2 %v950_v2  ;;  %362 = vmatpush.msrb.mxu3 %v958_v4 }
   0xf   :  { %244 = vmatpush.msrb.mxu0 %v964_v5  ;;  %267 = vmatpush.msrb.mxu1 %v969_v6 }
  0x10   :  { %340 = vmatpush.msrb.mxu2 %v964_v5  ;;  %363 = vmatpush.msrb.mxu3 %v969_v6 }
  0x11   :  { %245 = vmatpush.msrb.mxu0 %v978_v7  ;;  %268 = vmatpush.msrb.mxu1 %v983_v8 }
  0x12   :  { %341 = vmatpush.msrb.mxu2 %v978_v7  ;;  %364 = vmatpush.msrb.mxu3 %v983_v8 }
  0x13   :  { %434 = vmatpush.msra.mxu0 %v940_v0  ;;  %457 = vmatpush.msra.mxu1 %v945_v1 }
  0x14   :  { %808 = vmatmul.msk.f32.vlgmr.msra.gmra.mxu3 %vm32_vm1, %v806_v39 }
  0x15   :  { %435 = vmatpush.msra.mxu0 %v950_v2  ;;  %458 = vmatpush.msra.mxu1 %v958_v4 }
  0x16   :  { %553 = vmatpush.msra.mxu3 %v945_v1 }
  0x17   :  { %436 = vmatpush.msra.mxu0 %v964_v5  ;;  %459 = vmatpush.msra.mxu1 %v969_v6 }
  0x18   :  { %554 = vmatpush.msra.mxu3 %v958_v4 }
  0x19   :  { %437 = vmatpush.msra.mxu0 %v978_v7  ;;  %460 = vmatpush.msra.mxu1 %v983_v8 }
  0x1a   :  { %555 = vmatpush.msra.mxu3 %v969_v6 }
  0x1c   :  { %556 = vmatpush.msra.mxu3 %v983_v8 }
  0x86   :  { %v53_v12 = vpop.f32.mrf.mxu0 }
  0x87   :  { %v76_v13 = vpop.f32.mrf.mxu1 }
  0x88   :  { %v77_v14 = vadd.f32 %v76_v13, %v53_v12 }
  0x8a   :  { %v82_v15 = vadd.f32 %v1027_v11, %v77_v14  ;;  %v811_v14 = vld [vmem:[%s1178_s0 + $0x4] sm:$0x3] }
  0x8b   :  { %813 = vmatmul.msk.f32.vlgmr.msrb.gmra.mxu1 %vm32_vm1, %v811_v14 }
  0x8c   :  { %845 = vtanh.f32 %v82_v15  ;;  %v805_v17 = vmul.f32 -1.442695, %v82_v15  ;;  %649 = vmatpush.msrb.mxu1 %v945_v1 }
  0x8e   :  { %847 = vpow2.f32 %v805_v17  ;;  %650 = vmatpush.msrb.mxu1 %v958_v4 }
  0x90   :  { %651 = vmatpush.msrb.mxu1 %v969_v6 }
  0x92   :  { %v846_v16 = vpop.eup %845  ;;  %652 = vmatpush.msrb.mxu1 %v983_v8 }
  0x93   :  { %105 = vrot.lane.b32.xlu0 %v846_v16, %s910_s7 }
  0x94   :  { %v848_v18 = vpop.eup %847 }
  0x95   :  { %v86_v19 = vadd.f32 1.0, %v848_v18 }
  0x97   :  { %849 = vrcp.f32 %v86_v19  ;;  %v98_v25 = vand.u32 2147483648, %v86_v19  ;;  %vm92_vm3 = vweird.f32 %v86_v19  ;;  %v96_v26 = vand.u32 2147483647, %v86_v19  ;;  %v174_v42 = vpop.f32.mrf.mxu3 }
  0x99   :  { %v99_v28 = vor.u32 1.1754944e-38, %v98_v25  ;;  %vm97_vm5 = vcmp.eq.f32.partialorder %v96_v26, 8.507059e+37 }
  0x9d   :  { %v850_v20 = vpop.eup %849 }
  0x9e   :  { %v88_v21 = vmul.f32 %v850_v20, %v86_v19  ;;  %vm93_vm2 = vweird.f32 %v850_v20 }
  0x9f   :  { %vm94_vm4 = vmor %vm92_vm3, %vm93_vm2 }
  0xa0   :  { %v89_v22 = vsub.f32 1.0, %v88_v21 }
  0xa2   :  { %v90_v23 = vmul.f32 %v850_v20, %v89_v22 }
  0xa4   :  { %v91_v24 = vadd.f32 %v850_v20, %v90_v23 }
  0xa6   :  { %v95_v27 = vsel %vm94_vm4, %v850_v20, %v91_v24 }
  0xa7   :  { %v100_v30 = vsel %vm97_vm5, %v99_v28, %v95_v27 }
  0xa8   :  { %v103_v33 = vmul.f32 %v100_v30, %v31_v32 }
 0x105   :  { %v106_v29 = vpop.permute.xlu0 %105 }
 0x106   :  { %v108_v31 = vmul.f32 %v106_v29, %v100_v30 }
 0x108   :  { %110 = vrot.lane.b32.xlu0 %v108_v31, %s910_s7  ;;  %v270_v17 = vpop.f32.mrf.mxu1 }
 0x17a   :  { %v111_v34 = vpop.permute.xlu0 %110 }
 0x17b   :  { %v113_v35 = vadd.f32 %v111_v34, %v103_v33 }
 0x17d   :  { %851 = vtanh.f32 %v113_v35  ;;  %120 = vst.msk [vmem:[#allocation3] sm:$0x3] %vm17_vm0, %v113_v35 }
 0x183   :  { %v852_v36 = vpop.eup %851 }
 0x184   :  { %116 = vrot.lane.b32.xlu1 %v852_v36, %s910_s7  ;;  %v130_v62 = vld [vmem:[#allocation3] sm:$0x3] }
 0x1f6   :  { %v117_v37 = vpop.permute.xlu1 %116 }
 0x1f7   :  { %v119_v38 = vmul.f32 %v117_v37, %v100_v30 }
 0x1f9   :  { %122 = vrot.lane.b32.xlu1 %v119_v38, %s911_s3 }
 0x26b   :  { %v123_v40 = vpop.permute.xlu1 %122 }
 0x26c   :  { %125 = vst.msk [vmem:[#allocation2] sm:$0x3] %vm17_vm0, %v123_v40 }
 0x26d   :  { %126 = vst.msk [vmem:[%s1180_s4] sm:$0x3] %vm17_vm0, %v123_v40 }
 0x273   :  { %v129_v41 = vld [vmem:[#allocation2] sm:$0x3] }
 0x274   :  { %807 = vmatmul.msk.f32.vlgmr.msra.gmra.mxu2 %vm32_vm1, %v129_v41 }
 0x275   :  { %530 = vmatpush.msra.mxu2 %v940_v0 }
 0x277   :  { %531 = vmatpush.msra.mxu2 %v950_v2 }
 0x279   :  { %532 = vmatpush.msra.mxu2 %v964_v5 }
 0x27b   :  { %533 = vmatpush.msra.mxu2 %v978_v7 }
 0x2f7   :  { %v151_v43 = vpop.f32.mrf.mxu2 }
 0x2f8   :  { %v175_v44 = vadd.f32 %v174_v42, %v151_v43 }
 0x2fa   :  { %v177_v45 = vadd.f32 %v1027_v11, %v175_v44  ;;  %v816_v44 = vld [vmem:[%s1178_s0 + $0x6] sm:$0x3] }
 0x2fb   :  { %818 = vmatmul.msk.f32.vlgmr.msrb.gmra.mxu3 %vm32_vm1, %v816_v44 }
 0x2fc   :  { %853 = vtanh.f32 %v177_v45  ;;  %v809_v47 = vmul.f32 -1.442695, %v177_v45  ;;  %745 = vmatpush.msrb.mxu3 %v945_v1 }
 0x2fe   :  { %855 = vpow2.f32 %v809_v47  ;;  %746 = vmatpush.msrb.mxu3 %v958_v4 }
 0x300   :  { %747 = vmatpush.msrb.mxu3 %v969_v6 }
 0x302   :  { %v854_v46 = vpop.eup %853  ;;  %748 = vmatpush.msrb.mxu3 %v983_v8 }
 0x303   :  { %200 = vrot.lane.b32.xlu2 %v854_v46, %s910_s7 }
 0x304   :  { %v856_v48 = vpop.eup %855 }
 0x305   :  { %v181_v49 = vadd.f32 1.0, %v856_v48 }
 0x307   :  { %857 = vrcp.f32 %v181_v49  ;;  %v193_v55 = vand.u32 2147483648, %v181_v49  ;;  %vm187_vm7 = vweird.f32 %v181_v49  ;;  %v191_v56 = vand.u32 2147483647, %v181_v49 }
 0x309   :  { %v194_v58 = vor.u32 1.1754944e-38, %v193_v55  ;;  %vm192_vm9 = vcmp.eq.f32.partialorder %v191_v56, 8.507059e+37 }
 0x30d   :  { %v858_v50 = vpop.eup %857 }
 0x30e   :  { %v183_v51 = vmul.f32 %v858_v50, %v181_v49  ;;  %vm188_vm6 = vweird.f32 %v858_v50 }
 0x30f   :  { %vm189_vm8 = vmor %vm187_vm7, %vm188_vm6 }
 0x310   :  { %v184_v52 = vsub.f32 1.0, %v183_v51 }
 0x312   :  { %v185_v53 = vmul.f32 %v858_v50, %v184_v52 }
 0x314   :  { %v186_v54 = vadd.f32 %v858_v50, %v185_v53 }
 0x316   :  { %v190_v57 = vsel %vm189_vm8, %v858_v50, %v186_v54 }
 0x317   :  { %v195_v60 = vsel %vm192_vm9, %v194_v58, %v190_v57 }
 0x318   :  { %v198_v63 = vmul.f32 %v195_v60, %v130_v62 }
 0x35d   :  { %v201_v59 = vpop.permute.xlu2 %200 }
 0x35e   :  { %v203_v61 = vmul.f32 %v201_v59, %v195_v60 }
 0x360   :  { %205 = vrot.lane.b32.xlu2 %v203_v61, %s910_s7 }
 0x37e   :  { %v366_v1 = vpop.f32.mrf.mxu3 }
 0x3ba   :  { %v206_v3 = vpop.permute.xlu2 %205 }
 0x3bb   :  { %v208_v9 = vadd.f32 %v206_v3, %v198_v63 }
 0x3bd   :  { %859 = vtanh.f32 %v208_v9  ;;  %215 = vst.msk [vmem:[#allocation3] sm:$0x3] %vm17_vm0, %v208_v9 }
 0x3c3   :  { %v860_v10 = vpop.eup %859 }
 0x3c4   :  { %211 = vrot.lane.b32.xlu0 %v860_v10, %s910_s7  ;;  %v226_v37 = vld [vmem:[#allocation3] sm:$0x3]  ;;  %v821_v10 = vld [vmem:[%s1178_s0 + $0x8] sm:$0x3] }
 0x3c5   :  { %823 = vmatmul.msk.f32.vlgmr.msra.gmra.mxu1 %vm32_vm1, %v821_v10 }
 0x436   :  { %v212_v12 = vpop.permute.xlu0 %211 }
 0x437   :  { %v214_v13 = vmul.f32 %v212_v12, %v195_v60 }
 0x439   :  { %217 = vrot.lane.b32.xlu1 %v214_v13, %s911_s3 }
 0x442   :  { %v462_v14 = vpop.f32.mrf.mxu1 }
 0x4ab   :  { %v218_v15 = vpop.permute.xlu1 %217 }
 0x4ac   :  { %220 = vst.msk [vmem:[#allocation2] sm:$0x3] %vm17_vm0, %v218_v15 }
 0x4ad   :  { %810 = vst.msk [vmem:[%s1180_s4 + $0x2] sm:$0x3] %vm17_vm0, %v218_v15 }
 0x4b3   :  { %v225_v16 = vld [vmem:[#allocation2] sm:$0x3] }
 0x4b4   :  { %812 = vmatmul.msk.f32.vlgmr.msrb.gmra.mxu0 %vm32_vm1, %v225_v16 }
 0x4b5   :  { %626 = vmatpush.msrb.mxu0 %v940_v0 }
 0x4b7   :  { %627 = vmatpush.msrb.mxu0 %v950_v2 }
 0x4b9   :  { %628 = vmatpush.msrb.mxu0 %v964_v5 }
 0x4bb   :  { %629 = vmatpush.msrb.mxu0 %v978_v7 }
 0x531   :  { %v247_v18 = vpop.f32.mrf.mxu0 }
 0x532   :  { %v271_v19 = vadd.f32 %v270_v17, %v247_v18 }
 0x534   :  { %v273_v20 = vadd.f32 %v1027_v11, %v271_v19 }
 0x536   :  { %861 = vtanh.f32 %v273_v20  ;;  %v814_v22 = vmul.f32 -1.442695, %v273_v20 }
 0x538   :  { %863 = vpow2.f32 %v814_v22 }
 0x53c   :  { %v862_v21 = vpop.eup %861 }
 0x53d   :  { %296 = vrot.lane.b32.xlu2 %v862_v21, %s910_s7 }
 0x53e   :  { %v864_v23 = vpop.eup %863 }
 0x53f   :  { %v277_v24 = vadd.f32 1.0, %v864_v23 }
 0x541   :  { %865 = vrcp.f32 %v277_v24  ;;  %v289_v30 = vand.u32 2147483648, %v277_v24  ;;  %vm283_vm11 = vweird.f32 %v277_v24  ;;  %v287_v31 = vand.u32 2147483647, %v277_v24 }
 0x543   :  { %v290_v33 = vor.u32 1.1754944e-38, %v289_v30  ;;  %vm288_vm13 = vcmp.eq.f32.partialorder %v287_v31, 8.507059e+37 }
 0x547   :  { %v866_v25 = vpop.eup %865 }
 0x548   :  { %v279_v26 = vmul.f32 %v866_v25, %v277_v24  ;;  %vm284_vm10 = vweird.f32 %v866_v25 }
 0x549   :  { %vm285_vm12 = vmor %vm283_vm11, %vm284_vm10 }
 0x54a   :  { %v280_v27 = vsub.f32 1.0, %v279_v26 }
 0x54c   :  { %v281_v28 = vmul.f32 %v866_v25, %v280_v27 }
 0x54e   :  { %v282_v29 = vadd.f32 %v866_v25, %v281_v28 }
 0x550   :  { %v286_v32 = vsel %vm285_vm12, %v866_v25, %v282_v29 }
 0x551   :  { %v291_v35 = vsel %vm288_vm13, %v290_v33, %v286_v32 }
 0x552   :  { %v294_v38 = vmul.f32 %v291_v35, %v226_v37 }
 0x597   :  { %v297_v34 = vpop.permute.xlu2 %296 }
 0x598   :  { %v299_v36 = vmul.f32 %v297_v34, %v291_v35 }
 0x59a   :  { %301 = vrot.lane.b32.xlu0 %v299_v36, %s910_s7 }
 0x60c   :  { %v302_v39 = vpop.permute.xlu0 %301 }
 0x60d   :  { %v304_v40 = vadd.f32 %v302_v39, %v294_v38 }
 0x60f   :  { %867 = vtanh.f32 %v304_v40  ;;  %311 = vst.msk [vmem:[#allocation3] sm:$0x3] %vm17_vm0, %v304_v40 }
 0x615   :  { %v868_v41 = vpop.eup %867 }
 0x616   :  { %307 = vrot.lane.b32.xlu1 %v868_v41, %s910_s7  ;;  %v322_v59 = vld [vmem:[#allocation3] sm:$0x3]  ;;  %v826_v41 = vld [vmem:[%s1178_s0 + $0xa] sm:$0x3] }
 0x617   :  { %828 = vmatmul.msk.f32.vlgmr.msra.gmra.mxu3 %vm32_vm1, %v826_v41 }
 0x688   :  { %v308_v42 = vpop.permute.xlu1 %307 }
 0x689   :  { %v310_v43 = vmul.f32 %v308_v42, %v291_v35 }
 0x68b   :  { %313 = vrot.lane.b32.xlu2 %v310_v43, %s911_s3 }
 0x69a   :  { %v558_v44 = vpop.f32.mrf.mxu3 }
 0x6e5   :  { %v314_v45 = vpop.permute.xlu2 %313 }
 0x6e6   :  { %316 = vst.msk [vmem:[#allocation2] sm:$0x3] %vm17_vm0, %v314_v45 }
 0x6e7   :  { %815 = vst.msk [vmem:[%s1180_s4 + $0x4] sm:$0x3] %vm17_vm0, %v314_v45 }
 0x6ed   :  { %v321_v46 = vld [vmem:[#allocation2] sm:$0x3] }
 0x6ee   :  { %817 = vmatmul.msk.f32.vlgmr.msrb.gmra.mxu2 %vm32_vm1, %v321_v46 }
 0x6ef   :  { %722 = vmatpush.msrb.mxu2 %v940_v0 }
 0x6f1   :  { %723 = vmatpush.msrb.mxu2 %v950_v2 }
 0x6f3   :  { %724 = vmatpush.msrb.mxu2 %v964_v5 }
 0x6f5   :  { %725 = vmatpush.msrb.mxu2 %v978_v7 }
 0x771   :  { %v343_v4 = vpop.f32.mrf.mxu2 }
 0x772   :  { %v367_v6 = vadd.f32 %v366_v1, %v343_v4 }
 0x774   :  { %v369_v8 = vadd.f32 %v1027_v11, %v367_v6 }
 0x776   :  { %869 = vtanh.f32 %v369_v8  ;;  %v819_v48 = vmul.f32 -1.442695, %v369_v8 }
 0x778   :  { %871 = vpow2.f32 %v819_v48 }
 0x77c   :  { %v870_v47 = vpop.eup %869 }
 0x77d   :  { %392 = vrot.lane.b32.xlu0 %v870_v47, %s910_s7 }
 0x77e   :  { %v872_v49 = vpop.eup %871 }
 0x77f   :  { %v373_v50 = vadd.f32 1.0, %v872_v49 }
 0x781   :  { %873 = vrcp.f32 %v373_v50  ;;  %v385_v7 = vand.u32 2147483648, %v373_v50  ;;  %vm379_vm15 = vweird.f32 %v373_v50  ;;  %v383_v53 = vand.u32 2147483647, %v373_v50 }
 0x783   :  { %v386_v55 = vor.u32 1.1754944e-38, %v385_v7  ;;  %vm384_vm3 = vcmp.eq.f32.partialorder %v383_v53, 8.507059e+37 }
 0x787   :  { %v874_v0 = vpop.eup %873 }
 0x788   :  { %v375_v2 = vmul.f32 %v874_v0, %v373_v50  ;;  %vm380_vm14 = vweird.f32 %v874_v0 }
 0x789   :  { %vm381_vm2 = vmor %vm379_vm15, %vm380_vm14 }
 0x78a   :  { %v376_v51 = vsub.f32 1.0, %v375_v2 }
 0x78c   :  { %v377_v5 = vmul.f32 %v874_v0, %v376_v51 }
 0x78e   :  { %v378_v52 = vadd.f32 %v874_v0, %v377_v5 }
 0x790   :  { %v382_v54 = vsel %vm381_vm2, %v874_v0, %v378_v52 }
 0x791   :  { %v387_v57 = vsel %vm384_vm3, %v386_v55, %v382_v54 }
 0x792   :  { %v390_v60 = vmul.f32 %v387_v57, %v322_v59 }
 0x7ef   :  { %v393_v56 = vpop.permute.xlu0 %392 }
 0x7f0   :  { %v395_v58 = vmul.f32 %v393_v56, %v387_v57 }
 0x7f2   :  { %397 = vrot.lane.b32.xlu1 %v395_v58, %s910_s7 }
 0x864   :  { %v398_v61 = vpop.permute.xlu1 %397 }
 0x865   :  { %v400_v62 = vadd.f32 %v398_v61, %v390_v60 }
 0x867   :  { %875 = vtanh.f32 %v400_v62  ;;  %407 = vst.msk [vmem:[#allocation3] sm:$0x3] %vm17_vm0, %v400_v62 }
 0x86d   :  { %v876_v63 = vpop.eup %875 }
 0x86e   :  { %403 = vrot.lane.b32.xlu2 %v876_v63, %s910_s7  ;;  %v418_v34 = vld [vmem:[#allocation3] sm:$0x3]  ;;  %v831_v63 = vld [vmem:[%s1178_s0 + $0xc] sm:$0x3] }
 0x86f   :  { %833 = vmatmul.msk.f32.vlgmr.msrb.gmra.mxu1 %vm32_vm1, %v831_v63 }
 0x8c8   :  { %v404_v3 = vpop.permute.xlu2 %403 }
 0x8c9   :  { %v406_v9 = vmul.f32 %v404_v3, %v387_v57 }
 0x8cb   :  { %409 = vrot.lane.b32.xlu0 %v406_v9, %s911_s3 }
 0x8ec   :  { %v654_v10 = vpop.f32.mrf.mxu1 }
 0x93d   :  { %v410_v12 = vpop.permute.xlu0 %409 }
 0x93e   :  { %412 = vst.msk [vmem:[#allocation2] sm:$0x3] %vm17_vm0, %v410_v12 }
 0x93f   :  { %820 = vst.msk [vmem:[%s1180_s4 + $0x6] sm:$0x3] %vm17_vm0, %v410_v12 }
 0x945   :  { %v417_v13 = vld [vmem:[#allocation2] sm:$0x3] }
 0x946   :  { %822 = vmatmul.msk.f32.vlgmr.msra.gmra.mxu0 %vm32_vm1, %v417_v13 }
 0x9c3   :  { %v439_v15 = vpop.f32.mrf.mxu0 }
 0x9c4   :  { %v463_v16 = vadd.f32 %v462_v14, %v439_v15 }
 0x9c6   :  { %v465_v17 = vadd.f32 %v1027_v11, %v463_v16 }
 0x9c8   :  { %877 = vtanh.f32 %v465_v17  ;;  %v824_v19 = vmul.f32 -1.442695, %v465_v17 }
 0x9ca   :  { %879 = vpow2.f32 %v824_v19 }
 0x9ce   :  { %v878_v18 = vpop.eup %877 }
 0x9cf   :  { %488 = vrot.lane.b32.xlu1 %v878_v18, %s910_s7 }
 0x9d0   :  { %v880_v20 = vpop.eup %879 }
 0x9d1   :  { %v469_v21 = vadd.f32 1.0, %v880_v20 }
 0x9d3   :  { %881 = vrcp.f32 %v469_v21  ;;  %v481_v27 = vand.u32 2147483648, %v469_v21  ;;  %vm475_vm5 = vweird.f32 %v469_v21  ;;  %v479_v28 = vand.u32 2147483647, %v469_v21 }
 0x9d5   :  { %v482_v30 = vor.u32 1.1754944e-38, %v481_v27  ;;  %vm480_vm7 = vcmp.eq.f32.partialorder %v479_v28, 8.507059e+37 }
 0x9d9   :  { %v882_v22 = vpop.eup %881 }
 0x9da   :  { %v471_v23 = vmul.f32 %v882_v22, %v469_v21  ;;  %vm476_vm4 = vweird.f32 %v882_v22 }
 0x9db   :  { %vm477_vm6 = vmor %vm475_vm5, %vm476_vm4 }
 0x9dc   :  { %v472_v24 = vsub.f32 1.0, %v471_v23 }
 0x9de   :  { %v473_v25 = vmul.f32 %v882_v22, %v472_v24 }
 0x9e0   :  { %v474_v26 = vadd.f32 %v882_v22, %v473_v25 }
 0x9e2   :  { %v478_v29 = vsel %vm477_vm6, %v882_v22, %v474_v26 }
 0x9e3   :  { %v483_v32 = vsel %vm480_vm7, %v482_v30, %v478_v29 }
 0x9e4   :  { %v486_v35 = vmul.f32 %v483_v32, %v418_v34 }
 0xa41   :  { %v489_v31 = vpop.permute.xlu1 %488 }
 0xa42   :  { %v491_v33 = vmul.f32 %v489_v31, %v483_v32 }
 0xa44   :  { %493 = vrot.lane.b32.xlu2 %v491_v33, %s910_s7 }
 0xa9e   :  { %v494_v36 = vpop.permute.xlu2 %493 }
 0xa9f   :  { %v496_v37 = vadd.f32 %v494_v36, %v486_v35 }
 0xaa1   :  { %883 = vtanh.f32 %v496_v37  ;;  %503 = vst.msk [vmem:[#allocation3] sm:$0x3] %vm17_vm0, %v496_v37 }
 0xaa7   :  { %v884_v38 = vpop.eup %883 }
 0xaa8   :  { %499 = vrot.lane.b32.xlu0 %v884_v38, %s910_s7  ;;  %v514_v56 = vld [vmem:[#allocation3] sm:$0x3]  ;;  %v836_v38 = vld [vmem:[%s1178_s0 + $0xe] sm:$0x3] }
 0xaa9   :  { %838 = vmatmul.msk.f32.vlgmr.msrb.gmra.mxu3 %vm32_vm1, %v836_v38 }
 0xb1a   :  { %v500_v39 = vpop.permute.xlu0 %499 }
 0xb1b   :  { %v502_v40 = vmul.f32 %v500_v39, %v483_v32 }
 0xb1d   :  { %505 = vrot.lane.b32.xlu1 %v502_v40, %s911_s3 }
 0xb2c   :  { %v750_v41 = vpop.f32.mrf.mxu3 }
 0xb8f   :  { %v506_v42 = vpop.permute.xlu1 %505 }
 0xb90   :  { %508 = vst.msk [vmem:[#allocation2] sm:$0x3] %vm17_vm0, %v506_v42 }
 0xb91   :  { %825 = vst.msk [vmem:[%s1180_s4 + $0x8] sm:$0x3] %vm17_vm0, %v506_v42 }
 0xb97   :  { %v513_v43 = vld [vmem:[#allocation2] sm:$0x3] }
 0xb98   :  { %827 = vmatmul.msk.f32.vlgmr.msra.gmra.mxu2 %vm32_vm1, %v513_v43 }
 0xc1b   :  { %v535_v45 = vpop.f32.mrf.mxu2 }
 0xc1c   :  { %v559_v46 = vadd.f32 %v558_v44, %v535_v45 }
 0xc1e   :  { %v561_v1 = vadd.f32 %v1027_v11, %v559_v46 }
 0xc20   :  { %885 = vtanh.f32 %v561_v1  ;;  %v829_v6 = vmul.f32 -1.442695, %v561_v1 }
 0xc22   :  { %887 = vpow2.f32 %v829_v6 }
 0xc26   :  { %v886_v4 = vpop.eup %885 }
 0xc27   :  { %584 = vrot.lane.b32.xlu2 %v886_v4, %s910_s7 }
 0xc28   :  { %v888_v8 = vpop.eup %887 }
 0xc29   :  { %v565_v47 = vadd.f32 1.0, %v888_v8 }
 0xc2b   :  { %889 = vrcp.f32 %v565_v47  ;;  %v577_v51 = vand.u32 2147483648, %v565_v47  ;;  %vm571_vm9 = vweird.f32 %v565_v47  ;;  %v575_v5 = vand.u32 2147483647, %v565_v47 }
 0xc2d   :  { %v578_v7 = vor.u32 1.1754944e-38, %v577_v51  ;;  %vm576_vm11 = vcmp.eq.f32.partialorder %v575_v5, 8.507059e+37 }
 0xc31   :  { %v890_v48 = vpop.eup %889 }
 0xc32   :  { %v567_v49 = vmul.f32 %v890_v48, %v565_v47  ;;  %vm572_vm8 = vweird.f32 %v890_v48 }
 0xc33   :  { %vm573_vm10 = vmor %vm571_vm9, %vm572_vm8 }
 0xc34   :  { %v568_v50 = vsub.f32 1.0, %v567_v49 }
 0xc36   :  { %v569_v0 = vmul.f32 %v890_v48, %v568_v50 }
 0xc38   :  { %v570_v2 = vadd.f32 %v890_v48, %v569_v0 }
 0xc3a   :  { %v574_v52 = vsel %vm573_vm10, %v890_v48, %v570_v2 }
 0xc3b   :  { %v579_v54 = vsel %vm576_vm11, %v578_v7, %v574_v52 }
 0xc3c   :  { %v582_v57 = vmul.f32 %v579_v54, %v514_v56 }
 0xc81   :  { %v585_v53 = vpop.permute.xlu2 %584 }
 0xc82   :  { %v587_v55 = vmul.f32 %v585_v53, %v579_v54 }
 0xc84   :  { %589 = vrot.lane.b32.xlu0 %v587_v55, %s910_s7 }
 0xcf6   :  { %v590_v58 = vpop.permute.xlu0 %589 }
 0xcf7   :  { %v592_v59 = vadd.f32 %v590_v58, %v582_v57 }
 0xcf9   :  { %891 = vtanh.f32 %v592_v59  ;;  %599 = vst.msk [vmem:[#allocation3] sm:$0x3] %vm17_vm0, %v592_v59 }
 0xcff   :  { %v892_v60 = vpop.eup %891 }
 0xd00   :  { %595 = vrot.lane.b32.xlu1 %v892_v60, %s910_s7  ;;  %v610_v31 = vld [vmem:[#allocation3] sm:$0x3] }
 0xd72   :  { %v596_v61 = vpop.permute.xlu1 %595 }
 0xd73   :  { %v598_v62 = vmul.f32 %v596_v61, %v579_v54 }
 0xd75   :  { %601 = vrot.lane.b32.xlu2 %v598_v62, %s911_s3 }
 0xdcf   :  { %v602_v3 = vpop.permute.xlu2 %601 }
 0xdd0   :  { %604 = vst.msk [vmem:[#allocation2] sm:$0x3] %vm17_vm0, %v602_v3 }
 0xdd1   :  { %830 = vst.msk [vmem:[%s1180_s4 + $0xa] sm:$0x3] %vm17_vm0, %v602_v3 }
 0xdd7   :  { %v609_v9 = vld [vmem:[#allocation2] sm:$0x3] }
 0xdd8   :  { %832 = vmatmul.msk.f32.vlgmr.msrb.gmra.mxu0 %vm32_vm1, %v609_v9 }
 0xe55   :  { %v631_v12 = vpop.f32.mrf.mxu0 }
 0xe56   :  { %v655_v13 = vadd.f32 %v654_v10, %v631_v12 }
 0xe58   :  { %v657_v14 = vadd.f32 %v1027_v11, %v655_v13 }
 0xe5a   :  { %893 = vtanh.f32 %v657_v14  ;;  %v834_v16 = vmul.f32 -1.442695, %v657_v14 }
 0xe5c   :  { %895 = vpow2.f32 %v834_v16 }
 0xe60   :  { %v894_v15 = vpop.eup %893 }
 0xe61   :  { %680 = vrot.lane.b32.xlu0 %v894_v15, %s910_s7 }
 0xe62   :  { %v896_v17 = vpop.eup %895 }
 0xe63   :  { %v661_v18 = vadd.f32 1.0, %v896_v17 }
 0xe65   :  { %897 = vrcp.f32 %v661_v18  ;;  %v673_v24 = vand.u32 2147483648, %v661_v18  ;;  %vm667_vm13 = vweird.f32 %v661_v18  ;;  %v671_v25 = vand.u32 2147483647, %v661_v18 }
 0xe67   :  { %v674_v27 = vor.u32 1.1754944e-38, %v673_v24  ;;  %vm672_vm15 = vcmp.eq.f32.partialorder %v671_v25, 8.507059e+37 }
 0xe6b   :  { %v898_v19 = vpop.eup %897 }
 0xe6c   :  { %v663_v20 = vmul.f32 %v898_v19, %v661_v18  ;;  %vm668_vm12 = vweird.f32 %v898_v19 }
 0xe6d   :  { %vm669_vm14 = vmor %vm667_vm13, %vm668_vm12 }
 0xe6e   :  { %v664_v21 = vsub.f32 1.0, %v663_v20 }
 0xe70   :  { %v665_v22 = vmul.f32 %v898_v19, %v664_v21 }
 0xe72   :  { %v666_v23 = vadd.f32 %v898_v19, %v665_v22 }
 0xe74   :  { %v670_v26 = vsel %vm669_vm14, %v898_v19, %v666_v23 }
 0xe75   :  { %v675_v29 = vsel %vm672_vm15, %v674_v27, %v670_v26 }
 0xe76   :  { %v678_v32 = vmul.f32 %v675_v29, %v610_v31 }
 0xed3   :  { %v681_v28 = vpop.permute.xlu0 %680 }
 0xed4   :  { %v683_v30 = vmul.f32 %v681_v28, %v675_v29 }
 0xed6   :  { %685 = vrot.lane.b32.xlu1 %v683_v30, %s910_s7 }
 0xf48   :  { %v686_v33 = vpop.permute.xlu1 %685 }
 0xf49   :  { %v688_v34 = vadd.f32 %v686_v33, %v678_v32 }
 0xf4b   :  { %899 = vtanh.f32 %v688_v34  ;;  %695 = vst.msk [vmem:[#allocation3] sm:$0x3] %vm17_vm0, %v688_v34 }
 0xf51   :  { %v900_v35 = vpop.eup %899 }
 0xf52   :  { %691 = vrot.lane.b32.xlu2 %v900_v35, %s910_s7  ;;  %v706_v7 = vld [vmem:[#allocation3] sm:$0x3] }
 0xfac   :  { %v692_v36 = vpop.permute.xlu2 %691 }
 0xfad   :  { %v694_v37 = vmul.f32 %v692_v36, %v675_v29 }
 0xfaf   :  { %697 = vrot.lane.b32.xlu0 %v694_v37, %s911_s3 }
0x1021   :  { %v698_v39 = vpop.permute.xlu0 %697 }
0x1022   :  { %700 = vst.msk [vmem:[#allocation2] sm:$0x3] %vm17_vm0, %v698_v39 }
0x1023   :  { %835 = vst.msk [vmem:[%s1180_s4 + $0xc] sm:$0x3] %vm17_vm0, %v698_v39 }
0x1029   :  { %v705_v40 = vld [vmem:[#allocation2] sm:$0x3] }
0x102a   :  { %837 = vmatmul.msk.f32.vlgmr.msrb.gmra.mxu2 %vm32_vm1, %v705_v40 }
0x10ad   :  { %v727_v42 = vpop.f32.mrf.mxu2 }
0x10ae   :  { %v751_v43 = vadd.f32 %v750_v41, %v727_v42 }
0x10b0   :  { %v753_v44 = vadd.f32 %v1027_v11, %v751_v43 }
0x10b2   :  { %901 = vtanh.f32 %v753_v44  ;;  %v839_v46 = vmul.f32 -1.442695, %v753_v44 }
0x10b4   :  { %903 = vpow2.f32 %v839_v46 }
0x10b8   :  { %v902_v45 = vpop.eup %901 }
0x10b9   :  { %776 = vrot.lane.b32.xlu1 %v902_v45, %s910_s7 }
0x10ba   :  { %v904_v1 = vpop.eup %903 }
0x10bb   :  { %v757_v4 = vadd.f32 1.0, %v904_v1 }
0x10bd   :  { %905 = vrcp.f32 %v757_v4  ;;  %v769_v50 = vand.u32 2147483648, %v757_v4  ;;  %vm763_vm2 = vweird.f32 %v757_v4  ;;  %v767_v0 = vand.u32 2147483647, %v757_v4 }
0x10bf   :  { %v770_v2 = vor.u32 1.1754944e-38, %v769_v50  ;;  %vm768_vm4 = vcmp.eq.f32.partialorder %v767_v0, 8.507059e+37 }
0x10c3   :  { %v906_v6 = vpop.eup %905 }
0x10c4   :  { %v759_v8 = vmul.f32 %v906_v6, %v757_v4  ;;  %vm764_vm1 = vweird.f32 %v906_v6 }
0x10c5   :  { %vm765_vm3 = vmor %vm763_vm2, %vm764_vm1 }
0x10c6   :  { %v760_v47 = vsub.f32 1.0, %v759_v8 }
0x10c8   :  { %v761_v48 = vmul.f32 %v906_v6, %v760_v47 }
0x10ca   :  { %v762_v49 = vadd.f32 %v906_v6, %v761_v48 }
0x10cc   :  { %v766_v11 = vsel %vm765_vm3, %v906_v6, %v762_v49 }
0x10cd   :  { %v771_v5 = vsel %vm768_vm4, %v770_v2, %v766_v11 }
0x10ce   :  { %v774_v53 = vmul.f32 %v771_v5, %v706_v7 }
0x112b   :  { %v777_v51 = vpop.permute.xlu1 %776 }
0x112c   :  { %v779_v52 = vmul.f32 %v777_v51, %v771_v5 }
0x112e   :  { %781 = vrot.lane.b32.xlu2 %v779_v52, %s910_s7 }
0x1188   :  { %v782_v54 = vpop.permute.xlu2 %781 }
0x1189   :  { %v784_v55 = vadd.f32 %v782_v54, %v774_v53 }
0x118b   :  { %907 = vtanh.f32 %v784_v55  ;;  %791 = vst.msk [vmem:[#allocation3] sm:$0x3] %vm17_vm0, %v784_v55 }
0x1191   :  { %v908_v56 = vpop.eup %907 }
0x1192   :  { %787 = vrot.lane.b32.xlu0 %v908_v56, %s910_s7 }
0x1204   :  { %v788_v57 = vpop.permute.xlu0 %787 }
0x1205   :  { %v790_v58 = vmul.f32 %v788_v57, %v771_v5 }
0x1207   :  { %793 = vrot.lane.b32.xlu1 %v790_v58, %s911_s3 }
0x1279   :  { %v794_v59 = vpop.permute.xlu1 %793 }
0x127a   :  { %796 = vst.msk [vmem:[#allocation2] sm:$0x3] %vm17_vm0, %v794_v59 }
0x127b   :  { %840 = vst.msk [vmem:[%s1180_s4 + $0xe] sm:$0x3] %vm17_vm0, %v794_v59 }

</bundles_post_ra>
